<compile_context>
chip_gen: v6e
topology: v6e:2x2x1
jax: 0.10.0
libtpu: 0.0.40
codegen_flags: <defaults>
</compile_context>

<pallas_src>
import functools

import jax
import jax.numpy as jnp
import numpy as np
from jax import lax
from jax.experimental import pallas as pl
from jax.experimental.pallas import tpu as pltpu

KSZ = 3   # conv kernel size (both convs)
C1 = 16   # conv1 output channels
C2 = 32   # conv2 output channels


# ------------------------------ fused kernel ---------------------------------
def fused_forward_kernel(x_ref, w1b_ref, b1r_ref, w2b_ref, b2r_ref,
                         wl1_ref, bl1_ref, wl2_ref, bl2_ref, wl3_ref, bl3_ref,
                         out_ref,
                         hconv_ref, acc2_ref):
    """One grid step = one contiguous output-column tile of linear-1.

    Step 0 additionally runs both convs (as banded matmuls) and writes the
    flattened NHWC conv output into VMEM scratch; the last step applies
    linear-2's bias/ReLU and linear-3.  out_ref has a constant block index, so
    it is written back exactly once (after the last step).
    """
    j = pl.program_id(0)
    nj = pl.num_programs(0)

    B, rows, cols = x_ref.shape
    ho1 = rows - KSZ + 1                 # conv1 output rows
    ho2 = ho1 - KSZ + 1                  # conv2 output rows
    row_len = w2b_ref.shape[2]           # wo2 * C2 lanes per conv2 output row

    # -------- convs: run once, flattened result cached in VMEM scratch -------
    @pl.when(j == 0)
    def _convs():
        for b in range(B):               # B is tiny here; see TODO(synk) above
            xb = x_ref[b].astype(jnp.bfloat16)              # (rows, cols)

            # conv1 as 3 banded matmuls: h1[i, j*C1+co] (NHWC row layout).
            h1 = jnp.dot(xb[0:ho1, :], w1b_ref[0],
                         preferred_element_type=jnp.float32)
            for kh in range(1, KSZ):
                h1 = h1 + jnp.dot(xb[kh:kh + ho1, :], w1b_ref[kh],
                                  preferred_element_type=jnp.float32)
            h1 = jnp.maximum(h1 + b1r_ref[...], 0.0)        # f32 bias/ReLU
            h1 = h1.astype(jnp.bfloat16)                    # (ho1, wo1*C1)

            # conv2 as 3 banded matmuls: h2[i2, j2*C2+co2] (NHWC row layout).
            h2 = jnp.dot(h1[0:ho2, :], w2b_ref[0],
                         preferred_element_type=jnp.float32)
            for kh in range(1, KSZ):
                h2 = h2 + jnp.dot(h1[kh:kh + ho2, :], w2b_ref[kh],
                                  preferred_element_type=jnp.float32)
            h2 = jnp.maximum(h2 + b2r_ref[...], 0.0)        # (ho2, wo2*C2) f32

            # Flatten (h, w, c) = NHWC order with wide, lane-aligned row stores
            # (w_lin1's rows were pre-permuted to this order at prep time).
            for i in range(ho2):
                hconv_ref[b:b + 1, i * row_len:(i + 1) * row_len] = h2[i:i + 1, :]

        acc2_ref[...] = jnp.zeros_like(acc2_ref)

    # -------- linear 1 (bf16 weights, f32 accumulate) + f32 bias/ReLU ---------
    y1 = jnp.dot(hconv_ref[...].astype(jnp.bfloat16), wl1_ref[...],
                 preferred_element_type=jnp.float32)
    y1 = jnp.maximum(y1 + bl1_ref[...], 0.0)

    # -------- linear 2: accumulate partial K-contraction over lin1 tiles -----
    acc2_ref[...] += jnp.dot(y1, wl2_ref[...], preferred_element_type=jnp.float32)

    # -------- linear 2 bias/ReLU + linear 3 on the last step ------------------
    @pl.when(j == nj - 1)
    def _head():
        y2 = jnp.maximum(acc2_ref[...] + bl2_ref[...], 0.0)
        y3 = jnp.dot(y2, wl3_ref[...],
                     preferred_element_type=jnp.float32) + bl3_ref[...]
        out_ref[...] = y3.astype(out_ref.dtype)


# ------------------------------ wrapper ---------------------------------------
def conv_nn_forward(prepared, x, rows, cols):
    """x: (B, rows*cols) float32 -> (B, n_act) float32 logits."""
    B = x.shape[0]
    x3 = x.reshape(B, rows, cols)        # Cin == 1, so NCHW == this layout

    ho1, wo1 = rows - KSZ + 1, cols - KSZ + 1
    ho2, wo2 = ho1 - KSZ + 1, wo1 - KSZ + 1
    k_conv = ho2 * wo2 * C2              # flattened conv output size

    nt, kc, tn = prepared["w_lin1"].shape
    assert kc == k_conv
    h1_dim = nt * tn
    h2_dim = prepared["w_lin2"].shape[1]
    n_act = prepared["b_lin3"].shape[-1]

    grid_spec = pltpu.PrefetchScalarGridSpec(
        num_scalar_prefetch=0,
        grid=(nt,),
        in_specs=[
            pl.BlockSpec((B, rows, cols), lambda j: (0, 0, 0)),            # x
            pl.BlockSpec(prepared["w1band"].shape, lambda j: (0, 0, 0)),   # conv1 band (bf16)
            pl.BlockSpec(prepared["b_conv1_row"].shape, lambda j: (0, 0)), # conv1 bias row
            pl.BlockSpec(prepared["w2band"].shape, lambda j: (0, 0, 0)),   # conv2 band (bf16)
            pl.BlockSpec(prepared["b_conv2_row"].shape, lambda j: (0, 0)), # conv2 bias row
            pl.BlockSpec((None, k_conv, tn), lambda j: (j, 0, 0)),         # w_lin1 tile (bf16, contiguous)
            pl.BlockSpec((1, tn), lambda j: (0, j)),                       # b_lin1 tile
            pl.BlockSpec((tn, h2_dim), lambda j: (j, 0)),                  # w_lin2 K tile
            pl.BlockSpec((1, h2_dim), lambda j: (0, 0)),                   # b_lin2
            pl.BlockSpec((h2_dim, n_act), lambda j: (0, 0)),               # w_lin3
            pl.BlockSpec((1, n_act), lambda j: (0, 0)),                    # b_lin3
        ],
        out_specs=pl.BlockSpec((B, n_act), lambda j: (0, 0)),
        scratch_shapes=[
            pltpu.VMEM((B, k_conv), jnp.float32),   # flattened conv output (resident)
            pltpu.VMEM((B, h2_dim), jnp.float32),   # lin2 accumulator
        ],
    )
    # Total VMEM footprint (16x16 case) ~6.5 MB incl. double buffering, well
    # under the scoped defaults of v5e/v6e/v7x; no vmem_limit_bytes needed.
    return pl.pallas_call(
        fused_forward_kernel,
        out_shape=jax.ShapeDtypeStruct((B, n_act), jnp.float32),
        grid_spec=grid_spec,
        compiler_params=pltpu.CompilerParams(
            dimension_semantics=("arbitrary",)),    # accumulator carried across tiles
    )(x3, prepared["w1band"], prepared["b_conv1_row"],
      prepared["w2band"], prepared["b_conv2_row"],
      prepared["w_lin1"], prepared["b_lin1"],
      prepared["w_lin2"], prepared["b_lin2"],
      prepared["w_lin3"], prepared["b_lin3"])


# ------------------------- parameter preparation ------------------------------
def _pick_lin1_tile(h1_dim, k_conv, itemsize, vmem_budget_bytes=6 << 20):
    """Largest lin1 output-column tile that (a) divides h1_dim, (b) is a
    multiple of 128, (c) fits double-buffered inside a conservative VMEM
    budget, and (d) keeps >= 2 grid steps so the weight DMA pipelines."""
    cands = [t for t in range(128, h1_dim + 1, 128) if h1_dim % t == 0]
    if not cands:
        # TODO(synk): pad h1_dim to a multiple of 128 for odd problem sizes
        # instead of falling back to one monolithic block.
        return h1_dim
    fits = [t for t in cands if 2 * t * k_conv * itemsize <= vmem_budget_bytes]
    pool = fits if fits else cands[:1]
    # TODO(synk): very large conv outputs (e.g. Atari 84x84) also need K-tiling
    # of lin1; out of scope for this problem size.
    multi = [t for t in pool if h1_dim // t >= 2]
    return max(multi if multi else pool)


def _band_conv1(w1_hwio, cols):
    """Banded (Toeplitz) conv1 weight: (KSZ, cols, wo1*C1), bf16."""
    w1 = np.asarray(w1_hwio, np.float32)          # (KSZ, KSZ, 1, C1)
    c1 = w1.shape[-1]
    wo1 = cols - KSZ + 1
    band = np.zeros((KSZ, cols, wo1 * c1), np.float32)
    for kh in range(KSZ):
        for kw in range(KSZ):
            for j in range(wo1):
                band[kh, j + kw, j * c1:(j + 1) * c1] = w1[kh, kw, 0]
    return jnp.asarray(band, jnp.bfloat16)


def _band_conv2(w2_hwio, wo1):
    """Banded (Toeplitz) conv2 weight: (KSZ, wo1*C1, wo2*C2), bf16."""
    w2 = np.asarray(w2_hwio, np.float32)          # (KSZ, KSZ, C1, C2)
    c1, c2 = w2.shape[2], w2.shape[3]
    wo2 = wo1 - KSZ + 1
    band = np.zeros((KSZ, wo1 * c1, wo2 * c2), np.float32)
    for kh in range(KSZ):
        for kw in range(KSZ):
            for j in range(wo2):
                r0 = (j + kw) * c1
                band[kh, r0:r0 + c1, j * c2:(j + 1) * c2] = w2[kh, kw]
    return jnp.asarray(band, jnp.bfloat16)


def init_params(key, rows, cols, n_act):
    """PyTorch-equivalent layout: conv weights HWIO, linear weights (in, out),
    with w_lin1 rows in PyTorch's NCHW flatten order (c, h, w)."""
    size_out_conv = C2 * (rows - 4) * (cols - 4)
    h1 = rows * cols * 2
    h2 = (rows * cols) // 2
    ks = jax.random.split(key, 10)
    s = 0.05
    return {
        "w_conv1": s * jax.random.normal(ks[0], (KSZ, KSZ, 1, C1), jnp.float32),
        "b_conv1": s * jax.random.normal(ks[1], (C1,), jnp.float32),
        "w_conv2": s * jax.random.normal(ks[2], (KSZ, KSZ, C1, C2), jnp.float32),
        "b_conv2": s * jax.random.normal(ks[3], (C2,), jnp.float32),
        "w_lin1": s * jax.random.normal(ks[4], (size_out_conv, h1), jnp.float32),
        "b_lin1": s * jax.random.normal(ks[5], (h1,), jnp.float32),
        "w_lin2": s * jax.random.normal(ks[6], (h1, h2), jnp.float32),
        "b_lin2": s * jax.random.normal(ks[7], (h2,), jnp.float32),
        "w_lin3": s * jax.random.normal(ks[8], (h2, n_act), jnp.float32),
        "b_lin3": s * jax.random.normal(ks[9], (n_act,), jnp.float32),
    }


def prepare_params(params, rows, cols):
    """One-time (outside jit) conversion into the kernel's layout.

    * conv weights become banded (Toeplitz) matrices so the kernel needs no
      im2col; conv biases become per-row (1, wo*C) vectors.
    * w_lin1's rows are permuted from PyTorch's NCHW flatten order (c, h, w)
      to the kernel's NHWC order (h, w, c) -- same math, zero runtime cost --
      then cast to bf16 and pre-tiled into (nt, k_conv, tn) so every grid
      step's weight tile is a single contiguous HBM read.
    Note: PyTorch-trained OIHW conv / (out,in) linear weights must be converted
    to HWIO / (in,out) before calling this."""
    ho1, wo1 = rows - KSZ + 1, cols - KSZ + 1
    ho2, wo2 = ho1 - KSZ + 1, wo1 - KSZ + 1
    k_conv = ho2 * wo2 * C2
    h1_dim = params["w_lin1"].shape[1]

    w_lin1_nhwc = (params["w_lin1"]
                   .reshape(C2, ho2, wo2, h1_dim)
                   .transpose(1, 2, 0, 3)
                   .reshape(k_conv, h1_dim))
    tn = _pick_lin1_tile(h1_dim, k_conv, itemsize=2)
    nt = h1_dim // tn
    w_lin1_tiled = (w_lin1_nhwc.reshape(k_conv, nt, tn)
                    .transpose(1, 0, 2)
                    .astype(jnp.bfloat16))                  # (nt, k_conv, tn)

    return {
        "w1band": _band_conv1(params["w_conv1"], cols),     # (3, cols, wo1*C1) bf16
        "b_conv1_row": jnp.tile(params["b_conv1"], wo1).reshape(1, -1),
        "w2band": _band_conv2(params["w_conv2"], wo1),      # (3, wo1*C1, wo2*C2) bf16
        "b_conv2_row": jnp.tile(params["b_conv2"], wo2).reshape(1, -1),
        "w_lin1": w_lin1_tiled,
        "b_lin1": params["b_lin1"].reshape(1, -1),
        "w_lin2": params["w_lin2"],                         # f32 (only 256 KB)
        "b_lin2": params["b_lin2"].reshape(1, -1),
        "w_lin3": params["w_lin3"],
        "b_lin3": params["b_lin3"].reshape(1, -1),
    }


# --------------------------- pure-JAX reference --------------------------------
def reference_forward(params, x, rows, cols):
    """Mirrors the PyTorch module exactly (NCHW conv, NCHW flatten)."""
    B = x.shape[0]
    xi = x.reshape(B, 1, rows, cols)
    dn = ("NCHW", "HWIO", "NCHW")
    h = lax.conv_general_dilated(xi, params["w_conv1"], (1, 1), "VALID",
                                 dimension_numbers=dn)
    h = jnp.maximum(h + params["b_conv1"][None, :, None, None], 0.0)
    h = lax.conv_general_dilated(h, params["w_conv2"], (1, 1), "VALID",
                                 dimension_numbers=dn)
    h = jnp.maximum(h + params["b_conv2"][None, :, None, None], 0.0)
    h = h.reshape(B, -1)                                  # PyTorch .view(B, -1)
    h = jnp.maximum(h @ params["w_lin1"] + params["b_lin1"], 0.0)
    h = jnp.maximum(h @ params["w_lin2"] + params["b_lin2"], 0.0)
    return h @ params["w_lin3"] + params["b_lin3"]


if __name__ == "__main__":
    rows, cols, n_act = 16, 16, 4
    batch = 2

    key = jax.random.PRNGKey(0)
    k_params, k_x = jax.random.split(key)
    params = init_params(k_params, rows, cols, n_act)
    prepared = prepare_params(params, rows, cols)
    x = jax.random.normal(k_x, (batch, rows * cols), jnp.float32)

    fwd = jax.jit(functools.partial(conv_nn_forward, rows=rows, cols=cols))
    out = fwd(prepared, x)
    jax.block_until_ready(out)

    assert out.shape == (batch, n_act), out.shape
    assert out.dtype == jnp.float32

    # Reference models the kernel's weight-storage precision (conv + lin1
    # weights rounded through bf16; activations/accumulation in f32), so the
    # check validates the kernel structure/layout tightly.
    rt = lambda w: w.astype(jnp.bfloat16).astype(jnp.float32)
    ref_params = dict(params)
    ref_params["w_conv1"] = rt(params["w_conv1"])
    ref_params["w_conv2"] = rt(params["w_conv2"])
    ref_params["w_lin1"] = rt(params["w_lin1"])
    ref = reference_forward(ref_params, x, rows, cols)
    np.testing.assert_allclose(np.asarray(out), np.asarray(ref),
                               atol=2e-3, rtol=2e-2)

    print("KERNEL_OK")
</pallas_src>

<mosaic_0001>
module attributes {stable_mosaic.version = 11 : i64} {
  func.func @fused_forward_kernel(%arg0: i32, %arg1: memref<2x16x16xf32, #tpu.memory_space<vmem>>, %arg2: memref<3x16x224xbf16, #tpu.memory_space<vmem>>, %arg3: memref<1x224xf32, #tpu.memory_space<vmem>>, %arg4: memref<3x224x384xbf16, #tpu.memory_space<vmem>>, %arg5: memref<1x384xf32, #tpu.memory_space<vmem>>, %arg6: memref<1x4608x256xbf16, #tpu.memory_space<vmem>>, %arg7: memref<1x256xf32, #tpu.memory_space<vmem>>, %arg8: memref<256x128xf32, #tpu.memory_space<vmem>>, %arg9: memref<1x128xf32, #tpu.memory_space<vmem>>, %arg10: memref<128x4xf32, #tpu.memory_space<vmem>>, %arg11: memref<1x4xf32, #tpu.memory_space<vmem>>, %arg12: memref<2x4xf32, #tpu.memory_space<vmem>>, %arg13: memref<2x4608xf32, #tpu.memory_space<vmem>>, %arg14: memref<2x128xf32, #tpu.memory_space<vmem>>) attributes {dimension_semantics = [#tpu.dimension_semantics<arbitrary>], iteration_bounds = array<i64: 2>, scalar_prefetch = 0 : i64, scratch_operands = 2 : i64, tpu.core_type = #tpu.core_type<tc>, window_params = [{pipeline_mode = #tpu.pipeline_mode<synchronous>, transform_indices = @transform_0, window_bounds = array<i64: 2, 16, 16>}, {pipeline_mode = #tpu.pipeline_mode<synchronous>, transform_indices = @transform_1, window_bounds = array<i64: 3, 16, 224>}, {pipeline_mode = #tpu.pipeline_mode<synchronous>, transform_indices = @transform_2, window_bounds = array<i64: 1, 224>}, {pipeline_mode = #tpu.pipeline_mode<synchronous>, transform_indices = @transform_3, window_bounds = array<i64: 3, 224, 384>}, {pipeline_mode = #tpu.pipeline_mode<synchronous>, transform_indices = @transform_4, window_bounds = array<i64: 1, 384>}, {transform_indices = @transform_5, window_bounds = array<i64: 1, 4608, 256>}, {transform_indices = @transform_6, window_bounds = array<i64: 1, 256>}, {transform_indices = @transform_7, window_bounds = array<i64: 256, 128>}, {pipeline_mode = #tpu.pipeline_mode<synchronous>, transform_indices = @transform_8, window_bounds = array<i64: 1, 128>}, {pipeline_mode = #tpu.pipeline_mode<synchronous>, transform_indices = @transform_9, window_bounds = array<i64: 128, 4>}, {pipeline_mode = #tpu.pipeline_mode<synchronous>, transform_indices = @transform_10, window_bounds = array<i64: 1, 4>}, {pipeline_mode = #tpu.pipeline_mode<synchronous>, transform_indices = @transform_11, window_bounds = array<i64: 2, 4>}]} {
    %c0_i32 = arith.constant 0 : i32
    %0 = arith.cmpi eq, %arg0, %c0_i32 : i32
    %1 = arith.extui %0 : i1 to i32
    %c0_i32_0 = arith.constant 0 : i32
    %2 = arith.cmpi ne, %1, %c0_i32_0 : i32
    scf.if %2 {
      %c0_16 = arith.constant 0 : index
      %c0_17 = arith.constant 0 : index
      %c0_18 = arith.constant 0 : index
      %21 = vector.load %arg1[%c0_16, %c0_17, %c0_18] : memref<2x16x16xf32, #tpu.memory_space<vmem>>, vector<1x16x16xf32>
      %22 = vector.shape_cast %21 : vector<1x16x16xf32> to vector<16x16xf32>
      %23 = arith.truncf %22 : vector<16x16xf32> to vector<16x16xbf16>
      %24 = vector.extract_strided_slice %23 {offsets = [0, 0], sizes = [14, 16], strides = [1, 1]} : vector<16x16xbf16> to vector<14x16xbf16>
      %c0_19 = arith.constant 0 : index
      %c0_20 = arith.constant 0 : index
      %c0_21 = arith.constant 0 : index
      %25 = vector.load %arg2[%c0_19, %c0_20, %c0_21] : memref<3x16x224xbf16, #tpu.memory_space<vmem>>, vector<1x16x224xbf16>
      %26 = vector.shape_cast %25 : vector<1x16x224xbf16> to vector<16x224xbf16>
      %cst_22 = arith.constant dense<0.000000e+00> : vector<14x224xf32>
      %27 = tpu.matmul %24, %26, %cst_22 {dimension_numbers = #tpu.dot_dimension_numbers<[1], [0], [0], [1], [0, 0, 1, 1], [], []>} : vector<14x16xbf16>, vector<16x224xbf16>, vector<14x224xf32> -> vector<14x224xf32>
      %28 = vector.extract_strided_slice %23 {offsets = [1, 0], sizes = [14, 16], strides = [1, 1]} : vector<16x16xbf16> to vector<14x16xbf16>
      %c1 = arith.constant 1 : index
      %c0_23 = arith.constant 0 : index
      %c0_24 = arith.constant 0 : index
      %29 = vector.load %arg2[%c1, %c0_23, %c0_24] : memref<3x16x224xbf16, #tpu.memory_space<vmem>>, vector<1x16x224xbf16>
      %30 = vector.shape_cast %29 : vector<1x16x224xbf16> to vector<16x224xbf16>
      %cst_25 = arith.constant dense<0.000000e+00> : vector<14x224xf32>
      %31 = tpu.matmul %28, %30, %cst_25 {dimension_numbers = #tpu.dot_dimension_numbers<[1], [0], [0], [1], [0, 0, 1, 1], [], []>} : vector<14x16xbf16>, vector<16x224xbf16>, vector<14x224xf32> -> vector<14x224xf32>
      %32 = arith.addf %27, %31 : vector<14x224xf32>
      %33 = vector.extract_strided_slice %23 {offsets = [2, 0], sizes = [14, 16], strides = [1, 1]} : vector<16x16xbf16> to vector<14x16xbf16>
      %c2 = arith.constant 2 : index
      %c0_26 = arith.constant 0 : index
      %c0_27 = arith.constant 0 : index
      %34 = vector.load %arg2[%c2, %c0_26, %c0_27] : memref<3x16x224xbf16, #tpu.memory_space<vmem>>, vector<1x16x224xbf16>
      %35 = vector.shape_cast %34 : vector<1x16x224xbf16> to vector<16x224xbf16>
      %cst_28 = arith.constant dense<0.000000e+00> : vector<14x224xf32>
      %36 = tpu.matmul %33, %35, %cst_28 {dimension_numbers = #tpu.dot_dimension_numbers<[1], [0], [0], [1], [0, 0, 1, 1], [], []>} : vector<14x16xbf16>, vector<16x224xbf16>, vector<14x224xf32> -> vector<14x224xf32>
      %37 = arith.addf %32, %36 : vector<14x224xf32>
      %c0_29 = arith.constant 0 : index
      %c0_30 = arith.constant 0 : index
      %38 = vector.load %arg3[%c0_29, %c0_30] : memref<1x224xf32, #tpu.memory_space<vmem>>, vector<1x224xf32>
      %39 = vector.broadcast %38 : vector<1x224xf32> to vector<14x224xf32>
      %40 = arith.addf %37, %39 : vector<14x224xf32>
      %cst_31 = arith.constant 0.000000e+00 : f32
      %41 = vector.broadcast %cst_31 : f32 to vector<14x224xf32>
      %42 = arith.maximumf %40, %41 : vector<14x224xf32>
      %43 = arith.truncf %42 : vector<14x224xf32> to vector<14x224xbf16>
      %44 = vector.extract_strided_slice %43 {offsets = [0, 0], sizes = [12, 224], strides = [1, 1]} : vector<14x224xbf16> to vector<12x224xbf16>
      %c0_32 = arith.constant 0 : index
      %c0_33 = arith.constant 0 : index
      %c0_34 = arith.constant 0 : index
      %45 = vector.load %arg4[%c0_32, %c0_33, %c0_34] : memref<3x224x384xbf16, #tpu.memory_space<vmem>>, vector<1x224x384xbf16>
      %46 = vector.shape_cast %45 : vector<1x224x384xbf16> to vector<224x384xbf16>
      %cst_35 = arith.constant dense<0.000000e+00> : vector<12x384xf32>
      %47 = tpu.matmul %44, %46, %cst_35 {dimension_numbers = #tpu.dot_dimension_numbers<[1], [0], [0], [1], [0, 0, 1, 1], [], []>} : vector<12x224xbf16>, vector<224x384xbf16>, vector<12x384xf32> -> vector<12x384xf32>
      %48 = vector.extract_strided_slice %43 {offsets = [1, 0], sizes = [12, 224], strides = [1, 1]} : vector<14x224xbf16> to vector<12x224xbf16>
      %c1_36 = arith.constant 1 : index
      %c0_37 = arith.constant 0 : index
      %c0_38 = arith.constant 0 : index
      %49 = vector.load %arg4[%c1_36, %c0_37, %c0_38] : memref<3x224x384xbf16, #tpu.memory_space<vmem>>, vector<1x224x384xbf16>
      %50 = vector.shape_cast %49 : vector<1x224x384xbf16> to vector<224x384xbf16>
      %cst_39 = arith.constant dense<0.000000e+00> : vector<12x384xf32>
      %51 = tpu.matmul %48, %50, %cst_39 {dimension_numbers = #tpu.dot_dimension_numbers<[1], [0], [0], [1], [0, 0, 1, 1], [], []>} : vector<12x224xbf16>, vector<224x384xbf16>, vector<12x384xf32> -> vector<12x384xf32>
      %52 = arith.addf %47, %51 : vector<12x384xf32>
      %53 = vector.extract_strided_slice %43 {offsets = [2, 0], sizes = [12, 224], strides = [1, 1]} : vector<14x224xbf16> to vector<12x224xbf16>
      %c2_40 = arith.constant 2 : index
      %c0_41 = arith.constant 0 : index
      %c0_42 = arith.constant 0 : index
      %54 = vector.load %arg4[%c2_40, %c0_41, %c0_42] : memref<3x224x384xbf16, #tpu.memory_space<vmem>>, vector<1x224x384xbf16>
      %55 = vector.shape_cast %54 : vector<1x224x384xbf16> to vector<224x384xbf16>
      %cst_43 = arith.constant dense<0.000000e+00> : vector<12x384xf32>
      %56 = tpu.matmul %53, %55, %cst_43 {dimension_numbers = #tpu.dot_dimension_numbers<[1], [0], [0], [1], [0, 0, 1, 1], [], []>} : vector<12x224xbf16>, vector<224x384xbf16>, vector<12x384xf32> -> vector<12x384xf32>
      %57 = arith.addf %52, %56 : vector<12x384xf32>
      %c0_44 = arith.constant 0 : index
      %c0_45 = arith.constant 0 : index
      %58 = vector.load %arg5[%c0_44, %c0_45] : memref<1x384xf32, #tpu.memory_space<vmem>>, vector<1x384xf32>
      %59 = vector.broadcast %58 : vector<1x384xf32> to vector<12x384xf32>
      %60 = arith.addf %57, %59 : vector<12x384xf32>
      %cst_46 = arith.constant 0.000000e+00 : f32
      %61 = vector.broadcast %cst_46 : f32 to vector<12x384xf32>
      %62 = arith.maximumf %60, %61 : vector<12x384xf32>
      %63 = vector.extract_strided_slice %62 {offsets = [0, 0], sizes = [1, 384], strides = [1, 1]} : vector<12x384xf32> to vector<1x384xf32>
      %c0_47 = arith.constant 0 : index
      %c0_48 = arith.constant 0 : index
      %64 = vector.load %arg13[%c0_47, %c0_48] : memref<2x4608xf32, #tpu.memory_space<vmem>>, vector<1x384xf32>
      tpu.vector_store %arg13[%c0_47, %c0_48], %63 {strides = array<i32>} : memref<2x4608xf32, #tpu.memory_space<vmem>>, vector<1x384xf32>,
      %65 = vector.extract_strided_slice %62 {offsets = [1, 0], sizes = [1, 384], strides = [1, 1]} : vector<12x384xf32> to vector<1x384xf32>
      %c0_49 = arith.constant 0 : index
      %c384 = arith.constant 384 : index
      %66 = vector.load %arg13[%c0_49, %c384] : memref<2x4608xf32, #tpu.memory_space<vmem>>, vector<1x384xf32>
      tpu.vector_store %arg13[%c0_49, %c384], %65 {strides = array<i32>} : memref<2x4608xf32, #tpu.memory_space<vmem>>, vector<1x384xf32>,
      %67 = vector.extract_strided_slice %62 {offsets = [2, 0], sizes = [1, 384], strides = [1, 1]} : vector<12x384xf32> to vector<1x384xf32>
      %c0_50 = arith.constant 0 : index
      %c768 = arith.constant 768 : index
      %68 = vector.load %arg13[%c0_50, %c768] : memref<2x4608xf32, #tpu.memory_space<vmem>>, vector<1x384xf32>
      tpu.vector_store %arg13[%c0_50, %c768], %67 {strides = array<i32>} : memref<2x4608xf32, #tpu.memory_space<vmem>>, vector<1x384xf32>,
      %69 = vector.extract_strided_slice %62 {offsets = [3, 0], sizes = [1, 384], strides = [1, 1]} : vector<12x384xf32> to vector<1x384xf32>
      %c0_51 = arith.constant 0 : index
      %c1152 = arith.constant 1152 : index
      %70 = vector.load %arg13[%c0_51, %c1152] : memref<2x4608xf32, #tpu.memory_space<vmem>>, vector<1x384xf32>
      tpu.vector_store %arg13[%c0_51, %c1152], %69 {strides = array<i32>} : memref<2x4608xf32, #tpu.memory_space<vmem>>, vector<1x384xf32>,
      %71 = vector.extract_strided_slice %62 {offsets = [4, 0], sizes = [1, 384], strides = [1, 1]} : vector<12x384xf32> to vector<1x384xf32>
      %c0_52 = arith.constant 0 : index
      %c1536 = arith.constant 1536 : index
      %72 = vector.load %arg13[%c0_52, %c1536] : memref<2x4608xf32, #tpu.memory_space<vmem>>, vector<1x384xf32>
      tpu.vector_store %arg13[%c0_52, %c1536], %71 {strides = array<i32>} : memref<2x4608xf32, #tpu.memory_space<vmem>>, vector<1x384xf32>,
      %73 = vector.extract_strided_slice %62 {offsets = [5, 0], sizes = [1, 384], strides = [1, 1]} : vector<12x384xf32> to vector<1x384xf32>
      %c0_53 = arith.constant 0 : index
      %c1920 = arith.constant 1920 : index
      %74 = vector.load %arg13[%c0_53, %c1920] : memref<2x4608xf32, #tpu.memory_space<vmem>>, vector<1x384xf32>
      tpu.vector_store %arg13[%c0_53, %c1920], %73 {strides = array<i32>} : memref<2x4608xf32, #tpu.memory_space<vmem>>, vector<1x384xf32>,
      %75 = vector.extract_strided_slice %62 {offsets = [6, 0], sizes = [1, 384], strides = [1, 1]} : vector<12x384xf32> to vector<1x384xf32>
      %c0_54 = arith.constant 0 : index
      %c2304 = arith.constant 2304 : index
      %76 = vector.load %arg13[%c0_54, %c2304] : memref<2x4608xf32, #tpu.memory_space<vmem>>, vector<1x384xf32>
      tpu.vector_store %arg13[%c0_54, %c2304], %75 {strides = array<i32>} : memref<2x4608xf32, #tpu.memory_space<vmem>>, vector<1x384xf32>,
      %77 = vector.extract_strided_slice %62 {offsets = [7, 0], sizes = [1, 384], strides = [1, 1]} : vector<12x384xf32> to vector<1x384xf32>
      %c0_55 = arith.constant 0 : index
      %c2688 = arith.constant 2688 : index
      %78 = vector.load %arg13[%c0_55, %c2688] : memref<2x4608xf32, #tpu.memory_space<vmem>>, vector<1x384xf32>
      tpu.vector_store %arg13[%c0_55, %c2688], %77 {strides = array<i32>} : memref<2x4608xf32, #tpu.memory_space<vmem>>, vector<1x384xf32>,
      %79 = vector.extract_strided_slice %62 {offsets = [8, 0], sizes = [1, 384], strides = [1, 1]} : vector<12x384xf32> to vector<1x384xf32>
      %c0_56 = arith.constant 0 : index
      %c3072 = arith.constant 3072 : index
      %80 = vector.load %arg13[%c0_56, %c3072] : memref<2x4608xf32, #tpu.memory_space<vmem>>, vector<1x384xf32>
      tpu.vector_store %arg13[%c0_56, %c3072], %79 {strides = array<i32>} : memref<2x4608xf32, #tpu.memory_space<vmem>>, vector<1x384xf32>,
      %81 = vector.extract_strided_slice %62 {offsets = [9, 0], sizes = [1, 384], strides = [1, 1]} : vector<12x384xf32> to vector<1x384xf32>
      %c0_57 = arith.constant 0 : index
      %c3456 = arith.constant 3456 : index
      %82 = vector.load %arg13[%c0_57, %c3456] : memref<2x4608xf32, #tpu.memory_space<vmem>>, vector<1x384xf32>
      tpu.vector_store %arg13[%c0_57, %c3456], %81 {strides = array<i32>} : memref<2x4608xf32, #tpu.memory_space<vmem>>, vector<1x384xf32>,
      %83 = vector.extract_strided_slice %62 {offsets = [10, 0], sizes = [1, 384], strides = [1, 1]} : vector<12x384xf32> to vector<1x384xf32>
      %c0_58 = arith.constant 0 : index
      %c3840 = arith.constant 3840 : index
      %84 = vector.load %arg13[%c0_58, %c3840] : memref<2x4608xf32, #tpu.memory_space<vmem>>, vector<1x384xf32>
      tpu.vector_store %arg13[%c0_58, %c3840], %83 {strides = array<i32>} : memref<2x4608xf32, #tpu.memory_space<vmem>>, vector<1x384xf32>,
      %85 = vector.extract_strided_slice %62 {offsets = [11, 0], sizes = [1, 384], strides = [1, 1]} : vector<12x384xf32> to vector<1x384xf32>
      %c0_59 = arith.constant 0 : index
      %c4224 = arith.constant 4224 : index
      %86 = vector.load %arg13[%c0_59, %c4224] : memref<2x4608xf32, #tpu.memory_space<vmem>>, vector<1x384xf32>
      tpu.vector_store %arg13[%c0_59, %c4224], %85 {strides = array<i32>} : memref<2x4608xf32, #tpu.memory_space<vmem>>, vector<1x384xf32>,
      %c1_60 = arith.constant 1 : index
      %c0_61 = arith.constant 0 : index
      %c0_62 = arith.constant 0 : index
      %87 = vector.load %arg1[%c1_60, %c0_61, %c0_62] : memref<2x16x16xf32, #tpu.memory_space<vmem>>, vector<1x16x16xf32>
      %88 = vector.shape_cast %87 : vector<1x16x16xf32> to vector<16x16xf32>
      %89 = arith.truncf %88 : vector<16x16xf32> to vector<16x16xbf16>
      %90 = vector.extract_strided_slice %89 {offsets = [0, 0], sizes = [14, 16], strides = [1, 1]} : vector<16x16xbf16> to vector<14x16xbf16>
      %c0_63 = arith.constant 0 : index
      %c0_64 = arith.constant 0 : index
      %c0_65 = arith.constant 0 : index
      %91 = vector.load %arg2[%c0_63, %c0_64, %c0_65] : memref<3x16x224xbf16, #tpu.memory_space<vmem>>, vector<1x16x224xbf16>
      %92 = vector.shape_cast %91 : vector<1x16x224xbf16> to vector<16x224xbf16>
      %cst_66 = arith.constant dense<0.000000e+00> : vector<14x224xf32>
      %93 = tpu.matmul %90, %92, %cst_66 {dimension_numbers = #tpu.dot_dimension_numbers<[1], [0], [0], [1], [0, 0, 1, 1], [], []>} : vector<14x16xbf16>, vector<16x224xbf16>, vector<14x224xf32> -> vector<14x224xf32>
      %94 = vector.extract_strided_slice %89 {offsets = [1, 0], sizes = [14, 16], strides = [1, 1]} : vector<16x16xbf16> to vector<14x16xbf16>
      %c1_67 = arith.constant 1 : index
      %c0_68 = arith.constant 0 : index
      %c0_69 = arith.constant 0 : index
      %95 = vector.load %arg2[%c1_67, %c0_68, %c0_69] : memref<3x16x224xbf16, #tpu.memory_space<vmem>>, vector<1x16x224xbf16>
      %96 = vector.shape_cast %95 : vector<1x16x224xbf16> to vector<16x224xbf16>
      %cst_70 = arith.constant dense<0.000000e+00> : vector<14x224xf32>
      %97 = tpu.matmul %94, %96, %cst_70 {dimension_numbers = #tpu.dot_dimension_numbers<[1], [0], [0], [1], [0, 0, 1, 1], [], []>} : vector<14x16xbf16>, vector<16x224xbf16>, vector<14x224xf32> -> vector<14x224xf32>
      %98 = arith.addf %93, %97 : vector<14x224xf32>
      %99 = vector.extract_strided_slice %89 {offsets = [2, 0], sizes = [14, 16], strides = [1, 1]} : vector<16x16xbf16> to vector<14x16xbf16>
      %c2_71 = arith.constant 2 : index
      %c0_72 = arith.constant 0 : index
      %c0_73 = arith.constant 0 : index
      %100 = vector.load %arg2[%c2_71, %c0_72, %c0_73] : memref<3x16x224xbf16, #tpu.memory_space<vmem>>, vector<1x16x224xbf16>
      %101 = vector.shape_cast %100 : vector<1x16x224xbf16> to vector<16x224xbf16>
      %cst_74 = arith.constant dense<0.000000e+00> : vector<14x224xf32>
      %102 = tpu.matmul %99, %101, %cst_74 {dimension_numbers = #tpu.dot_dimension_numbers<[1], [0], [0], [1], [0, 0, 1, 1], [], []>} : vector<14x16xbf16>, vector<16x224xbf16>, vector<14x224xf32> -> vector<14x224xf32>
      %103 = arith.addf %98, %102 : vector<14x224xf32>
      %c0_75 = arith.constant 0 : index
      %c0_76 = arith.constant 0 : index
      %104 = vector.load %arg3[%c0_75, %c0_76] : memref<1x224xf32, #tpu.memory_space<vmem>>, vector<1x224xf32>
      %105 = vector.broadcast %104 : vector<1x224xf32> to vector<14x224xf32>
      %106 = arith.addf %103, %105 : vector<14x224xf32>
      %cst_77 = arith.constant 0.000000e+00 : f32
      %107 = vector.broadcast %cst_77 : f32 to vector<14x224xf32>
      %108 = arith.maximumf %106, %107 : vector<14x224xf32>
      %109 = arith.truncf %108 : vector<14x224xf32> to vector<14x224xbf16>
      %110 = vector.extract_strided_slice %109 {offsets = [0, 0], sizes = [12, 224], strides = [1, 1]} : vector<14x224xbf16> to vector<12x224xbf16>
      %c0_78 = arith.constant 0 : index
      %c0_79 = arith.constant 0 : index
      %c0_80 = arith.constant 0 : index
      %111 = vector.load %arg4[%c0_78, %c0_79, %c0_80] : memref<3x224x384xbf16, #tpu.memory_space<vmem>>, vector<1x224x384xbf16>
      %112 = vector.shape_cast %111 : vector<1x224x384xbf16> to vector<224x384xbf16>
      %cst_81 = arith.constant dense<0.000000e+00> : vector<12x384xf32>
      %113 = tpu.matmul %110, %112, %cst_81 {dimension_numbers = #tpu.dot_dimension_numbers<[1], [0], [0], [1], [0, 0, 1, 1], [], []>} : vector<12x224xbf16>, vector<224x384xbf16>, vector<12x384xf32> -> vector<12x384xf32>
      %114 = vector.extract_strided_slice %109 {offsets = [1, 0], sizes = [12, 224], strides = [1, 1]} : vector<14x224xbf16> to vector<12x224xbf16>
      %c1_82 = arith.constant 1 : index
      %c0_83 = arith.constant 0 : index
      %c0_84 = arith.constant 0 : index
      %115 = vector.load %arg4[%c1_82, %c0_83, %c0_84] : memref<3x224x384xbf16, #tpu.memory_space<vmem>>, vector<1x224x384xbf16>
      %116 = vector.shape_cast %115 : vector<1x224x384xbf16> to vector<224x384xbf16>
      %cst_85 = arith.constant dense<0.000000e+00> : vector<12x384xf32>
      %117 = tpu.matmul %114, %116, %cst_85 {dimension_numbers = #tpu.dot_dimension_numbers<[1], [0], [0], [1], [0, 0, 1, 1], [], []>} : vector<12x224xbf16>, vector<224x384xbf16>, vector<12x384xf32> -> vector<12x384xf32>
      %118 = arith.addf %113, %117 : vector<12x384xf32>
      %119 = vector.extract_strided_slice %109 {offsets = [2, 0], sizes = [12, 224], strides = [1, 1]} : vector<14x224xbf16> to vector<12x224xbf16>
      %c2_86 = arith.constant 2 : index
      %c0_87 = arith.constant 0 : index
      %c0_88 = arith.constant 0 : index
      %120 = vector.load %arg4[%c2_86, %c0_87, %c0_88] : memref<3x224x384xbf16, #tpu.memory_space<vmem>>, vector<1x224x384xbf16>
      %121 = vector.shape_cast %120 : vector<1x224x384xbf16> to vector<224x384xbf16>
      %cst_89 = arith.constant dense<0.000000e+00> : vector<12x384xf32>
      %122 = tpu.matmul %119, %121, %cst_89 {dimension_numbers = #tpu.dot_dimension_numbers<[1], [0], [0], [1], [0, 0, 1, 1], [], []>} : vector<12x224xbf16>, vector<224x384xbf16>, vector<12x384xf32> -> vector<12x384xf32>
      %123 = arith.addf %118, %122 : vector<12x384xf32>
      %c0_90 = arith.constant 0 : index
      %c0_91 = arith.constant 0 : index
      %124 = vector.load %arg5[%c0_90, %c0_91] : memref<1x384xf32, #tpu.memory_space<vmem>>, vector<1x384xf32>
      %125 = vector.broadcast %124 : vector<1x384xf32> to vector<12x384xf32>
      %126 = arith.addf %123, %125 : vector<12x384xf32>
      %cst_92 = arith.constant 0.000000e+00 : f32
      %127 = vector.broadcast %cst_92 : f32 to vector<12x384xf32>
      %128 = arith.maximumf %126, %127 : vector<12x384xf32>
      %129 = vector.extract_strided_slice %128 {offsets = [0, 0], sizes = [1, 384], strides = [1, 1]} : vector<12x384xf32> to vector<1x384xf32>
      %c1_93 = arith.constant 1 : index
      %c0_94 = arith.constant 0 : index
      %130 = vector.load %arg13[%c1_93, %c0_94] : memref<2x4608xf32, #tpu.memory_space<vmem>>, vector<1x384xf32>
      tpu.vector_store %arg13[%c1_93, %c0_94], %129 {strides = array<i32>} : memref<2x4608xf32, #tpu.memory_space<vmem>>, vector<1x384xf32>,
      %131 = vector.extract_strided_slice %128 {offsets = [1, 0], sizes = [1, 384], strides = [1, 1]} : vector<12x384xf32> to vector<1x384xf32>
      %c1_95 = arith.constant 1 : index
      %c384_96 = arith.constant 384 : index
      %132 = vector.load %arg13[%c1_95, %c384_96] : memref<2x4608xf32, #tpu.memory_space<vmem>>, vector<1x384xf32>
      tpu.vector_store %arg13[%c1_95, %c384_96], %131 {strides = array<i32>} : memref<2x4608xf32, #tpu.memory_space<vmem>>, vector<1x384xf32>,
      %133 = vector.extract_strided_slice %128 {offsets = [2, 0], sizes = [1, 384], strides = [1, 1]} : vector<12x384xf32> to vector<1x384xf32>
      %c1_97 = arith.constant 1 : index
      %c768_98 = arith.constant 768 : index
      %134 = vector.load %arg13[%c1_97, %c768_98] : memref<2x4608xf32, #tpu.memory_space<vmem>>, vector<1x384xf32>
      tpu.vector_store %arg13[%c1_97, %c768_98], %133 {strides = array<i32>} : memref<2x4608xf32, #tpu.memory_space<vmem>>, vector<1x384xf32>,
      %135 = vector.extract_strided_slice %128 {offsets = [3, 0], sizes = [1, 384], strides = [1, 1]} : vector<12x384xf32> to vector<1x384xf32>
      %c1_99 = arith.constant 1 : index
      %c1152_100 = arith.constant 1152 : index
      %136 = vector.load %arg13[%c1_99, %c1152_100] : memref<2x4608xf32, #tpu.memory_space<vmem>>, vector<1x384xf32>
      tpu.vector_store %arg13[%c1_99, %c1152_100], %135 {strides = array<i32>} : memref<2x4608xf32, #tpu.memory_space<vmem>>, vector<1x384xf32>,
      %137 = vector.extract_strided_slice %128 {offsets = [4, 0], sizes = [1, 384], strides = [1, 1]} : vector<12x384xf32> to vector<1x384xf32>
      %c1_101 = arith.constant 1 : index
      %c1536_102 = arith.constant 1536 : index
      %138 = vector.load %arg13[%c1_101, %c1536_102] : memref<2x4608xf32, #tpu.memory_space<vmem>>, vector<1x384xf32>
      tpu.vector_store %arg13[%c1_101, %c1536_102], %137 {strides = array<i32>} : memref<2x4608xf32, #tpu.memory_space<vmem>>, vector<1x384xf32>,
      %139 = vector.extract_strided_slice %128 {offsets = [5, 0], sizes = [1, 384], strides = [1, 1]} : vector<12x384xf32> to vector<1x384xf32>
      %c1_103 = arith.constant 1 : index
      %c1920_104 = arith.constant 1920 : index
      %140 = vector.load %arg13[%c1_103, %c1920_104] : memref<2x4608xf32, #tpu.memory_space<vmem>>, vector<1x384xf32>
      tpu.vector_store %arg13[%c1_103, %c1920_104], %139 {strides = array<i32>} : memref<2x4608xf32, #tpu.memory_space<vmem>>, vector<1x384xf32>,
      %141 = vector.extract_strided_slice %128 {offsets = [6, 0], sizes = [1, 384], strides = [1, 1]} : vector<12x384xf32> to vector<1x384xf32>
      %c1_105 = arith.constant 1 : index
      %c2304_106 = arith.constant 2304 : index
      %142 = vector.load %arg13[%c1_105, %c2304_106] : memref<2x4608xf32, #tpu.memory_space<vmem>>, vector<1x384xf32>
      tpu.vector_store %arg13[%c1_105, %c2304_106], %141 {strides = array<i32>} : memref<2x4608xf32, #tpu.memory_space<vmem>>, vector<1x384xf32>,
      %143 = vector.extract_strided_slice %128 {offsets = [7, 0], sizes = [1, 384], strides = [1, 1]} : vector<12x384xf32> to vector<1x384xf32>
      %c1_107 = arith.constant 1 : index
      %c2688_108 = arith.constant 2688 : index
      %144 = vector.load %arg13[%c1_107, %c2688_108] : memref<2x4608xf32, #tpu.memory_space<vmem>>, vector<1x384xf32>
      tpu.vector_store %arg13[%c1_107, %c2688_108], %143 {strides = array<i32>} : memref<2x4608xf32, #tpu.memory_space<vmem>>, vector<1x384xf32>,
      %145 = vector.extract_strided_slice %128 {offsets = [8, 0], sizes = [1, 384], strides = [1, 1]} : vector<12x384xf32> to vector<1x384xf32>
      %c1_109 = arith.constant 1 : index
      %c3072_110 = arith.constant 3072 : index
      %146 = vector.load %arg13[%c1_109, %c3072_110] : memref<2x4608xf32, #tpu.memory_space<vmem>>, vector<1x384xf32>
      tpu.vector_store %arg13[%c1_109, %c3072_110], %145 {strides = array<i32>} : memref<2x4608xf32, #tpu.memory_space<vmem>>, vector<1x384xf32>,
      %147 = vector.extract_strided_slice %128 {offsets = [9, 0], sizes = [1, 384], strides = [1, 1]} : vector<12x384xf32> to vector<1x384xf32>
      %c1_111 = arith.constant 1 : index
      %c3456_112 = arith.constant 3456 : index
      %148 = vector.load %arg13[%c1_111, %c3456_112] : memref<2x4608xf32, #tpu.memory_space<vmem>>, vector<1x384xf32>
      tpu.vector_store %arg13[%c1_111, %c3456_112], %147 {strides = array<i32>} : memref<2x4608xf32, #tpu.memory_space<vmem>>, vector<1x384xf32>,
      %149 = vector.extract_strided_slice %128 {offsets = [10, 0], sizes = [1, 384], strides = [1, 1]} : vector<12x384xf32> to vector<1x384xf32>
      %c1_113 = arith.constant 1 : index
      %c3840_114 = arith.constant 3840 : index
      %150 = vector.load %arg13[%c1_113, %c3840_114] : memref<2x4608xf32, #tpu.memory_space<vmem>>, vector<1x384xf32>
      tpu.vector_store %arg13[%c1_113, %c3840_114], %149 {strides = array<i32>} : memref<2x4608xf32, #tpu.memory_space<vmem>>, vector<1x384xf32>,
      %151 = vector.extract_strided_slice %128 {offsets = [11, 0], sizes = [1, 384], strides = [1, 1]} : vector<12x384xf32> to vector<1x384xf32>
      %c1_115 = arith.constant 1 : index
      %c4224_116 = arith.constant 4224 : index
      %152 = vector.load %arg13[%c1_115, %c4224_116] : memref<2x4608xf32, #tpu.memory_space<vmem>>, vector<1x384xf32>
      tpu.vector_store %arg13[%c1_115, %c4224_116], %151 {strides = array<i32>} : memref<2x4608xf32, #tpu.memory_space<vmem>>, vector<1x384xf32>,
      %cst_117 = arith.constant 0.000000e+00 : f32
      %153 = vector.broadcast %cst_117 : f32 to vector<2x128xf32>
      %c0_118 = arith.constant 0 : index
      %c0_119 = arith.constant 0 : index
      %154 = vector.load %arg14[%c0_118, %c0_119] : memref<2x128xf32, #tpu.memory_space<vmem>>, vector<2x128xf32>
      tpu.vector_store %arg14[%c0_118, %c0_119], %153 {strides = array<i32>} : memref<2x128xf32, #tpu.memory_space<vmem>>, vector<2x128xf32>,
    } else {
    }
    %c0 = arith.constant 0 : index
    %c0_1 = arith.constant 0 : index
    %3 = vector.load %arg13[%c0, %c0_1] : memref<2x4608xf32, #tpu.memory_space<vmem>>, vector<2x4608xf32>
    %4 = arith.truncf %3 : vector<2x4608xf32> to vector<2x4608xbf16>
    %c0_2 = arith.constant 0 : index
    %c0_3 = arith.constant 0 : index
    %c0_4 = arith.constant 0 : index
    %5 = vector.load %arg6[%c0_2, %c0_3, %c0_4] : memref<1x4608x256xbf16, #tpu.memory_space<vmem>>, vector<1x4608x256xbf16>
    %6 = vector.shape_cast %5 : vector<1x4608x256xbf16> to vector<4608x256xbf16>
    %cst = arith.constant dense<0.000000e+00> : vector<2x256xf32>
    %7 = tpu.matmul %4, %6, %cst {dimension_numbers = #tpu.dot_dimension_numbers<[1], [0], [0], [1], [0, 0, 1, 1], [], []>} : vector<2x4608xbf16>, vector<4608x256xbf16>, vector<2x256xf32> -> vector<2x256xf32>
    %c0_5 = arith.constant 0 : index
    %c0_6 = arith.constant 0 : index
    %8 = vector.load %arg7[%c0_5, %c0_6] : memref<1x256xf32, #tpu.memory_space<vmem>>, vector<1x256xf32>
    %9 = vector.broadcast %8 : vector<1x256xf32> to vector<2x256xf32>
    %10 = arith.addf %7, %9 : vector<2x256xf32>
    %cst_7 = arith.constant 0.000000e+00 : f32
    %11 = vector.broadcast %cst_7 : f32 to vector<2x256xf32>
    %12 = arith.maximumf %10, %11 : vector<2x256xf32>
    %c0_8 = arith.constant 0 : index
    %c0_9 = arith.constant 0 : index
    %13 = vector.load %arg14[%c0_8, %c0_9] : memref<2x128xf32, #tpu.memory_space<vmem>>, vector<2x128xf32>
    %c0_10 = arith.constant 0 : index
    %c0_11 = arith.constant 0 : index
    %14 = vector.load %arg8[%c0_10, %c0_11] : memref<256x128xf32, #tpu.memory_space<vmem>>, vector<256x128xf32>
    %cst_12 = arith.constant dense<0.000000e+00> : vector<2x128xf32>
    %15 = tpu.matmul %12, %14, %cst_12 {dimension_numbers = #tpu.dot_dimension_numbers<[1], [0], [0], [1], [0, 0, 1, 1], [], []>} : vector<2x256xf32>, vector<256x128xf32>, vector<2x128xf32> -> vector<2x128xf32>
    %16 = arith.addf %13, %15 : vector<2x128xf32>
    %c0_13 = arith.constant 0 : index
    %c0_14 = arith.constant 0 : index
    %17 = vector.load %arg14[%c0_13, %c0_14] : memref<2x128xf32, #tpu.memory_space<vmem>>, vector<2x128xf32>
    tpu.vector_store %arg14[%c0_13, %c0_14], %16 {strides = array<i32>} : memref<2x128xf32, #tpu.memory_space<vmem>>, vector<2x128xf32>,
    %c1_i32 = arith.constant 1 : i32
    %18 = arith.cmpi eq, %arg0, %c1_i32 : i32
    %19 = arith.extui %18 : i1 to i32
    %c0_i32_15 = arith.constant 0 : i32
    %20 = arith.cmpi ne, %19, %c0_i32_15 : i32
    scf.if %20 {
      %c0_16 = arith.constant 0 : index
      %c0_17 = arith.constant 0 : index
      %21 = vector.load %arg14[%c0_16, %c0_17] : memref<2x128xf32, #tpu.memory_space<vmem>>, vector<2x128xf32>
      %c0_18 = arith.constant 0 : index
      %c0_19 = arith.constant 0 : index
      %22 = vector.load %arg9[%c0_18, %c0_19] : memref<1x128xf32, #tpu.memory_space<vmem>>, vector<1x128xf32>
      %23 = vector.broadcast %22 : vector<1x128xf32> to vector<2x128xf32>
      %24 = arith.addf %21, %23 : vector<2x128xf32>
      %cst_20 = arith.constant 0.000000e+00 : f32
      %25 = vector.broadcast %cst_20 : f32 to vector<2x128xf32>
      %26 = arith.maximumf %24, %25 : vector<2x128xf32>
      %c0_21 = arith.constant 0 : index
      %c0_22 = arith.constant 0 : index
      %27 = vector.load %arg10[%c0_21, %c0_22] : memref<128x4xf32, #tpu.memory_space<vmem>>, vector<128x4xf32>
      %cst_23 = arith.constant dense<0.000000e+00> : vector<2x4xf32>
      %28 = tpu.matmul %26, %27, %cst_23 {dimension_numbers = #tpu.dot_dimension_numbers<[1], [0], [0], [1], [0, 0, 1, 1], [], []>} : vector<2x128xf32>, vector<128x4xf32>, vector<2x4xf32> -> vector<2x4xf32>
      %c0_24 = arith.constant 0 : index
      %c0_25 = arith.constant 0 : index
      %29 = vector.load %arg11[%c0_24, %c0_25] : memref<1x4xf32, #tpu.memory_space<vmem>>, vector<1x4xf32>
      %30 = vector.broadcast %29 : vector<1x4xf32> to vector<2x4xf32>
      %31 = arith.addf %28, %30 : vector<2x4xf32>
      %c0_26 = arith.constant 0 : index
      %c0_27 = arith.constant 0 : index
      %32 = vector.load %arg12[%c0_26, %c0_27] : memref<2x4xf32, #tpu.memory_space<vmem>>, vector<2x4xf32>
      tpu.vector_store %arg12[%c0_26, %c0_27], %31 {strides = array<i32>} : memref<2x4xf32, #tpu.memory_space<vmem>>, vector<2x4xf32>,
    } else {
    }
    return
  }
  func.func @transform_0(%arg0: i32) -> (i32, i32, i32) {
    %c0_i32 = arith.constant 0 : i32
    %c0_i32_0 = arith.constant 0 : i32
    %c0_i32_1 = arith.constant 0 : i32
    %c0_i32_2 = arith.constant 0 : i32
    return %c0_i32, %c0_i32_0, %c0_i32_1 : i32, i32, i32
  }
  func.func @transform_1(%arg0: i32) -> (i32, i32, i32) {
    %c0_i32 = arith.constant 0 : i32
    %c0_i32_0 = arith.constant 0 : i32
    %c0_i32_1 = arith.constant 0 : i32
    %c0_i32_2 = arith.constant 0 : i32
    return %c0_i32, %c0_i32_0, %c0_i32_1 : i32, i32, i32
  }
  func.func @transform_2(%arg0: i32) -> (i32, i32) {
    %c0_i32 = arith.constant 0 : i32
    %c0_i32_0 = arith.constant 0 : i32
    %c0_i32_1 = arith.constant 0 : i32
    return %c0_i32, %c0_i32_0 : i32, i32
  }
  func.func @transform_3(%arg0: i32) -> (i32, i32, i32) {
    %c0_i32 = arith.constant 0 : i32
    %c0_i32_0 = arith.constant 0 : i32
    %c0_i32_1 = arith.constant 0 : i32
    %c0_i32_2 = arith.constant 0 : i32
    return %c0_i32, %c0_i32_0, %c0_i32_1 : i32, i32, i32
  }
  func.func @transform_4(%arg0: i32) -> (i32, i32) {
    %c0_i32 = arith.constant 0 : i32
    %c0_i32_0 = arith.constant 0 : i32
    %c0_i32_1 = arith.constant 0 : i32
    return %c0_i32, %c0_i32_0 : i32, i32
  }
  func.func @transform_5(%arg0: i32) -> (i32, i32, i32) {
    %c0_i32 = arith.constant 0 : i32
    %c0_i32_0 = arith.constant 0 : i32
    %c0_i32_1 = arith.constant 0 : i32
    return %arg0, %c0_i32, %c0_i32_0 : i32, i32, i32
  }
  func.func @transform_6(%arg0: i32) -> (i32, i32) {
    %c0_i32 = arith.constant 0 : i32
    %c0_i32_0 = arith.constant 0 : i32
    return %c0_i32, %arg0 : i32, i32
  }
  func.func @transform_7(%arg0: i32) -> (i32, i32) {
    %c0_i32 = arith.constant 0 : i32
    %c0_i32_0 = arith.constant 0 : i32
    return %arg0, %c0_i32 : i32, i32
  }
  func.func @transform_8(%arg0: i32) -> (i32, i32) {
    %c0_i32 = arith.constant 0 : i32
    %c0_i32_0 = arith.constant 0 : i32
    %c0_i32_1 = arith.constant 0 : i32
    return %c0_i32, %c0_i32_0 : i32, i32
  }
  func.func @transform_9(%arg0: i32) -> (i32, i32) {
    %c0_i32 = arith.constant 0 : i32
    %c0_i32_0 = arith.constant 0 : i32
    %c0_i32_1 = arith.constant 0 : i32
    return %c0_i32, %c0_i32_0 : i32, i32
  }
  func.func @transform_10(%arg0: i32) -> (i32, i32) {
    %c0_i32 = arith.constant 0 : i32
    %c0_i32_0 = arith.constant 0 : i32
    %c0_i32_1 = arith.constant 0 : i32
    return %c0_i32, %c0_i32_0 : i32, i32
  }
  func.func @transform_11(%arg0: i32) -> (i32, i32) {
    %c0_i32 = arith.constant 0 : i32
    %c0_i32_0 = arith.constant 0 : i32
    %c0_i32_1 = arith.constant 0 : i32
    return %c0_i32, %c0_i32_0 : i32, i32
  }
}

</mosaic_0001>

<bundles_post_ra>
// kernel: conv_nn_forward.1
= control target key start
LH: loop header
LB: loop body
LE: loop exit
PB: predicated region body
PF: predicated region fallthrough
CT: control target
= control target key end

     0   :  { %s12464_s0 = inlined_call_operand.vmem [shape: f32[2,16,16], index: 0, kind: input, shape index: {}]   ;;  %s12465_s1 = inlined_call_operand.hbm [shape: bf16[3,16,224], index: 1, kind: input, shape index: {}]   ;;  %s12466_s2 = inlined_call_operand.hbm [shape: f32[1,224], index: 2, kind: input, shape index: {}]   ;;  %s12467_s3 = inlined_call_operand.hbm [shape: bf16[3,224,384], index: 3, kind: input, shape index: {}]   ;;  %s12468_s4 = inlined_call_operand.hbm [shape: f32[1,384], index: 4, kind: input, shape index: {}]   ;;  %s12469_s5 = inlined_call_operand.hbm [shape: bf16[2,4608,256], index: 5, kind: input, shape index: {}]   ;;  %s12470_s6 = inlined_call_operand.hbm [shape: f32[1,512], index: 6, kind: input, shape index: {}]   ;;  %s12471_s7 = inlined_call_operand.hbm [shape: f32[512,128], index: 7, kind: input, shape index: {}]   ;;  %s12472_s8 = inlined_call_operand.hbm [shape: f32[1,128], index: 8, kind: input, shape index: {}]   ;;  %s12473_s9 = inlined_call_operand.vmem [shape: f32[128,4], index: 9, kind: input, shape index: {}]   ;;  %s12474_s10 = inlined_call_operand.hbm [shape: f32[1,4], index: 10, kind: input, shape index: {}]   ;;  %s12475_s11 = inlined_call_operand.hbm [shape: f32[2,4], index: 11, kind: output, shape index: {}]  }
   0x1   :  { %12497 = sst [smem:[#allocation30_spill]] %s12464_s0 }
   0x2   :  { %12498 = sst [smem:[#allocation31_spill]] %s12465_s1 }
   0x3   :  { %12499 = sst [smem:[#allocation32_spill]] %s12466_s2 }
   0x4   :  { %12500 = sst [smem:[#allocation33_spill]] %s12467_s3 }
   0x5   :  { %12501 = sst [smem:[#allocation34_spill]] %s12469_s5 }
   0x6   :  { %12502 = sst [smem:[#allocation35_spill]] %s12473_s9 }
   0x7   :  { %12503 = sst [smem:[#allocation36_spill]] %s12475_s11 }
   0x8   :  { %16 = vsyncpa [#allocation5], 0 }
   0x9   :  { %17 = vsyncpa [#allocation8], 0 }
   0xa   :  { %18 = vsyncpa [#allocation11], 0 }
   0xb   :  { %19 = vsyncpa [#allocation6], 0  ;;  %s11136_s17 = smov 0   ;;  %s11138_s18 = smov 0  }
   0xc   :  { %s11140_s19 = smov 0   ;;  %s11142_s20 = smov 0  }
   0xd LB: > { %12504 = sst [smem:[#allocation25_spill]] %s11046_s18  ;;  %s11056_s21 = smov [#allocation4]   ;;  %s11054_s20 = sphi %s11142_s20, %s12545_s20   ;;  %s11050_s19 = sphi %s11140_s19, %s12548_s19   ;;  %s11046_s18 = sphi %s11138_s18, %s12547_s18   ;;  %s11042_s17 = sphi %s11136_s17, %s12546_s17  }
   0xe   : > { %12505 = sst [smem:[#allocation26_spill]] %s11050_s19  ;;  %s312_s22 = sshll.u32 %s11056_s21, 4  ;;  %s313_s22 = int_to_ptr.vmem [resolvable:$true] %s312_s22 }
   0xf   : > { %s11157_s23 = sadd.s32 4294967295, %s11054_s20   ;;  %p8394_p0 = scmp.ge.s32.totalorder %s11054_s20, 1 }
  0x10   : > { %p12481_p1 = scmp.eq.s32.totalorder %s11157_s23, 0  ;;  %p297_p2 = scmp.lt.s32.totalorder %s11054_s20, 3 }
  0x11   : > { %s11057_s25 = smov [#allocation7]   ;;  %s10743_s29 = scalar_lea.vmem %s313_s22, 768 }
  0x12   : > { %p11163_p4 = pnand %p8394_p0, %p297_p2  ;;  %s326_s26 = sshll.u32 %s11057_s25, 4  ;;  %s327_s26 = int_to_ptr.vmem [resolvable:$true] %s326_s26 }
  0x13   : > { %p10744_p8 = scmp.ne.s32.totalorder %s313_s22, %s10743_s29  ;;  %p10751_p11 = scmp.lt.s32.totalorder %s313_s22, %s313_s22 }
  0x14   : > { %s12506_s24 = scalar_select %p11163_p4, 1, 0 }
  0x15   : > { %p9412_p5 = pneg %p11163_p4  ;;  %p10752_p12 = scmp.lt.s32.totalorder %s10743_s29, %s10743_s29 }
  0x17   : > { %p11171_p6 = pnand %p9412_p5, %p12481_p1  ;;  %p10753_p13 = por %p10752_p12, %p10751_p11 }
  0x19   : > { %s12507_s27 = scalar_select %p11171_p6, 1, 0 }
  0x1a   : > { %p11177_p7 = pneg %p11171_p6 }
  0x1c   : > { %s12508_s28 = scalar_select %p11177_p7, 1, 0 }
  0x1d   : > { %p10746_p9 = pnand %p10744_p8, %p11177_p7 }
  0x1f   : > { %p10747_p10 = pneg %p10746_p9 }
  0x21   : > { %p10754_p0 = pnand %p10753_p13, %p10747_p10 }
  0x23   : > { %10757 = shalt.err (!%p10754_p0)
}
  0x24   : > { %s12476_s30 = smov 128   ;;  %s12478_s12 = smov 8  }
  0x25   : > { %s12509_s1 = sld [smem:[#allocation31_spill]]  ;;  %s10769_s15 = scalar_lea.vmem %s327_s26, 32 }
  0x26   : > { %p10770_p2 = scmp.ne.s32.totalorder %s327_s26, %s10769_s15  ;;  %p10777_p9 = scmp.lt.s32.totalorder %s327_s26, %s327_s26 }
  0x27   : > { %p10778_p10 = scmp.lt.s32.totalorder %s10769_s15, %s10769_s15 }
  0x28   : > { %p10772_p5 = pnand %p10770_p2, %p11177_p7 }
  0x29   : > { %p10779_p11 = por %p10778_p10, %p10777_p9 }
  0x2a   : > { %p10773_p8 = pneg %p10772_p5 }
  0x2b   : > { %9415 = dma.hbm_to_vmem [thread:$0]  (!%p11171_p6), %s12509_s1, 768, %s313_s22, [#allocation5], %s12476_s30, %s12476_s30, %s12478_s12  }
  0x2c   : > { %p10780_p12 = pnand %p10779_p11, %p10773_p8 }
  0x2e   : > { %10783 = shalt.err (!%p10780_p12)
}
  0x2f   : > { %s12510_s2 = sld [smem:[#allocation32_spill]]  ;;  %s11199_s22 = sadd.s32 1, %s11054_s20  }
  0x30   : > { %12511 = sst [smem:[#allocation27_spill]] %s11199_s22  ;;  %s137_s25 = sadd.s32 1, %s11050_s19 }
  0x31   : > { %s134_s29 = ssub.s32 %s11054_s20, %s11199_s22  ;;  %p144_p13 = scmp.ne.s32.totalorder %s11050_s19, %s11046_s18 }
  0x32   : > { %p135_p0 = scmp.eq.s32.totalorder %s134_s29, 0  ;;  %p145_p2 = scmp.eq.s32.totalorder %s11054_s20, 0 }
  0x33   : > { %p150_p5 = scmp.ne.s32.totalorder %s11046_s18, %s11042_s17  ;;  %p9447_p8 = scmp.lt.s32.totalorder %s11054_s20, 2 }
  0x34   : > { %s11211_s13 = scalar_select %p135_p0, %s11050_s19, %s137_s25  }
  0x35   : > { %9418 = dma.hbm_to_vmem [thread:$0]  (!%p11171_p6), %s12510_s2, 32, %s327_s26, [#allocation8]  }
  0x36   : > { %12512 = sst [smem:[#allocation28_spill]] %s11211_s13  ;;  %p146_p9 = por %p145_p2, %p144_p13 }
  0x37   : > { %p11215_p10 = por %p12481_p1, %p150_p5  ;;  %s386_s15 = sand.u32 1, %s11054_s20  }
  0x38   : > { %s11221_s26 = sand.u32 1, %s11050_s19   ;;  %s9376_s21 = smul.u32 73728, %s11054_s20 }
  0x39   : > { %s12513_s14 = scalar_select %p11215_p10, 1, 0 }
  0x3a   : > { %s9375_s16 = smul.u32 4608, %s11221_s26  ;;  %p11225_p11 = pnand %p9447_p8, %p146_p9 }
  0x3b   : > { %12514 = sst [smem:[#allocation29_spill]] %s12513_s14  ;;  %s11236_s2 = scalar_lea.sflag [#allocation5], %s386_s15 }
  0x3c   : > { %s12516_s5 = sld [smem:[#allocation34_spill]]  ;;  %s390_s12 = scalar_lea.vmem [#allocation12], %s9375_s16 }
  0x3d   : > { %s397_s1 = sshll.u32 %s390_s12, 4  ;;  %p11242_p13 = pneg %p11225_p11  ;;  %s11234_s1 = int_to_ptr.vmem [resolvable:$true] %s397_s1 }
  0x42   : > { %s11232_s25 = scalar_lea.hbm %s12516_s5, %s9376_s21  ;;  %s10789_s16 = scalar_lea.hbm %s12516_s5, 147456 }
  0x43   : > { %s10784_s13 = scalar_lea.hbm %s11232_s25, 73728  ;;  %p10790_p5 = scmp.lt.s32.totalorder %s11232_s25, %s12516_s5 }
  0x44   : > { %p10785_p12 = scmp.ne.s32.totalorder %s11232_s25, %s10784_s13  ;;  %p10791_p8 = scmp.lt.s32.totalorder %s10789_s16, %s10784_s13 }
  0x46   : > { %p10787_p0 = pnand %p11242_p13, %p10785_p12  ;;  %p10792_p9 = por %p10791_p8, %p10790_p5 }
  0x48   : > { %p10788_p2 = pneg %p10787_p0 }
  0x4a   : > { %p10793_p3 = pnand %p10792_p9, %p10788_p2 }
  0x4c   : > { %10796 = shalt.err (!%p10793_p3)
}
  0x4d   : > { %s10797_s15 = scalar_lea.vmem %s11234_s1, 73728  ;;  %s11060_s22 = smov [#allocation12]  }
  0x4e   : > { %p10798_p1 = scmp.ne.s32.totalorder %s11234_s1, %s10797_s15  ;;  %s10802_s21 = sshll.u32 %s11060_s22, 4  ;;  %s10803_s21 = int_to_ptr.vmem [resolvable:$false] %s10802_s21 }
  0x4f   : > { %s10804_s17 = scalar_lea.vmem %s10803_s21, 147456  ;;  %p10805_p10 = scmp.lt.s32.totalorder %s11234_s1, %s10803_s21 }
  0x50   : > { %p10800_p12 = pnand %p10798_p1, %p11242_p13  ;;  %p10806_p4 = scmp.lt.s32.totalorder %s10804_s17, %s10797_s15 }
  0x52   : > { %p10801_p0 = pneg %p10800_p12  ;;  %p10807_p6 = por %p10806_p4, %p10805_p10 }
  0x54   : > { %p10808_p7 = pnand %p10807_p6, %p10801_p0 }
  0x56   : > { %10811 = shalt.err (!%p10808_p7)
}
  0x57   : > { %s12518_s13 = smov 8   ;;  %s12519_s16 = smov 128  }
  0x58   : > { %9434 = dma.hbm_to_vmem [thread:$0]  (!%p11225_p11), %s11232_s25, 73728, %s11234_s1, %s11236_s2, %s12519_s16, %s12519_s16, %s12518_s13  }
  0x59   : > { %s11061_s12 = smov [#allocation9]   ;;  %p12520_p3 = scmp.ne.s32.totalorder %s12508_s28, 0 }
  0x5a   : > { %s336_s29 = sshll.u32 %s11061_s12, 4  ;;  %s337_s29 = int_to_ptr.vmem [resolvable:$true] %s336_s29 }
  0x5b   : > { %s10823_s22 = scalar_lea.vmem %s337_s29, 16128  ;;  %p10831_p6 = scmp.lt.s32.totalorder %s337_s29, %s337_s29 }
  0x5c   : > { %p10824_p1 = scmp.ne.s32.totalorder %s337_s29, %s10823_s22  ;;  %p10832_p7 = scmp.lt.s32.totalorder %s10823_s22, %s10823_s22 }
  0x5e   : > { %p10826_p2 = pnand %p10824_p1, %p12520_p3  ;;  %p10833_p10 = por %p10832_p7, %p10831_p6 }
  0x60   : > { %p10827_p4 = pneg %p10826_p2 }
  0x62   : > { %p10834_p5 = pnand %p10833_p10, %p10827_p4 }
  0x64   : > { %10837 = shalt.err (!%p10834_p5)
}
  0x65   : > { %s11062_s15 = smov 192   ;;  %s11063_s21 = smov 12  }
  0x66   : > { %p12521_p8 = scmp.ne.s32.totalorder %s12507_s27, 0  ;;  %s12522_s3 = sld [smem:[#allocation33_spill]] }
  0x67   : > { %s8403_s17 = sshll.u32 %s11221_s26, 1  ;;  %s11064_s12 = smov [#allocation10]  }
  0x68   : > { %s350_s5 = sshll.u32 %s11064_s12, 4  ;;  %s9286_s11 = sshll.u32 %s11054_s20, 5  ;;  %s351_s5 = int_to_ptr.vmem [resolvable:$true] %s350_s5 }
  0x69   : > { %s10849_s22 = scalar_lea.vmem %s351_s5, 48  ;;  %s10856_s9 = scalar_lea.vmem %s351_s5, 64 }
  0x6a   : > { %p10850_p9 = scmp.ne.s32.totalorder %s351_s5, %s10849_s22  ;;  %p10857_p1 = scmp.lt.s32.totalorder %s351_s5, %s351_s5 }
  0x6b   : > { %p10858_p2 = scmp.lt.s32.totalorder %s10856_s9, %s10849_s22 }
  0x6c   : > { %9421 = dma.hbm_to_vmem [thread:$0]  (!%p12521_p8), %s12522_s3, 16128, %s337_s29, [#allocation8], %s11062_s15, %s11062_s15, %s11063_s21  }
  0x6d   : > { %p10852_p12 = pnand %p10850_p9, %p12520_p3  ;;  %p10859_p4 = por %p10858_p2, %p10857_p1 }
  0x6f   : > { %p10853_p0 = pneg %p10852_p12 }
  0x71   : > { %p10860_p6 = pnand %p10859_p4, %p10853_p0 }
  0x73   : > { %10863 = shalt.err (!%p10860_p6)
}
  0x74   : > { %9424 = dma.hbm_to_vmem [thread:$0]  (!%p12521_p8), %s12468_s4, 48, %s351_s5, [#allocation11]  }
  0x75   : > { %s417_s25 = scalar_lea.hbm %s12470_s6, %s9286_s11  ;;  %s411_s12 = scalar_lea.vmem [#allocation13], %s8403_s17 }
  0x76   : > { %s419_s3 = sshll.u32 %s411_s12, 4  ;;  %s10864_s0 = scalar_lea.hbm %s417_s25, 32  ;;  %s420_s3 = int_to_ptr.vmem [resolvable:$true] %s419_s3 }
  0x77   : > { %p10865_p7 = scmp.ne.s32.totalorder %s417_s25, %s10864_s0  ;;  %s10869_s14 = scalar_lea.hbm %s12470_s6, 64 }
  0x78   : > { %p10870_p9 = scmp.lt.s32.totalorder %s417_s25, %s12470_s6  ;;  %p10871_p12 = scmp.lt.s32.totalorder %s10869_s14, %s10864_s0 }
  0x79   : > { %p10867_p10 = pnand %p10865_p7, %p11242_p13 }
  0x7a   : > { %p10872_p0 = por %p10871_p12, %p10870_p9 }
  0x7b   : > { %p10868_p5 = pneg %p10867_p10 }
  0x7d   : > { %p10873_p1 = pnand %p10872_p0, %p10868_p5 }
  0x7f   : > { %10876 = shalt.err (!%p10873_p1)
}
  0x80   : > { %s10877_s5 = scalar_lea.vmem %s420_s3, 32  ;;  %s11065_s11 = smov [#allocation13]  }
  0x81   : > { %p10878_p2 = scmp.ne.s32.totalorder %s420_s3, %s10877_s5  ;;  %s10882_s17 = sshll.u32 %s11065_s11, 4  ;;  %s10883_s17 = int_to_ptr.vmem [resolvable:$false] %s10882_s17 }
  0x82   : > { %s10884_s29 = scalar_lea.vmem %s10883_s17, 64  ;;  %p10885_p7 = scmp.lt.s32.totalorder %s420_s3, %s10883_s17 }
  0x83   : > { %p10880_p4 = pnand %p10878_p2, %p11242_p13  ;;  %p10886_p10 = scmp.lt.s32.totalorder %s10884_s29, %s10877_s5 }
  0x85   : > { %p10881_p6 = pneg %p10880_p4  ;;  %p10887_p8 = por %p10886_p10, %p10885_p7 }
  0x87   : > { %p10888_p3 = pnand %p10887_p8, %p10881_p6 }
  0x89   : > { %10891 = shalt.err (!%p10888_p3)
}
  0x8a   : > { %9437 = dma.hbm_to_vmem [thread:$0]  (!%p11225_p11), %s417_s25, 32, %s420_s3, %s11236_s2  }
  0x8b   : > { %s11066_s0 = smov [#allocation15]   ;;  %s11067_s14 = smov [#allocation16]  }
  0x8c   : > { %s361_s18 = sshll.u32 %s11066_s0, 4  ;;  %s375_s15 = sshll.u32 %s11067_s14, 4  ;;  %s362_s18 = int_to_ptr.vmem [resolvable:$true] %s361_s18  ;;  %s376_s15 = int_to_ptr.vmem [resolvable:$true] %s375_s15 }
  0x8d   : > { %s10903_s21 = scalar_lea.vmem %s362_s18, 16  ;;  %p12523_p9 = scmp.ne.s32.totalorder %s12508_s28, 0 }
  0x8e   : > { %p10904_p5 = scmp.ne.s32.totalorder %s362_s18, %s10903_s21  ;;  %s10910_s12 = scalar_lea.vmem %s362_s18, 32 }
  0x8f   : > { %p10911_p1 = scmp.lt.s32.totalorder %s362_s18, %s362_s18  ;;  %p10912_p2 = scmp.lt.s32.totalorder %s10910_s12, %s10903_s21 }
  0x90   : > { %p10906_p12 = pnand %p10904_p5, %p12523_p9 }
  0x91   : > { %p10913_p8 = por %p10912_p2, %p10911_p1 }
  0x92   : > { %p10907_p0 = pneg %p10906_p12 }
  0x94   : > { %p10914_p3 = pnand %p10913_p8, %p10907_p0 }
  0x96   : > { %10917 = shalt.err (!%p10914_p3)
}
  0x97   : > { %p12524_p4 = scmp.ne.s32.totalorder %s12507_s27, 0  ;;  %s8406_s25 = sshll.u32 %s11221_s26, 8 }
  0x98   : > { %s10929_s22 = scalar_lea.vmem %s376_s15, 16  ;;  %s10936_s1 = scalar_lea.vmem %s376_s15, 32 }
  0x99   : > { %9427 = dma.hbm_to_vmem [thread:$0]  (!%p12524_p4), %s12472_s8, 16, %s362_s18, [#allocation8]  }
  0x9a   : > { %p10930_p6 = scmp.ne.s32.totalorder %s376_s15, %s10929_s22  ;;  %p10937_p5 = scmp.lt.s32.totalorder %s376_s15, %s376_s15 }
  0x9b   : > { %p10938_p12 = scmp.lt.s32.totalorder %s10936_s1, %s10929_s22 }
  0x9c   : > { %p10932_p7 = pnand %p10930_p6, %p12523_p9 }
  0x9d   : > { %p10939_p0 = por %p10938_p12, %p10937_p5 }
  0x9e   : > { %p10933_p10 = pneg %p10932_p7 }
  0xa0   : > { %p10940_p1 = pnand %p10939_p0, %p10933_p10 }
  0xa2   : > { %10943 = shalt.err (!%p10940_p1)
}
  0xa3   : > { %9430 = dma.hbm_to_vmem [thread:$0]  (!%p12524_p4), %s12474_s10, 16, %s376_s15, [#allocation11]  }
  0xa4   : > { %s9287_s26 = sshll.u32 %s11054_s20, 12  ;;  %s430_s0 = scalar_lea.vmem [#allocation14], %s8406_s25 }
  0xa5   : > { %s11319_s28 = scalar_lea.hbm %s12471_s7, %s9287_s26  ;;  %s437_s18 = sshll.u32 %s430_s0, 4  ;;  %s438_s18 = int_to_ptr.vmem [resolvable:$true] %s437_s18 }
  0xa6   : > { %s10944_s14 = scalar_lea.hbm %s11319_s28, 4096  ;;  %s10949_s20 = scalar_lea.hbm %s12471_s7, 8192 }
  0xa7   : > { %p10945_p9 = scmp.ne.s32.totalorder %s11319_s28, %s10944_s14  ;;  %p10950_p3 = scmp.lt.s32.totalorder %s11319_s28, %s12471_s7 }
  0xa8   : > { %p10951_p4 = scmp.lt.s32.totalorder %s10949_s20, %s10944_s14 }
  0xa9   : > { %p10947_p2 = pnand %p10945_p9, %p11242_p13 }
  0xaa   : > { %p10952_p6 = por %p10951_p4, %p10950_p3 }
  0xab   : > { %p10948_p8 = pneg %p10947_p2 }
  0xad   : > { %p10953_p7 = pnand %p10952_p6, %p10948_p8 }
  0xaf   : > { %10956 = shalt.err (!%p10953_p7)
}
  0xb0   : > { %s10957_s9 = scalar_lea.vmem %s438_s18, 4096  ;;  %s11068_s3 = smov [#allocation14]  }
  0xb1   : > { %p10958_p10 = scmp.ne.s32.totalorder %s438_s18, %s10957_s9  ;;  %s10962_s25 = sshll.u32 %s11068_s3, 4  ;;  %s10963_s25 = int_to_ptr.vmem [resolvable:$false] %s10962_s25 }
  0xb2   : > { %s10964_s22 = scalar_lea.vmem %s10963_s25, 8192  ;;  %p10965_p0 = scmp.lt.s32.totalorder %s438_s18, %s10963_s25 }
  0xb3   : > { %p10960_p5 = pnand %p10958_p10, %p11242_p13  ;;  %p10966_p1 = scmp.lt.s32.totalorder %s10964_s22, %s10957_s9 }
  0xb5   : > { %p10961_p12 = pneg %p10960_p5  ;;  %p10967_p9 = por %p10966_p1, %p10965_p0 }
  0xb7   : > { %p10968_p2 = pnand %p10967_p9, %p10961_p12 }
  0xb9   : > { %10971 = shalt.err (!%p10968_p2)
}
  0xba   : > { %9440 = dma.hbm_to_vmem [thread:$0]  (!%p11225_p11), %s11319_s28, 4096, %s438_s18, %s11236_s2, %s12519_s16, %s12519_s16, %s12518_s13  }
  0xbb   : > { %p12525_p13 = scmp.ne.s32.totalorder %s12506_s24, 0 }
  0xbc   : > { %p12526_p8 = scmp.eq.s32.totalorder (!%p12525_p13), %s11157_s23, 0 }
  0xbd   : > { %449 = sbr.rel (%p12525_p13) target bundleno = 2361 (0x939), region = 64 }
  0xc2   : > { %11013 = dma.done.wait (%p12526_p8), [#allocation5], 768   ;;  %p12527_p3 = pmov %p12526_p8 }
  0xc4   : > { %11015 = vsyncadd (%p12527_p3), [#allocation5], 4294966528  ;;  %p12528_p4 = pmov %p12527_p3 }
  0xc5   : > { %p12529_p6 = pmov %p12527_p3 }
  0xc6   : > { %11017 = dma.done.wait (%p12528_p4), [#allocation8], 16160  }
  0xc7   : > { %11019 = vsyncadd (%p12529_p6), [#allocation8], 4294951136  ;;  %p12530_p7 = pmov %p12527_p3 }
  0xc8   : > { %p12531_p11 = pmov %p12527_p3 }
  0xc9   : > { %11021 = dma.done.wait (%p12530_p7), [#allocation11], 48  }
  0xca   : > { %11023 = vsyncadd (%p12531_p11), [#allocation11], 4294967248  ;;  %s12532_s2 = sld [smem:[#allocation25_spill]]  ;;  %s467_s24 = sand.u32 1, %s11157_s23  }
  0xcb   : > { %s12533_s19 = sld [smem:[#allocation29_spill]]  ;;  %s468_s16 = scalar_lea.sflag [#allocation5], %s467_s24 }
  0xd0   : > { %s469_s30 = sand.u32 1, %s12532_s2  }
  0xd1   : > { %s9377_s13 = smul.u32 4608, %s469_s30  ;;  %p12534_p10 = scmp.ne.s32.totalorder %s12533_s19, 0 }
  0xd3   : > { %s11357_s1 = scalar_lea.vmem [#allocation12], %s9377_s13 }
  0xd4   : > { %11025 = dma.done.wait (%p12534_p10), %s468_s16, 77856  }
  0xd5   : > { %11027 = vsyncadd (%p12534_p10), %s468_s16, 4294889440  ;;  %s8414_s5 = sshll.u32 %s469_s30, 1  ;;  %s8415_s11 = sshll.u32 %s469_s30, 8 }
  0xd6   : > { %s11363_s26 = scalar_lea.vmem [#allocation13], %s8414_s5  ;;  %s11365_s17 = scalar_lea.vmem [#allocation14], %s8415_s11 }
  0xd7   : > { %p12535_p5 = pmov %p12527_p3 }
  0xd8   : > { %p12536_p12 = pmov %p12527_p3 }
  0xd9   : > { %11029 = dma.done.wait (%p12535_p5), [#allocation8], 16  }
  0xda   : > { %11031 = vsyncadd (%p12536_p12), [#allocation8], 4294967280  ;;  %p12537_p0 = pmov %p12527_p3 }
  0xdc   : > { %11033 = dma.done.wait (%p12537_p0), [#allocation11], 16   ;;  %p12538_p1 = pmov %p12537_p0 }
  0xdd   : > { %p12539_p9 = scmp.ne.s32.totalorder %s11157_s23, 0 }
  0xde   : > { %11035 = vsyncadd (%p12538_p1), [#allocation11], 4294967280  ;;  %s12540_s0 = sld [smem:[#allocation30_spill]] (!%p12539_p9) }
  0xdf   : > { %547 = sbr.rel (%p12539_p9) target bundleno = 1132 (0x46c), region = 104 }
  0xe4   : > { %v9505_v0 = vld [vmem:[#allocation4 + $0x14] ss:$8 sps:$4 sm:$0xff]   ;;  %v9507_v1 = vld [vmem:[#allocation4 + $0x4] ss:$8 sps:$4 sm:$0xff]   ;;  %v11069_v2 = vmov 0   ;;  %vm573_vm0 = vcmask 130048   ;;  %v742_v58 = vlaneseq }
  0xe5   : > { %609 = vmatprep.mubr.bf16.mxu0 %v11069_v2  ;;  %664 = vmatprep.mubr.bf16.mxu1 %v11069_v2  ;;  %v9509_v3 = vld [vmem:[#allocation4 + $0x10] ss:$8 sps:$4 sm:$0xff]   ;;  %v9510_v4 = vld [vmem:[#allocation4] ss:$8 sps:$4 sm:$0xff]   ;;  %v9513_v8 = vld [vmem:[#allocation4 + $0x24] ss:$8 sps:$4 sm:$0xff]  }
  0xe6   : > { %591 = vmatprep.subr.bf16.mxu0 %v9505_v0  ;;  %v548_v5 = vld [vmem:[%s12540_s0] sm:$0xff]  ;;  %646 = vmatprep.subr.bf16.mxu1 %v9507_v1  ;;  %v549_v6 = vld [vmem:[%s12540_s0 + $0x8] sm:$0xff]  ;;  %v9528_v20 = vld [vmem:[#allocation9 + $0x1b4] ss:$12 sps:$4 sm:$0xff]   ;;  %v11405_v61 = vshrl.u32 %v742_v58, 7  ;;  %vm1114_vm1 = vcmask 785408  }
  0xe7   : > { %592 = vmatpush1.bf16.msra.mxu0 %v9509_v3  ;;  %647 = vmatpush1.bf16.msra.mxu1 %v9510_v4  ;;  %v550_v7 = vpack.c.bf16 %v549_v6, %v548_v5  ;;  %v9514_v9 = vld [vmem:[#allocation9 + $0x1f8] ss:$12 sps:$4 sm:$0xff]   ;;  %v9516_v10 = vld [vmem:[#allocation9 + $0x1fc] ss:$12 sps:$4 sm:$0xff]   ;;  %v9518_v14 = vld [vmem:[#allocation9 + $0x1e0] ss:$12 sps:$4 sm:$0xff]  }
  0xe8   : > { %707 = vmatprep.subr.bf16.mxu0 %v9513_v8  ;;  %1118 = vmatprep.subr.bf16.mxu1 %v9516_v10  ;;  %v9520_v15 = vld [vmem:[#allocation9 + $0x1e4] ss:$12 sps:$4 sm:$0xff]   ;;  %v9524_v18 = vld [vmem:[#allocation9 + $0x1cc] ss:$12 sps:$4 sm:$0xff]   ;;  %v9522_v19 = vld [vmem:[#allocation9 + $0x1c8] ss:$12 sps:$4 sm:$0xff]  }
  0xe9   : > { %v557_v11 = vshrl.u32 %v550_v7, 16  ;;  %v559_v12 = vshll.u32 %v550_v7, 16  ;;  %v9511_v16 = vld [vmem:[#allocation4 + $0x20] ss:$8 sps:$4 sm:$0xff]   ;;  %v679_v21 = vrot.slane %v550_v7, 1  ;;  %v11408_v1 = vsub.s32 0, %v11405_v61 }
  0xea   : > { %8424 = vmatmul.mubr.msk.bf16.vlgmr.msra.gmra.mxu1 %vm573_vm0, %v550_v7  ;;  %v9526_v22 = vld [vmem:[#allocation9 + $0x1b0] ss:$12 sps:$4 sm:$0xff]   ;;  %v9517_v23 = vld [vmem:[#allocation9 + $0x200] ss:$12 sps:$4 sm:$0xff]   ;;  %v9521_v25 = vld [vmem:[#allocation9 + $0x1e8] ss:$12 sps:$4 sm:$0xff]  }
  0xeb   : > { %v561_v13 = vrot.slane %v559_v12, 1  ;;  %1119 = vmatpush1.bf16.msra.mxu1 %v9514_v9  ;;  %v9532_v24 = vld [vmem:[#allocation9 + $0x19c] ss:$12 sps:$4 sm:$0xff]   ;;  %v9530_v26 = vld [vmem:[#allocation9 + $0x198] ss:$12 sps:$4 sm:$0xff]   ;;  %v11411_v7 = vsub.s32 1, %v11405_v61 }
  0xec   : > { %1120 = vmatprep.subr.bf16.mxu1 %v9520_v15  ;;  %v9536_v27 = vld [vmem:[#allocation9 + $0x184] ss:$12 sps:$4 sm:$0xff]   ;;  %v9534_v28 = vld [vmem:[#allocation9 + $0x180] ss:$12 sps:$4 sm:$0xff]   ;;  %v9538_v31 = vld [vmem:[#allocation9 + $0x168] ss:$12 sps:$4 sm:$0xff]  }
  0xed   : > { %v562_v17 = vor.u32 %v561_v13, %v557_v11  ;;  %v9525_v29 = vld [vmem:[#allocation9 + $0x1d0] ss:$12 sps:$4 sm:$0xff]   ;;  %v9540_v30 = vld [vmem:[#allocation9 + $0x16c] ss:$12 sps:$4 sm:$0xff]   ;;  %v9537_v34 = vld [vmem:[#allocation9 + $0x188] ss:$12 sps:$4 sm:$0xff]  }
  0xee   : > { %v9529_v32 = vld [vmem:[#allocation9 + $0x1b8] ss:$12 sps:$4 sm:$0xff]   ;;  %v9533_v33 = vld [vmem:[#allocation9 + $0x1a0] ss:$12 sps:$4 sm:$0xff]   ;;  %v9541_v35 = vld [vmem:[#allocation9 + $0x170] ss:$12 sps:$4 sm:$0xff]  }
  0xef   : > { %8421 = vmatmul.mubr.msk.bf16.vlgmr.msra.gmra.mxu0 %vm573_vm0, %v562_v17  ;;  %1121 = vmatpush1.bf16.msra.mxu1 %v9518_v14  ;;  %v9544_v36 = vld [vmem:[#allocation9 + $0x154] ss:$12 sps:$4 sm:$0xff]   ;;  %v9542_v37 = vld [vmem:[#allocation9 + $0x150] ss:$12 sps:$4 sm:$0xff]   ;;  %v9545_v38 = vld [vmem:[#allocation9 + $0x158] ss:$12 sps:$4 sm:$0xff]  }
  0xf0   : > { %708 = vmatpush1.bf16.msra.mxu0 %v9511_v16  ;;  %725 = vmatprep.mubr.bf16.mxu0 %v11069_v2  ;;  %v9548_v39 = vld [vmem:[#allocation9 + $0x28c] ss:$12 sps:$4 sm:$0xff]   ;;  %v9546_v40 = vld [vmem:[#allocation9 + $0x288] ss:$12 sps:$4 sm:$0xff]   ;;  %v9549_v41 = vld [vmem:[#allocation9 + $0x290] ss:$12 sps:$4 sm:$0xff]  }
  0xf1   : > { %1161 = vmatprep.subr.bf16.mxu0 %v11069_v2  ;;  %1122 = vmatprep.subr.bf16.mxu1 %v9524_v18  ;;  %v9552_v42 = vld [vmem:[#allocation9 + $0x274] ss:$12 sps:$4 sm:$0xff]   ;;  %v9550_v43 = vld [vmem:[#allocation9 + $0x270] ss:$12 sps:$4 sm:$0xff]   ;;  %v9553_v44 = vld [vmem:[#allocation9 + $0x278] ss:$12 sps:$4 sm:$0xff]  }
  0xf2   : > { %v9556_v45 = vld [vmem:[#allocation9 + $0x25c] ss:$12 sps:$4 sm:$0xff]   ;;  %v9554_v46 = vld [vmem:[#allocation9 + $0x258] ss:$12 sps:$4 sm:$0xff]   ;;  %v9557_v47 = vld [vmem:[#allocation9 + $0x260] ss:$12 sps:$4 sm:$0xff]  }
  0xf3   : > { %1123 = vmatpush1.bf16.msra.mxu1 %v9522_v19  ;;  %v9560_v48 = vld [vmem:[#allocation9 + $0x244] ss:$12 sps:$4 sm:$0xff]   ;;  %v9558_v49 = vld [vmem:[#allocation9 + $0x240] ss:$12 sps:$4 sm:$0xff]   ;;  %v9561_v50 = vld [vmem:[#allocation9 + $0x248] ss:$12 sps:$4 sm:$0xff]  }
  0xf4   : > { %1124 = vmatprep.subr.bf16.mxu1 %v9528_v20  ;;  %v9564_v51 = vld [vmem:[#allocation9 + $0x22c] ss:$12 sps:$4 sm:$0xff]   ;;  %v9562_v52 = vld [vmem:[#allocation9 + $0x228] ss:$12 sps:$4 sm:$0xff]   ;;  %v9565_v53 = vld [vmem:[#allocation9 + $0x230] ss:$12 sps:$4 sm:$0xff]  }
  0xf5   : > { %v9566_v54 = vld [vmem:[#allocation9 + $0x210] ss:$12 sps:$4 sm:$0xff]   ;;  %v9568_v55 = vld [vmem:[#allocation9 + $0x214] ss:$12 sps:$4 sm:$0xff]   ;;  %v9569_v56 = vld [vmem:[#allocation9 + $0x218] ss:$12 sps:$4 sm:$0xff]  }
  0xf6   : > { %v9572_v57 = vld [vmem:[#allocation9 + $0xac] ss:$12 sps:$4 sm:$0xff]   ;;  %v740_v5 = vld [vmem:[#allocation7] sm:$0x3]  ;;  %vm11505_vm2 = vcmp.lt.s32.totalorder %v742_v58, 384 }
  0xf7   : > { %8427 = vmatmul.mubr.msk.bf16.vlgmr.msra.gmra.mxu0 %vm573_vm0, %v679_v21  ;;  %1125 = vmatpush1.bf16.msra.mxu1 %v9526_v22  ;;  %v745_v11 = vrot.slane %v740_v5, %v11408_v1  ;;  %v749_v16 = vrot.slane %v740_v5, %v11411_v7  ;;  %v9605_v5 = vld [vmem:[#allocation9 + $0x140] ss:$12 sps:$4 sm:$0xff]  }
  0xf8   : > { %1162 = vmatpush1.bf16.msra.mxu0 %v9517_v23  ;;  %1126 = vmatprep.subr.bf16.mxu1 %v9532_v24 }
  0xf9   : > { %1163 = vmatprep.subr.bf16.mxu0 %v11069_v2 }
  0xfb   : > { %1127 = vmatpush1.bf16.msra.mxu1 %v9530_v26 }
  0xfc   : > { %1164 = vmatpush1.bf16.msra.mxu0 %v9521_v25  ;;  %1128 = vmatprep.subr.bf16.mxu1 %v9536_v27 }
  0xfd   : > { %1165 = vmatprep.subr.bf16.mxu0 %v11069_v2 }
  0xff   : > { %1129 = vmatpush1.bf16.msra.mxu1 %v9534_v28 }
 0x100   : > { %1166 = vmatpush1.bf16.msra.mxu0 %v9525_v29  ;;  %1130 = vmatprep.subr.bf16.mxu1 %v9540_v30 }
 0x101   : > { %1167 = vmatprep.subr.bf16.mxu0 %v11069_v2 }
 0x103   : > { %1131 = vmatpush1.bf16.msra.mxu1 %v9538_v31 }
 0x104   : > { %1168 = vmatpush1.bf16.msra.mxu0 %v9529_v32  ;;  %1132 = vmatprep.subr.bf16.mxu1 %v9544_v36 }
 0x105   : > { %1169 = vmatprep.subr.bf16.mxu0 %v11069_v2 }
 0x107   : > { %1133 = vmatpush1.bf16.msra.mxu1 %v9542_v37 }
 0x108   : > { %1170 = vmatpush1.bf16.msra.mxu0 %v9533_v33  ;;  %1138 = vmatprep.subr.bf16.mxu1 %v9548_v39  ;;  %v9570_v39 = vld [vmem:[#allocation9 + $0xa8] ss:$12 sps:$4 sm:$0xff]  }
 0x109   : > { %1171 = vmatprep.subr.bf16.mxu0 %v11069_v2 }
 0x10b   : > { %1139 = vmatpush2.bf16.msra.mxu1 %v9546_v40  ;;  %v9573_v40 = vld [vmem:[#allocation9 + $0xb0] ss:$12 sps:$4 sm:$0xff]  }
 0x10c   : > { %1172 = vmatpush1.bf16.msra.mxu0 %v9537_v34  ;;  %1140 = vmatprep.subr.bf16.mxu1 %v9552_v42  ;;  %v9576_v42 = vld [vmem:[#allocation9 + $0x94] ss:$12 sps:$4 sm:$0xff]  }
 0x10d   : > { %1173 = vmatprep.subr.bf16.mxu0 %v11069_v2 }
 0x10f   : > { %1141 = vmatpush2.bf16.msra.mxu1 %v9550_v43  ;;  %v9574_v43 = vld [vmem:[#allocation9 + $0x90] ss:$12 sps:$4 sm:$0xff]  }
 0x110   : > { %1174 = vmatpush1.bf16.msra.mxu0 %v9541_v35  ;;  %1142 = vmatprep.subr.bf16.mxu1 %v9556_v45  ;;  %v9580_v45 = vld [vmem:[#allocation9 + $0x7c] ss:$12 sps:$4 sm:$0xff]  }
 0x111   : > { %1175 = vmatprep.subr.bf16.mxu0 %v11069_v2 }
 0x113   : > { %1143 = vmatpush2.bf16.msra.mxu1 %v9554_v46  ;;  %v9578_v46 = vld [vmem:[#allocation9 + $0x78] ss:$12 sps:$4 sm:$0xff]  }
 0x114   : > { %1176 = vmatpush1.bf16.msra.mxu0 %v9545_v38  ;;  %1144 = vmatprep.subr.bf16.mxu1 %v9560_v48  ;;  %v9584_v48 = vld [vmem:[#allocation9 + $0x64] ss:$12 sps:$4 sm:$0xff]  }
 0x115   : > { %1181 = vmatprep.subr.bf16.mxu0 %v11069_v2 }
 0x117   : > { %1145 = vmatpush2.bf16.msra.mxu1 %v9558_v49  ;;  %v9582_v49 = vld [vmem:[#allocation9 + $0x60] ss:$12 sps:$4 sm:$0xff]  }
 0x118   : > { %1182 = vmatpush2.bf16.msra.mxu0 %v9549_v41  ;;  %1146 = vmatprep.subr.bf16.mxu1 %v9564_v51  ;;  %v9588_v51 = vld [vmem:[#allocation9 + $0x4c] ss:$12 sps:$4 sm:$0xff]  }
 0x119   : > { %1183 = vmatprep.subr.bf16.mxu0 %v11069_v2 }
 0x11b   : > { %1147 = vmatpush2.bf16.msra.mxu1 %v9562_v52  ;;  %v9586_v52 = vld [vmem:[#allocation9 + $0x48] ss:$12 sps:$4 sm:$0xff]  }
 0x11c   : > { %1184 = vmatpush2.bf16.msra.mxu0 %v9553_v44  ;;  %1148 = vmatprep.subr.bf16.mxu1 %v9568_v55  ;;  %v9577_v44 = vld [vmem:[#allocation9 + $0x98] ss:$12 sps:$4 sm:$0xff]   ;;  %v9590_v55 = vld [vmem:[#allocation9 + $0x30] ss:$12 sps:$4 sm:$0xff]  }
 0x11d   : > { %1185 = vmatprep.subr.bf16.mxu0 %v11069_v2 }
 0x11f   : > { %1149 = vmatpush2.bf16.msra.mxu1 %v9566_v54  ;;  %v9592_v54 = vld [vmem:[#allocation9 + $0x34] ss:$12 sps:$4 sm:$0xff]  }
 0x120   : > { %1186 = vmatpush2.bf16.msra.mxu0 %v9557_v47  ;;  %1428 = vmatprep.subr.bf16.mxu1 %v9572_v57  ;;  %v9581_v47 = vld [vmem:[#allocation9 + $0x80] ss:$12 sps:$4 sm:$0xff]   ;;  %v9596_v57 = vld [vmem:[#allocation9 + $0x1c] ss:$12 sps:$4 sm:$0xff]  }
 0x121   : > { %1187 = vmatprep.subr.bf16.mxu0 %v11069_v2 }
 0x124   : > { %1188 = vmatpush2.bf16.msra.mxu0 %v9561_v50  ;;  %v9585_v50 = vld [vmem:[#allocation9 + $0x68] ss:$12 sps:$4 sm:$0xff]  }
 0x125   : > { %1189 = vmatprep.subr.bf16.mxu0 %v11069_v2 }
 0x128   : > { %1190 = vmatpush2.bf16.msra.mxu0 %v9565_v53  ;;  %v9589_v53 = vld [vmem:[#allocation9 + $0x50] ss:$12 sps:$4 sm:$0xff]  }
 0x129   : > { %1191 = vmatprep.subr.bf16.mxu0 %v11069_v2 }
 0x12c   : > { %1192 = vmatpush2.bf16.msra.mxu0 %v9569_v56  ;;  %v9593_v56 = vld [vmem:[#allocation9 + $0x38] ss:$12 sps:$4 sm:$0xff]  }
 0x12d   : > { %1471 = vmatprep.subr.bf16.mxu0 %v11069_v2 }
 0x1aa   : > { %v666_v59 = vpop.f32.mrf.mxu1 }
 0x1ac   : > { %v668_v63 = vpop.f32.mrf.mxu1 }
 0x1ae   : > { %v670_v3 = vpop.f32.mrf.mxu1 }
 0x1af   : > { %v611_v60 = vpop.f32.mrf.mxu0 }
 0x1b0   : > { %v667_v6 = vadd.f32 %v666_v59, %v611_v60  ;;  %v672_v12 = vpop.f32.mrf.mxu1  ;;  %v9594_v59 = vld [vmem:[#allocation9 + $0x18] ss:$12 sps:$4 sm:$0xff]   ;;  %v9597_v60 = vld [vmem:[#allocation9 + $0x20] ss:$12 sps:$4 sm:$0xff]  }
 0x1b1   : > { %v613_v62 = vpop.f32.mrf.mxu0 }
 0x1b2   : > { %v669_v9 = vadd.f32 %v668_v63, %v613_v62  ;;  %v9600_v62 = vld [vmem:[#allocation9 + $0x4] ss:$12 sps:$4 sm:$0xff]   ;;  %v9598_v63 = vld [vmem:[#allocation9] ss:$12 sps:$4 sm:$0xff]  }
 0x1b3   : > { %v615_v0 = vpop.f32.mrf.mxu0 }
 0x1b4   : > { %v671_v14 = vadd.f32 %v670_v3, %v615_v0  ;;  %v9601_v0 = vld [vmem:[#allocation9 + $0x8] ss:$12 sps:$4 sm:$0xff]  }
 0x1b5   : > { %v617_v4 = vpop.f32.mrf.mxu0  ;;  %v9604_v3 = vld [vmem:[#allocation9 + $0x13c] ss:$12 sps:$4 sm:$0xff]  }
 0x1b6   : > { %v673_v18 = vadd.f32 %v672_v12, %v617_v4  ;;  %v9602_v4 = vld [vmem:[#allocation9 + $0x138] ss:$12 sps:$4 sm:$0xff]   ;;  %v9613_v12 = vld [vmem:[#allocation9 + $0x110] ss:$12 sps:$4 sm:$0xff]  }
 0x1b7   : > { %v727_v8 = vpop.f32.mrf.mxu0 }
 0x1b8   : > { %v736_v10 = vadd.f32 %v727_v8, %v667_v6  ;;  %v9608_v6 = vld [vmem:[#allocation9 + $0x124] ss:$12 sps:$4 sm:$0xff]   ;;  %v9606_v8 = vld [vmem:[#allocation9 + $0x120] ss:$12 sps:$4 sm:$0xff]  }
 0x1b9   : > { %v729_v13 = vpop.f32.mrf.mxu0 }
 0x1ba   : > { %v737_v15 = vadd.f32 %v729_v13, %v669_v9  ;;  %v752_v19 = vadd.f32 %v745_v11, %v736_v10  ;;  %v9609_v9 = vld [vmem:[#allocation9 + $0x128] ss:$12 sps:$4 sm:$0xff]   ;;  %v9612_v10 = vld [vmem:[#allocation9 + $0x10c] ss:$12 sps:$4 sm:$0xff]  }
 0x1bb   : > { %v731_v17 = vpop.f32.mrf.mxu0  ;;  %v9616_v13 = vld [vmem:[#allocation9 + $0xf4] ss:$12 sps:$4 sm:$0xff]  }
 0x1bc   : > { %v738_v20 = vadd.f32 %v731_v17, %v671_v14  ;;  %v753_v22 = vadd.f32 %v749_v16, %v737_v15  ;;  %v756_v25 = vmax.f32 %v752_v19, 0.0  ;;  %v9614_v14 = vld [vmem:[#allocation9 + $0xf0] ss:$12 sps:$4 sm:$0xff]   ;;  %v9617_v15 = vld [vmem:[#allocation9 + $0xf8] ss:$12 sps:$4 sm:$0xff]  }
 0x1bd   : > { %v733_v21 = vpop.f32.mrf.mxu0  ;;  %v9618_v17 = vld [vmem:[#allocation9 + $0xd8] ss:$12 sps:$4 sm:$0xff]  }
 0x1be   : > { %v754_v23 = vadd.f32 %v745_v11, %v738_v20  ;;  %v739_v24 = vadd.f32 %v733_v21, %v673_v18  ;;  %v757_v28 = vmax.f32 %v753_v22, 0.0  ;;  %v9610_v11 = vld [vmem:[#allocation9 + $0x108] ss:$12 sps:$4 sm:$0xff]   ;;  %v9621_v18 = vld [vmem:[#allocation9 + $0xe0] ss:$12 sps:$4 sm:$0xff]  }
 0x1bf   : > { %v9624_v19 = vld [vmem:[#allocation9 + $0xc4] ss:$12 sps:$4 sm:$0xff]   ;;  %v9622_v20 = vld [vmem:[#allocation9 + $0xc0] ss:$12 sps:$4 sm:$0xff]   ;;  %v9625_v21 = vld [vmem:[#allocation9 + $0xc8] ss:$12 sps:$4 sm:$0xff]  }
 0x1c0   : > { %v758_v26 = vmax.f32 %v754_v23, 0.0  ;;  %v755_v27 = vadd.f32 %v749_v16, %v739_v24  ;;  %v9620_v16 = vld [vmem:[#allocation9 + $0xdc] ss:$12 sps:$4 sm:$0xff]   ;;  %v9628_v22 = vld [vmem:[#allocation9 + $0x34c] ss:$12 sps:$4 sm:$0xff]  }
 0x1c1   : > { %v9626_v23 = vld [vmem:[#allocation9 + $0x348] ss:$12 sps:$4 sm:$0xff]   ;;  %v9629_v24 = vld [vmem:[#allocation9 + $0x350] ss:$12 sps:$4 sm:$0xff]  }
 0x1c2   : > { %v11415_v29 = vpack.c.bf16 %v758_v26, %v756_v25  ;;  %v759_v30 = vmax.f32 %v755_v27, 0.0  ;;  %v9632_v26 = vld [vmem:[#allocation9 + $0x334] ss:$12 sps:$4 sm:$0xff]   ;;  %v9630_v27 = vld [vmem:[#allocation9 + $0x330] ss:$12 sps:$4 sm:$0xff]  }
 0x1c4   : > { %v11417_v31 = vpack.c.bf16 %v759_v30, %v757_v28  ;;  %v878_v32 = vshll.u32 %v11415_v29, 16  ;;  %v876_v37 = vshrl.u32 %v11415_v29, 16  ;;  %v9633_v28 = vld [vmem:[#allocation9 + $0x338] ss:$12 sps:$4 sm:$0xff]   ;;  %v9636_v30 = vld [vmem:[#allocation9 + $0x31c] ss:$12 sps:$4 sm:$0xff]  }
 0x1c6   : > { %v885_v33 = vshll.u32 %v11417_v31, 16  ;;  %v880_v34 = vrot.slane %v878_v32, 1  ;;  %v883_v35 = vshrl.u32 %v11417_v31, 16  ;;  %v1572_v25 = vrot.slane %v11417_v31, 1  ;;  %v9634_v32 = vld [vmem:[#allocation9 + $0x318] ss:$12 sps:$4 sm:$0xff]  }
 0x1c8   : > { %v887_v36 = vrot.slane %v885_v33, 1  ;;  %v881_v41 = vor.u32 %v880_v34, %v876_v37  ;;  %v9640_v33 = vld [vmem:[#allocation9 + $0x304] ss:$12 sps:$4 sm:$0xff]   ;;  %v9638_v34 = vld [vmem:[#allocation9 + $0x300] ss:$12 sps:$4 sm:$0xff]  }
 0x1c9   : > { %v9642_v37 = vld [vmem:[#allocation9 + $0x2e8] ss:$12 sps:$4 sm:$0xff]  }
 0x1ca   : > { %v888_v38 = vor.u32 %v887_v36, %v883_v35  ;;  %v9641_v35 = vld [vmem:[#allocation9 + $0x308] ss:$12 sps:$4 sm:$0xff]   ;;  %v9644_v36 = vld [vmem:[#allocation9 + $0x2ec] ss:$12 sps:$4 sm:$0xff]  }
 0x1cc   : > { %8470 = vmatprep.mubr.msk.bf16.mxu1 %vm1114_vm1, %v888_v38  ;;  %8471 = vmatprep.mubr.msk.bf16.mxu0 %vm1114_vm1, %v888_v38  ;;  %v9645_v38 = vld [vmem:[#allocation9 + $0x2f0] ss:$12 sps:$4 sm:$0xff]  }
 0x1cd   : > { %1151 = vmatmul.mubr.bf16.vlgmr.msra.gmra.mxu1 %v881_v41  ;;  %1194 = vmatmul.mubr.bf16.vlgmr.msra.gmra.mxu0 %v881_v41  ;;  %v9649_v41 = vld [vmem:[#allocation9 + $0x2d8] ss:$12 sps:$4 sm:$0xff]  }
 0x1ce   : > { %1429 = vmatpush1.bf16.msra.mxu1 %v9570_v39  ;;  %1472 = vmatpush1.bf16.msra.mxu0 %v9573_v40  ;;  %v9648_v39 = vld [vmem:[#allocation9 + $0x2d4] ss:$12 sps:$4 sm:$0xff]   ;;  %v9646_v40 = vld [vmem:[#allocation9 + $0x2d0] ss:$12 sps:$4 sm:$0xff]  }
 0x1cf   : > { %8514 = vmatprep.mubr.msk.bf16.mxu1 %vm1114_vm1, %v11417_v31  ;;  %8515 = vmatprep.mubr.msk.bf16.mxu0 %vm1114_vm1, %v11417_v31  ;;  %v9637_v31 = vld [vmem:[#allocation9 + $0x320] ss:$12 sps:$4 sm:$0xff]  }
 0x1d0   : > { %1430 = vmatprep.subr.bf16.mxu1 %v9576_v42  ;;  %1473 = vmatprep.subr.bf16.mxu0 %v11069_v2  ;;  %v9652_v42 = vld [vmem:[#allocation9 + $0x2bc] ss:$12 sps:$4 sm:$0xff]  }
 0x1d2   : > { %1431 = vmatpush1.bf16.msra.mxu1 %v9574_v43  ;;  %1474 = vmatpush1.bf16.msra.mxu0 %v9577_v44  ;;  %v9650_v43 = vld [vmem:[#allocation9 + $0x2b8] ss:$12 sps:$4 sm:$0xff]   ;;  %v9653_v44 = vld [vmem:[#allocation9 + $0x2c0] ss:$12 sps:$4 sm:$0xff]  }
 0x1d3   : > { %1432 = vmatprep.subr.bf16.mxu1 %v9580_v45  ;;  %1475 = vmatprep.subr.bf16.mxu0 %v11069_v2  ;;  %v9656_v45 = vld [vmem:[#allocation9 + $0x2a4] ss:$12 sps:$4 sm:$0xff]  }
 0x1d6   : > { %1433 = vmatpush1.bf16.msra.mxu1 %v9578_v46  ;;  %1476 = vmatpush1.bf16.msra.mxu0 %v9581_v47  ;;  %v9654_v46 = vld [vmem:[#allocation9 + $0x2a0] ss:$12 sps:$4 sm:$0xff]   ;;  %v9657_v47 = vld [vmem:[#allocation9 + $0x2a8] ss:$12 sps:$4 sm:$0xff]  }
 0x1d7   : > { %1434 = vmatprep.subr.bf16.mxu1 %v9584_v48  ;;  %1477 = vmatprep.subr.bf16.mxu0 %v11069_v2  ;;  %v9660_v48 = vld [vmem:[#allocation9 + $0x3dc] ss:$12 sps:$4 sm:$0xff]  }
 0x1da   : > { %1435 = vmatpush1.bf16.msra.mxu1 %v9582_v49  ;;  %1478 = vmatpush1.bf16.msra.mxu0 %v9585_v50  ;;  %v9658_v49 = vld [vmem:[#allocation9 + $0x3d8] ss:$12 sps:$4 sm:$0xff]   ;;  %v9661_v50 = vld [vmem:[#allocation9 + $0x3e0] ss:$12 sps:$4 sm:$0xff]  }
 0x1db   : > { %1436 = vmatprep.subr.bf16.mxu1 %v9588_v51  ;;  %1479 = vmatprep.subr.bf16.mxu0 %v11069_v2  ;;  %v9664_v51 = vld [vmem:[#allocation9 + $0x3c4] ss:$12 sps:$4 sm:$0xff]  }
 0x1de   : > { %1437 = vmatpush1.bf16.msra.mxu1 %v9586_v52  ;;  %1480 = vmatpush1.bf16.msra.mxu0 %v9589_v53  ;;  %v9662_v52 = vld [vmem:[#allocation9 + $0x3c0] ss:$12 sps:$4 sm:$0xff]   ;;  %v9665_v53 = vld [vmem:[#allocation9 + $0x3c8] ss:$12 sps:$4 sm:$0xff]  }
 0x1df   : > { %1438 = vmatprep.subr.bf16.mxu1 %v9592_v54  ;;  %1481 = vmatprep.subr.bf16.mxu0 %v11069_v2  ;;  %v9668_v54 = vld [vmem:[#allocation9 + $0x3ac] ss:$12 sps:$4 sm:$0xff]  }
 0x1e2   : > { %1439 = vmatpush1.bf16.msra.mxu1 %v9590_v55  ;;  %1482 = vmatpush1.bf16.msra.mxu0 %v9593_v56  ;;  %v9666_v55 = vld [vmem:[#allocation9 + $0x3a8] ss:$12 sps:$4 sm:$0xff]   ;;  %v9669_v56 = vld [vmem:[#allocation9 + $0x3b0] ss:$12 sps:$4 sm:$0xff]  }
 0x1e3   : > { %1440 = vmatprep.subr.bf16.mxu1 %v9596_v57  ;;  %1483 = vmatprep.subr.bf16.mxu0 %v11069_v2  ;;  %v9672_v57 = vld [vmem:[#allocation9 + $0x394] ss:$12 sps:$4 sm:$0xff]  }
 0x1e6   : > { %1441 = vmatpush1.bf16.msra.mxu1 %v9594_v59  ;;  %1484 = vmatpush1.bf16.msra.mxu0 %v9597_v60  ;;  %v9670_v59 = vld [vmem:[#allocation9 + $0x390] ss:$12 sps:$4 sm:$0xff]   ;;  %v9673_v60 = vld [vmem:[#allocation9 + $0x398] ss:$12 sps:$4 sm:$0xff]  }
 0x1e7   : > { %1442 = vmatprep.subr.bf16.mxu1 %v9600_v62  ;;  %1485 = vmatprep.subr.bf16.mxu0 %v11069_v2  ;;  %v9676_v62 = vld [vmem:[#allocation9 + $0x37c] ss:$12 sps:$4 sm:$0xff]  }
 0x1ea   : > { %1443 = vmatpush1.bf16.msra.mxu1 %v9598_v63  ;;  %1486 = vmatpush1.bf16.msra.mxu0 %v9601_v0  ;;  %v9674_v63 = vld [vmem:[#allocation9 + $0x378] ss:$12 sps:$4 sm:$0xff]  }
 0x1eb   : > { %1448 = vmatprep.subr.bf16.mxu1 %v9604_v3  ;;  %1491 = vmatprep.subr.bf16.mxu0 %v11069_v2  ;;  %v8560_v0 = vld [vmem:[%s12540_s0 + $0x10] sm:$0xff]  ;;  %v8561_v3 = vld [vmem:[%s12540_s0 + $0x18] sm:$0xff] }
 0x1ee   : > { %1449 = vmatpush2.bf16.msra.mxu1 %v9602_v4  ;;  %1492 = vmatpush2.bf16.msra.mxu0 %v9605_v5  ;;  %v9677_v4 = vld [vmem:[#allocation9 + $0x380] ss:$12 sps:$4 sm:$0xff]   ;;  %v9680_v5 = vld [vmem:[#allocation9 + $0x364] ss:$12 sps:$4 sm:$0xff]  }
 0x1ef   : > { %1450 = vmatprep.subr.bf16.mxu1 %v9608_v6  ;;  %1493 = vmatprep.subr.bf16.mxu0 %v11069_v2  ;;  %v2068_v6 = vpack.c.bf16 %v8561_v3, %v8560_v0  ;;  %v9741_v0 = vld [vmem:[#allocation9 + $0x22c] ss:$12 sps:$4 sm:$0xff]   ;;  %v9739_v3 = vld [vmem:[#allocation9 + $0x228] ss:$12 sps:$4 sm:$0xff]  }
 0x1f2   : > { %1451 = vmatpush2.bf16.msra.mxu1 %v9606_v8  ;;  %1494 = vmatpush2.bf16.msra.mxu0 %v9609_v9  ;;  %v9678_v8 = vld [vmem:[#allocation9 + $0x360] ss:$12 sps:$4 sm:$0xff]   ;;  %v9681_v9 = vld [vmem:[#allocation9 + $0x368] ss:$12 sps:$4 sm:$0xff]  }
 0x1f3   : > { %1452 = vmatprep.subr.bf16.mxu1 %v9612_v10  ;;  %1495 = vmatprep.subr.bf16.mxu0 %v11069_v2  ;;  %v9684_v10 = vld [vmem:[#allocation4 + $0x14] ss:$8 sps:$4 sm:$0xff]  }
 0x1f6   : > { %1453 = vmatpush2.bf16.msra.mxu1 %v9610_v11  ;;  %1496 = vmatpush2.bf16.msra.mxu0 %v9613_v12  ;;  %v9687_v11 = vld [vmem:[#allocation4 + $0x4] ss:$8 sps:$4 sm:$0xff]   ;;  %v2076_v12 = vshll.u32 %v2068_v6, 16 }
 0x1f7   : > { %1454 = vmatprep.subr.bf16.mxu1 %v9616_v13  ;;  %1497 = vmatprep.subr.bf16.mxu0 %v11069_v2  ;;  %v9682_v13 = vld [vmem:[#allocation4 + $0x10] ss:$8 sps:$4 sm:$0xff]  }
 0x1fa   : > { %1455 = vmatpush2.bf16.msra.mxu1 %v9614_v14  ;;  %1498 = vmatpush2.bf16.msra.mxu0 %v9617_v15  ;;  %v1571_v14 = vrot.slane %v11415_v29, 1  ;;  %v9685_v15 = vld [vmem:[#allocation4] ss:$8 sps:$4 sm:$0xff]  }
 0x1fb   : > { %1456 = vmatprep.subr.bf16.mxu1 %v9620_v16  ;;  %1499 = vmatprep.subr.bf16.mxu0 %v11069_v2  ;;  %v9690_v16 = vld [vmem:[#allocation4 + $0x24] ss:$8 sps:$4 sm:$0xff]  }
 0x1fe   : > { %1457 = vmatpush2.bf16.msra.mxu1 %v9618_v17  ;;  %1500 = vmatpush2.bf16.msra.mxu0 %v9621_v18  ;;  %v2074_v17 = vshrl.u32 %v2068_v6, 16  ;;  %v2078_v18 = vrot.slane %v2076_v12, 1 }
 0x1ff   : > { %1458 = vmatprep.subr.bf16.mxu1 %v9624_v19  ;;  %1501 = vmatprep.subr.bf16.mxu0 %v11069_v2 }
 0x200   : > { %v2079_v19 = vor.u32 %v2078_v18, %v2074_v17 }
 0x202   : > { %1459 = vmatpush2.bf16.msra.mxu1 %v9622_v20  ;;  %1502 = vmatpush2.bf16.msra.mxu0 %v9625_v21  ;;  %v9688_v20 = vld [vmem:[#allocation4 + $0x20] ss:$8 sps:$4 sm:$0xff]  }
 0x203   : > { %1801 = vmatprep.subr.bf16.mxu1 %v9628_v22  ;;  %1844 = vmatprep.subr.bf16.mxu0 %v11069_v2  ;;  %v9691_v21 = vld [vmem:[#allocation9 + $0x1f8] ss:$12 sps:$4 sm:$0xff]   ;;  %v9693_v22 = vld [vmem:[#allocation9 + $0x1fc] ss:$12 sps:$4 sm:$0xff]  }
 0x205   : > { %1461 = vmatmul.mubr.bf16.vlgmr.msra.gmra.mxu1 %v11415_v29  ;;  %1504 = vmatmul.mubr.bf16.vlgmr.msra.gmra.mxu0 %v11415_v29  ;;  %v2194_v29 = vrot.slane %v2068_v6, 1 }
 0x206   : > { %1802 = vmatpush1.bf16.msra.mxu1 %v9626_v23  ;;  %8558 = vmatprep.mubr.msk.bf16.mxu1 %vm1114_vm1, %v1572_v25  ;;  %v9694_v23 = vld [vmem:[#allocation9 + $0x200] ss:$12 sps:$4 sm:$0xff]  }
 0x207   : > { %1845 = vmatpush1.bf16.msra.mxu0 %v9629_v24  ;;  %8559 = vmatprep.mubr.msk.bf16.mxu0 %vm1114_vm1, %v1572_v25  ;;  %v9697_v24 = vld [vmem:[#allocation9 + $0x1e4] ss:$12 sps:$4 sm:$0xff]   ;;  %v9698_v25 = vld [vmem:[#allocation9 + $0x1e8] ss:$12 sps:$4 sm:$0xff]  }
 0x208   : > { %1803 = vmatprep.subr.bf16.mxu1 %v9632_v26  ;;  %1846 = vmatprep.subr.bf16.mxu0 %v11069_v2  ;;  %v9695_v26 = vld [vmem:[#allocation9 + $0x1e0] ss:$12 sps:$4 sm:$0xff]  }
 0x20a   : > { %1804 = vmatpush1.bf16.msra.mxu1 %v9630_v27  ;;  %v9701_v27 = vld [vmem:[#allocation9 + $0x1cc] ss:$12 sps:$4 sm:$0xff]  }
 0x20b   : > { %1847 = vmatpush1.bf16.msra.mxu0 %v9633_v28  ;;  %1805 = vmatprep.subr.bf16.mxu1 %v9636_v30  ;;  %v9702_v28 = vld [vmem:[#allocation9 + $0x1d0] ss:$12 sps:$4 sm:$0xff]   ;;  %v9699_v30 = vld [vmem:[#allocation9 + $0x1c8] ss:$12 sps:$4 sm:$0xff]  }
 0x20c   : > { %1848 = vmatprep.subr.bf16.mxu0 %v11069_v2 }
 0x20e   : > { %1806 = vmatpush1.bf16.msra.mxu1 %v9634_v32  ;;  %v9705_v32 = vld [vmem:[#allocation9 + $0x1b4] ss:$12 sps:$4 sm:$0xff]  }
 0x20f   : > { %1849 = vmatpush1.bf16.msra.mxu0 %v9637_v31  ;;  %1807 = vmatprep.subr.bf16.mxu1 %v9640_v33  ;;  %v9706_v31 = vld [vmem:[#allocation9 + $0x1b8] ss:$12 sps:$4 sm:$0xff]   ;;  %v9703_v33 = vld [vmem:[#allocation9 + $0x1b0] ss:$12 sps:$4 sm:$0xff]  }
 0x210   : > { %1850 = vmatprep.subr.bf16.mxu0 %v11069_v2 }
 0x212   : > { %1808 = vmatpush1.bf16.msra.mxu1 %v9638_v34  ;;  %v9709_v34 = vld [vmem:[#allocation9 + $0x19c] ss:$12 sps:$4 sm:$0xff]  }
 0x213   : > { %1851 = vmatpush1.bf16.msra.mxu0 %v9641_v35  ;;  %1809 = vmatprep.subr.bf16.mxu1 %v9644_v36  ;;  %v9710_v35 = vld [vmem:[#allocation9 + $0x1a0] ss:$12 sps:$4 sm:$0xff]   ;;  %v9707_v36 = vld [vmem:[#allocation9 + $0x198] ss:$12 sps:$4 sm:$0xff]  }
 0x214   : > { %1852 = vmatprep.subr.bf16.mxu0 %v11069_v2 }
 0x216   : > { %1810 = vmatpush1.bf16.msra.mxu1 %v9642_v37  ;;  %v9713_v37 = vld [vmem:[#allocation9 + $0x184] ss:$12 sps:$4 sm:$0xff]  }
 0x217   : > { %1853 = vmatpush1.bf16.msra.mxu0 %v9645_v38  ;;  %1811 = vmatprep.subr.bf16.mxu1 %v9648_v39  ;;  %v9711_v38 = vld [vmem:[#allocation9 + $0x180] ss:$12 sps:$4 sm:$0xff]   ;;  %v9714_v39 = vld [vmem:[#allocation9 + $0x188] ss:$12 sps:$4 sm:$0xff]  }
 0x218   : > { %1854 = vmatprep.subr.bf16.mxu0 %v11069_v2 }
 0x21a   : > { %1812 = vmatpush1.bf16.msra.mxu1 %v9646_v40  ;;  %v9717_v40 = vld [vmem:[#allocation9 + $0x16c] ss:$12 sps:$4 sm:$0xff]  }
 0x21b   : > { %1855 = vmatpush1.bf16.msra.mxu0 %v9649_v41  ;;  %1813 = vmatprep.subr.bf16.mxu1 %v9652_v42  ;;  %v9715_v41 = vld [vmem:[#allocation9 + $0x168] ss:$12 sps:$4 sm:$0xff]   ;;  %v9718_v42 = vld [vmem:[#allocation9 + $0x170] ss:$12 sps:$4 sm:$0xff]  }
 0x21c   : > { %1856 = vmatprep.subr.bf16.mxu0 %v11069_v2 }
 0x21e   : > { %1814 = vmatpush1.bf16.msra.mxu1 %v9650_v43  ;;  %v9721_v43 = vld [vmem:[#allocation9 + $0x154] ss:$12 sps:$4 sm:$0xff]  }
 0x21f   : > { %1857 = vmatpush1.bf16.msra.mxu0 %v9653_v44  ;;  %1815 = vmatprep.subr.bf16.mxu1 %v9656_v45  ;;  %v9719_v44 = vld [vmem:[#allocation9 + $0x150] ss:$12 sps:$4 sm:$0xff]   ;;  %v9722_v45 = vld [vmem:[#allocation9 + $0x158] ss:$12 sps:$4 sm:$0xff]  }
 0x220   : > { %1858 = vmatprep.subr.bf16.mxu0 %v11069_v2 }
 0x222   : > { %1816 = vmatpush1.bf16.msra.mxu1 %v9654_v46  ;;  %v9725_v46 = vld [vmem:[#allocation9 + $0x28c] ss:$12 sps:$4 sm:$0xff]  }
 0x223   : > { %1859 = vmatpush1.bf16.msra.mxu0 %v9657_v47  ;;  %1821 = vmatprep.subr.bf16.mxu1 %v9660_v48  ;;  %v9723_v47 = vld [vmem:[#allocation9 + $0x288] ss:$12 sps:$4 sm:$0xff]   ;;  %v9726_v48 = vld [vmem:[#allocation9 + $0x290] ss:$12 sps:$4 sm:$0xff]  }
 0x224   : > { %1864 = vmatprep.subr.bf16.mxu0 %v11069_v2 }
 0x226   : > { %1822 = vmatpush2.bf16.msra.mxu1 %v9658_v49 }
 0x227   : > { %1865 = vmatpush2.bf16.msra.mxu0 %v9661_v50  ;;  %1823 = vmatprep.subr.bf16.mxu1 %v9664_v51  ;;  %v9729_v50 = vld [vmem:[#allocation9 + $0x274] ss:$12 sps:$4 sm:$0xff]   ;;  %v9727_v51 = vld [vmem:[#allocation9 + $0x270] ss:$12 sps:$4 sm:$0xff]  }
 0x228   : > { %1866 = vmatprep.subr.bf16.mxu0 %v11069_v2 }
 0x22a   : > { %1824 = vmatpush2.bf16.msra.mxu1 %v9662_v52  ;;  %v9730_v52 = vld [vmem:[#allocation9 + $0x278] ss:$12 sps:$4 sm:$0xff]  }
 0x22b   : > { %1867 = vmatpush2.bf16.msra.mxu0 %v9665_v53  ;;  %1825 = vmatprep.subr.bf16.mxu1 %v9668_v54 }
 0x22c   : > { %1868 = vmatprep.subr.bf16.mxu0 %v11069_v2 }
 0x22e   : > { %1826 = vmatpush2.bf16.msra.mxu1 %v9666_v55  ;;  %v9733_v55 = vld [vmem:[#allocation9 + $0x25c] ss:$12 sps:$4 sm:$0xff]  }
 0x22f   : > { %1869 = vmatpush2.bf16.msra.mxu0 %v9669_v56  ;;  %1827 = vmatprep.subr.bf16.mxu1 %v9672_v57  ;;  %v9731_v56 = vld [vmem:[#allocation9 + $0x258] ss:$12 sps:$4 sm:$0xff]   ;;  %v9734_v57 = vld [vmem:[#allocation9 + $0x260] ss:$12 sps:$4 sm:$0xff]  }
 0x230   : > { %1870 = vmatprep.subr.bf16.mxu0 %v11069_v2 }
 0x232   : > { %1828 = vmatpush2.bf16.msra.mxu1 %v9670_v59 }
 0x233   : > { %1871 = vmatpush2.bf16.msra.mxu0 %v9673_v60  ;;  %1829 = vmatprep.subr.bf16.mxu1 %v9676_v62  ;;  %v9737_v60 = vld [vmem:[#allocation9 + $0x244] ss:$12 sps:$4 sm:$0xff]   ;;  %v9735_v62 = vld [vmem:[#allocation9 + $0x240] ss:$12 sps:$4 sm:$0xff]  }
 0x234   : > { %1872 = vmatprep.subr.bf16.mxu0 %v11069_v2 }
 0x236   : > { %1830 = vmatpush2.bf16.msra.mxu1 %v9674_v63  ;;  %v9738_v63 = vld [vmem:[#allocation9 + $0x248] ss:$12 sps:$4 sm:$0xff]  }
 0x237   : > { %1873 = vmatpush2.bf16.msra.mxu0 %v9677_v4  ;;  %1831 = vmatprep.subr.bf16.mxu1 %v9680_v5  ;;  %v9742_v4 = vld [vmem:[#allocation9 + $0x230] ss:$12 sps:$4 sm:$0xff]   ;;  %v9745_v5 = vld [vmem:[#allocation9 + $0x214] ss:$12 sps:$4 sm:$0xff]  }
 0x238   : > { %1874 = vmatprep.subr.bf16.mxu0 %v11069_v2 }
 0x23a   : > { %1832 = vmatpush2.bf16.msra.mxu1 %v9678_v8  ;;  %v9746_v8 = vld [vmem:[#allocation9 + $0x218] ss:$12 sps:$4 sm:$0xff]  }
 0x23b   : > { %1875 = vmatpush2.bf16.msra.mxu0 %v9681_v9  ;;  %2107 = vmatprep.subr.bf16.mxu1 %v9684_v10  ;;  %v9749_v9 = vld [vmem:[#allocation9 + $0xac] ss:$12 sps:$4 sm:$0xff]  }
 0x23c   : > { %2162 = vmatprep.subr.bf16.mxu0 %v9687_v11 }
 0x23d   : > { %1834 = vmatmul.mubr.bf16.vlgmr.msra.gmra.mxu1 %v1571_v14 }
 0x23e   : > { %1877 = vmatmul.mubr.bf16.vlgmr.msra.gmra.mxu0 %v1571_v14  ;;  %2108 = vmatpush1.bf16.msra.mxu1 %v9682_v13 }
 0x23f   : > { %2163 = vmatpush1.bf16.msra.mxu0 %v9685_v15  ;;  %2125 = vmatprep.mubr.bf16.mxu1 %v11069_v2 }
 0x240   : > { %2180 = vmatprep.mubr.bf16.mxu0 %v11069_v2  ;;  %2222 = vmatprep.subr.bf16.mxu1 %v9690_v16 }
 0x241   : > { %2631 = vmatprep.subr.bf16.mxu0 %v9693_v22  ;;  %v11070_v22 = vmov 1966171168  }
 0x245   : > { %8564 = vmatmul.mubr.msk.bf16.vlgmr.msra.gmra.mxu1 %vm573_vm0, %v2079_v19 }
 0x246   : > { %8567 = vmatmul.mubr.msk.bf16.vlgmr.msra.gmra.mxu0 %vm573_vm0, %v2068_v6  ;;  %2223 = vmatpush1.bf16.msra.mxu1 %v9688_v20  ;;  %v9743_v6 = vld [vmem:[#allocation9 + $0x210] ss:$12 sps:$4 sm:$0xff]  }
 0x247   : > { %2240 = vmatprep.mubr.bf16.mxu1 %v11069_v2  ;;  %2674 = vmatprep.subr.bf16.mxu1 %v11069_v2 }
 0x248   : > { %2632 = vmatpush1.bf16.msra.mxu0 %v9691_v21  ;;  %v1903_v21 = vsub.s32 2, %v11405_v61 }
 0x249   : > { %2633 = vmatprep.subr.bf16.mxu0 %v9697_v24 }
 0x24c   : > { %2634 = vmatpush1.bf16.msra.mxu0 %v9695_v26 }
 0x24d   : > { %8570 = vmatmul.mubr.msk.bf16.vlgmr.msra.gmra.mxu1 %vm573_vm0, %v2194_v29  ;;  %2635 = vmatprep.subr.bf16.mxu0 %v9701_v27  ;;  %v1891_v29 = vld [vmem:[#allocation10] sm:$0x7] }
 0x24e   : > { %2675 = vmatpush1.bf16.msra.mxu1 %v9694_v23  ;;  %v1925_v23 = vunpack.c.l.s4 %v11070_v22  ;;  %v1896_v26 = vrot.slane %v1891_v29, %v11408_v1 }
 0x24f   : > { %2676 = vmatprep.subr.bf16.mxu1 %v11069_v2 }
 0x250   : > { %2636 = vmatpush1.bf16.msra.mxu0 %v9699_v30  ;;  %v1904_v30 = vrot.slane %v1891_v29, %v1903_v21 }
 0x251   : > { %2637 = vmatprep.subr.bf16.mxu0 %v9705_v32 }
 0x252   : > { %2677 = vmatpush1.bf16.msra.mxu1 %v9698_v25 }
 0x253   : > { %2678 = vmatprep.subr.bf16.mxu1 %v11069_v2 }
 0x254   : > { %2638 = vmatpush1.bf16.msra.mxu0 %v9703_v33 }
 0x255   : > { %2639 = vmatprep.subr.bf16.mxu0 %v9709_v34  ;;  %v1900_v34 = vrot.slane %v1891_v29, %v11411_v7 }
 0x256   : > { %2679 = vmatpush1.bf16.msra.mxu1 %v9702_v28 }
 0x257   : > { %2680 = vmatprep.subr.bf16.mxu1 %v11069_v2 }
 0x258   : > { %2640 = vmatpush1.bf16.msra.mxu0 %v9707_v36 }
 0x259   : > { %2641 = vmatprep.subr.bf16.mxu0 %v9713_v37 }
 0x25a   : > { %2681 = vmatpush1.bf16.msra.mxu1 %v9706_v31 }
 0x25b   : > { %2682 = vmatprep.subr.bf16.mxu1 %v11069_v2 }
 0x25c   : > { %2642 = vmatpush1.bf16.msra.mxu0 %v9711_v38 }
 0x25d   : > { %2643 = vmatprep.subr.bf16.mxu0 %v9717_v40 }
 0x25e   : > { %2683 = vmatpush1.bf16.msra.mxu1 %v9710_v35  ;;  %v1926_v35 = vunpack.c.0.s8 %v1925_v23 }
 0x25f   : > { %2684 = vmatprep.subr.bf16.mxu1 %v11069_v2 }
 0x260   : > { %2644 = vmatpush1.bf16.msra.mxu0 %v9715_v41 }
 0x261   : > { %2645 = vmatprep.subr.bf16.mxu0 %v9721_v43 }
 0x262   : > { %2685 = vmatpush1.bf16.msra.mxu1 %v9714_v39 }
 0x263   : > { %2686 = vmatprep.subr.bf16.mxu1 %v11069_v2 }
 0x264   : > { %2646 = vmatpush1.bf16.msra.mxu0 %v9719_v44 }
 0x265   : > { %2651 = vmatprep.subr.bf16.mxu0 %v9725_v46 }
 0x266   : > { %2687 = vmatpush1.bf16.msra.mxu1 %v9718_v42 }
 0x267   : > { %2688 = vmatprep.subr.bf16.mxu1 %v11069_v2 }
 0x268   : > { %2652 = vmatpush2.bf16.msra.mxu0 %v9723_v47 }
 0x269   : > { %2653 = vmatprep.subr.bf16.mxu0 %v9729_v50 }
 0x26a   : > { %2689 = vmatpush1.bf16.msra.mxu1 %v9722_v45 }
 0x26b   : > { %2694 = vmatprep.subr.bf16.mxu1 %v11069_v2 }
 0x26c   : > { %2654 = vmatpush2.bf16.msra.mxu0 %v9727_v51 }
 0x26d   : > { %2655 = vmatprep.subr.bf16.mxu0 %v9733_v55 }
 0x26e   : > { %2695 = vmatpush2.bf16.msra.mxu1 %v9726_v48 }
 0x26f   : > { %2696 = vmatprep.subr.bf16.mxu1 %v11069_v2 }
 0x270   : > { %2656 = vmatpush2.bf16.msra.mxu0 %v9731_v56 }
 0x271   : > { %2657 = vmatprep.subr.bf16.mxu0 %v9737_v60 }
 0x272   : > { %2697 = vmatpush2.bf16.msra.mxu1 %v9730_v52 }
 0x273   : > { %2698 = vmatprep.subr.bf16.mxu1 %v11069_v2 }
 0x274   : > { %2658 = vmatpush2.bf16.msra.mxu0 %v9735_v62 }
 0x275   : > { %2659 = vmatprep.subr.bf16.mxu0 %v9741_v0 }
 0x276   : > { %2699 = vmatpush2.bf16.msra.mxu1 %v9734_v57 }
 0x277   : > { %2700 = vmatprep.subr.bf16.mxu1 %v11069_v2 }
 0x278   : > { %2660 = vmatpush2.bf16.msra.mxu0 %v9739_v3 }
 0x279   : > { %2661 = vmatprep.subr.bf16.mxu0 %v9745_v5 }
 0x27a   : > { %2701 = vmatpush2.bf16.msra.mxu1 %v9738_v63 }
 0x27b   : > { %2702 = vmatprep.subr.bf16.mxu1 %v11069_v2 }
 0x27c   : > { %2662 = vmatpush2.bf16.msra.mxu0 %v9743_v6 }
 0x27d   : > { %2941 = vmatprep.subr.bf16.mxu0 %v9749_v9 }
 0x27e   : > { %2703 = vmatpush2.bf16.msra.mxu1 %v9742_v4 }
 0x27f   : > { %2704 = vmatprep.subr.bf16.mxu1 %v11069_v2 }
 0x282   : > { %2705 = vmatpush2.bf16.msra.mxu1 %v9746_v8 }
 0x283   : > { %2984 = vmatprep.subr.bf16.mxu1 %v11069_v2 }
 0x28d   : > { %v1195_v49 = vpop.f32.mrf.mxu0  ;;  %v1152_v14 = vpop.f32.mrf.mxu1 }
 0x28f   : > { %v1197_v53 = vpop.f32.mrf.mxu0  ;;  %v1154_v15 = vpop.f32.mrf.mxu1 }
 0x291   : > { %v11484_v54 = vpop.f32.mrf.mxu0  ;;  %v1156_v16 = vpop.f32.mrf.mxu1 }
 0x293   : > { %v1200_v59 = vpop.f32.mrf.mxu0  ;;  %v1158_v17 = vpop.f32.mrf.mxu1 }
 0x2c5   : > { %v1505_v10 = vpop.f32.mrf.mxu0  ;;  %v1462_v18 = vpop.f32.mrf.mxu1 }
 0x2c6   : > { %v1463_v25 = vadd.f32 %v1462_v18, %v1152_v14  ;;  %v1506_v27 = vadd.f32 %v1505_v10, %v1195_v49  ;;  %v11498_v49 = vsub.s32 %v1926_v35, %v11405_v61 }
 0x2c7   : > { %v1507_v11 = vpop.f32.mrf.mxu0  ;;  %v1464_v19 = vpop.f32.mrf.mxu1 }
 0x2c8   : > { %v1465_v32 = vadd.f32 %v1464_v19, %v1154_v15 }
 0x2c9   : > { %v1508_v12 = vpop.f32.mrf.mxu0  ;;  %v1466_v20 = vpop.f32.mrf.mxu1 }
 0x2ca   : > { %v1467_v38 = vadd.f32 %v1466_v20, %v1156_v16  ;;  %v1509_v42 = vadd.f32 %v1508_v12, %v11484_v54 }
 0x2cb   : > { %v1510_v13 = vpop.f32.mrf.mxu0  ;;  %v1468_v24 = vpop.f32.mrf.mxu1 }
 0x2cc   : > { %v1469_v45 = vadd.f32 %v1468_v24, %v1158_v17  ;;  %v2255_v13 = vld [vmem:[#allocation7] sm:$0x3] }
 0x2fd   : > { %v1835_v28 = vpop.f32.mrf.mxu1 }
 0x2fe   : > { %v1885_v31 = vadd.f32 %v1835_v28, %v1463_v25  ;;  %v1878_v33 = vpop.f32.mrf.mxu0  ;;  %v2260_v25 = vrot.slane %v2255_v13, %v11408_v1 }
 0x2ff   : > { %v1887_v36 = vadd.f32 %v1878_v33, %v1506_v27  ;;  %v1837_v37 = vpop.f32.mrf.mxu1 }
 0x300   : > { %v1908_v39 = vadd.f32 %v1896_v26, %v1885_v31  ;;  %v1886_v40 = vadd.f32 %v1837_v37, %v1465_v32  ;;  %v1880_v41 = vpop.f32.mrf.mxu0 }
 0x301   : > { %v1910_v43 = vadd.f32 %v1904_v30, %v1887_v36  ;;  %v1839_v44 = vpop.f32.mrf.mxu1 }
 0x302   : > { %v1909_v46 = vadd.f32 %v1900_v34, %v1886_v40  ;;  %v1888_v47 = vadd.f32 %v1839_v44, %v1467_v38  ;;  %v1881_v48 = vpop.f32.mrf.mxu0  ;;  %v1914_v53 = vmax.f32 %v1908_v39, 0.0 }
 0x303   : > { %v1916_v50 = vmax.f32 %v1910_v43, 0.0  ;;  %v1890_v51 = vadd.f32 %v1881_v48, %v1509_v42  ;;  %v1841_v52 = vpop.f32.mrf.mxu1 }
 0x304   : > { %v1915_v55 = vmax.f32 %v1909_v46, 0.0  ;;  %v1889_v56 = vadd.f32 %v1841_v52, %v1469_v45  ;;  %v1883_v57 = vpop.f32.mrf.mxu0  ;;  %v1911_v60 = vadd.f32 %v1896_v26, %v1888_v47  ;;  %v2264_v46 = vrot.slane %v2255_v13, %v11411_v7 }
 0x305   : > { %v1972_v59 = vcombine.high %v1916_v50, %v1916_v50  ;;  %v1913_v62 = vadd.f32 %v1904_v30, %v1890_v51  ;;  %v2127_v54 = vpop.f32.mrf.mxu1  ;;  %v1937_v5 = vrot.slane %v1916_v50, %v11498_v49 }
 0x306   : > { %v1923_v63 = vcombine.low %v1914_v53, %v1915_v55  ;;  %v1971_v0 = vcombine.high %v1914_v53, %v1915_v55  ;;  %v1912_v3 = vadd.f32 %v1900_v34, %v1889_v56  ;;  %v2182_v4 = vpop.f32.mrf.mxu0  ;;  %v1917_v14 = vmax.f32 %v1911_v60, 0.0 }
 0x307   : > { %v2129_v6 = vpop.f32.mrf.mxu1  ;;  %v1986_v8 = vrot.slane %v1972_v59, %v11498_v49  ;;  %v1919_v15 = vmax.f32 %v1913_v62, 0.0  ;;  %v2183_v31 = vadd.f32 %v2182_v4, %v2127_v54 }
 0x308   : > { %v1930_v9 = vrot.slane %v1923_v63, %v11498_v49  ;;  %v1979_v10 = vrot.slane %v1971_v0, %v11498_v49  ;;  %v1918_v11 = vmax.f32 %v1912_v3, 0.0  ;;  %v2184_v12 = vpop.f32.mrf.mxu0 }
 0x309   : > { %v2131_v16 = vpop.f32.mrf.mxu1  ;;  %v2034_v32 = vrot.slane %v1919_v15, %v11498_v49  ;;  %v2185_v33 = vadd.f32 %v2184_v12, %v2129_v6  ;;  %v9747_v15 = vld [vmem:[#allocation9 + $0xa8] ss:$12 sps:$4 sm:$0xff]  }
 0x30a   : > { %v1938_v17 = vcombine.low %v1930_v9, %v1937_v5  ;;  %v1952_v18 = vcombine.high %v1930_v9, %v1937_v5  ;;  %v1987_v19 = vcombine.low %v1979_v10, %v1986_v8  ;;  %v1998_v20 = vcombine.high %v1979_v10, %v1986_v8  ;;  %v2186_v23 = vpop.f32.mrf.mxu0 }
 0x30b   : > { %v2020_v22 = vcombine.low %v1917_v14, %v1918_v11  ;;  %v2133_v24 = vpop.f32.mrf.mxu1  ;;  %v2187_v44 = vadd.f32 %v2186_v23, %v2131_v16  ;;  %v9750_v16 = vld [vmem:[#allocation9 + $0xb0] ss:$12 sps:$4 sm:$0xff]   ;;  %v9755_v23 = vld [vmem:[#allocation9 + $0x78] ss:$12 sps:$4 sm:$0xff]  }
 0x30c   : > { %v1945_v26 = vrot.slane %v1938_v17, %v11498_v49  ;;  %v1959_v27 = vrot.slane %v1952_v18, %v11498_v49  ;;  %v1994_v28 = vrot.slane %v1987_v19, %v11498_v49  ;;  %v2005_v30 = vrot.slane %v1998_v20, %v11498_v49  ;;  %v2188_v41 = vpop.f32.mrf.mxu0  ;;  %v9753_v18 = vld [vmem:[#allocation9 + $0x94] ss:$12 sps:$4 sm:$0xff]   ;;  %v9751_v19 = vld [vmem:[#allocation9 + $0x90] ss:$12 sps:$4 sm:$0xff]   ;;  %v9754_v20 = vld [vmem:[#allocation9 + $0x98] ss:$12 sps:$4 sm:$0xff]  }
 0x30d   : > { %v2027_v58 = vrot.slane %v2020_v22, %v11498_v49  ;;  %v2242_v34 = vpop.f32.mrf.mxu1  ;;  %v2189_v51 = vadd.f32 %v2188_v41, %v2133_v24  ;;  %v9757_v22 = vld [vmem:[#allocation9 + $0x7c] ss:$12 sps:$4 sm:$0xff]   ;;  %v9758_v24 = vld [vmem:[#allocation9 + $0x80] ss:$12 sps:$4 sm:$0xff]   ;;  %v9779_v41 = vld [vmem:[#allocation9 + $0x138] ss:$12 sps:$4 sm:$0xff]  }
 0x30e   : > { %1951 = vst.msk [vmem:[#allocation2] ss:$2 sm:$0x7] %vm11505_vm2, %v1945_v26  ;;  %1962 = vst.msk [vmem:[#allocation2 + $0x6] ss:$2 sm:$0x7] %vm11505_vm2, %v1959_v27  ;;  %v1963_v35 = vcombine.high %v1945_v26, %v1945_v26  ;;  %v1967_v36 = vcombine.high %v1959_v27, %v1959_v27  ;;  %v2009_v37 = vcombine.high %v1994_v28, %v1994_v28 }
 0x30f   : > { %1997 = vst.msk [vmem:[#allocation2 + $0x18] ss:$2 sm:$0x7] %vm11505_vm2, %v1994_v28  ;;  %2008 = vst.msk [vmem:[#allocation2 + $0x1e] ss:$2 sm:$0x7] %vm11505_vm2, %v2005_v30  ;;  %v2013_v38 = vcombine.high %v2005_v30, %v2005_v30  ;;  %v2035_v39 = vcombine.low %v2027_v58, %v2034_v32  ;;  %v2046_v40 = vcombine.high %v2027_v58, %v2034_v32  ;;  %v2244_v43 = vpop.f32.mrf.mxu1 }
 0x310   : > { %v2251_v42 = vadd.f32 %v2242_v34, %v2183_v31  ;;  %1966 = vst.msk [vmem:[#allocation2 + $0xc] ss:$2 sm:$0x7] %vm11505_vm2, %v1963_v35  ;;  %1970 = vst.msk [vmem:[#allocation2 + $0x12] ss:$2 sm:$0x7] %vm11505_vm2, %v1967_v36  ;;  %v2252_v45 = vadd.f32 %v2244_v43, %v2185_v33 }
 0x311   : > { %2012 = vst.msk [vmem:[#allocation2 + $0x24] ss:$2 sm:$0x7] %vm11505_vm2, %v2009_v37  ;;  %2016 = vst.msk [vmem:[#allocation2 + $0x2a] ss:$2 sm:$0x7] %vm11505_vm2, %v2013_v38  ;;  %v2042_v47 = vrot.slane %v2035_v39, %v11498_v49  ;;  %v2053_v48 = vrot.slane %v2046_v40, %v11498_v49  ;;  %v2246_v50 = vpop.f32.mrf.mxu1 }
 0x312   : > { %v2267_v52 = vadd.f32 %v2260_v25, %v2251_v42  ;;  %v2253_v53 = vadd.f32 %v2246_v50, %v2187_v44  ;;  %v2268_v59 = vadd.f32 %v2264_v46, %v2252_v45  ;;  %v9759_v26 = vld [vmem:[#allocation9 + $0x60] ss:$12 sps:$4 sm:$0xff]   ;;  %v9762_v27 = vld [vmem:[#allocation9 + $0x68] ss:$12 sps:$4 sm:$0xff]   ;;  %v9766_v32 = vld [vmem:[#allocation9 + $0x50] ss:$12 sps:$4 sm:$0xff]  }
 0x313   : > { %2045 = vst.msk [vmem:[#allocation2 + $0x30] ss:$2 sm:$0x7] %vm11505_vm2, %v2042_v47  ;;  %2056 = vst.msk [vmem:[#allocation2 + $0x36] ss:$2 sm:$0x7] %vm11505_vm2, %v2053_v48  ;;  %v2057_v55 = vcombine.high %v2042_v47, %v2042_v47  ;;  %v2061_v56 = vcombine.high %v2053_v48, %v2053_v48  ;;  %v2248_v57 = vpop.f32.mrf.mxu1 }
 0x314   : > { %v2269_v60 = vadd.f32 %v2260_v25, %v2253_v53  ;;  %v2254_v62 = vadd.f32 %v2248_v57, %v2189_v51  ;;  %v2271_v54 = vmax.f32 %v2267_v52, 0.0  ;;  %v2272_v3 = vmax.f32 %v2268_v59, 0.0  ;;  %v9761_v25 = vld [vmem:[#allocation9 + $0x64] ss:$12 sps:$4 sm:$0xff]   ;;  %v9765_v28 = vld [vmem:[#allocation9 + $0x4c] ss:$12 sps:$4 sm:$0xff]  }
 0x315   : > { %2060 = vst.msk [vmem:[#allocation2 + $0x3c] ss:$2 sm:$0x7] %vm11505_vm2, %v2057_v55  ;;  %2064 = vst.msk [vmem:[#allocation2 + $0x42] ss:$2 sm:$0x7] %vm11505_vm2, %v2061_v56 }
 0x316   : > { %v2273_v63 = vmax.f32 %v2269_v60, 0.0  ;;  %v2270_v0 = vadd.f32 %v2264_v46, %v2254_v62  ;;  %v9763_v30 = vld [vmem:[#allocation9 + $0x48] ss:$12 sps:$4 sm:$0xff]   ;;  %v9767_v31 = vld [vmem:[#allocation9 + $0x30] ss:$12 sps:$4 sm:$0xff]  }
 0x317   : > { %v9769_v58 = vld [vmem:[#allocation9 + $0x34] ss:$12 sps:$4 sm:$0xff]   ;;  %v9770_v33 = vld [vmem:[#allocation9 + $0x38] ss:$12 sps:$4 sm:$0xff]   ;;  %v9773_v34 = vld [vmem:[#allocation9 + $0x1c] ss:$12 sps:$4 sm:$0xff]  }
 0x318   : > { %v11543_v4 = vpack.c.bf16 %v2273_v63, %v2271_v54  ;;  %v2274_v5 = vmax.f32 %v2270_v0, 0.0  ;;  %v9771_v35 = vld [vmem:[#allocation9 + $0x18] ss:$12 sps:$4 sm:$0xff]   ;;  %v9774_v36 = vld [vmem:[#allocation9 + $0x20] ss:$12 sps:$4 sm:$0xff]  }
 0x319   : > { %v9777_v37 = vld [vmem:[#allocation9 + $0x4] ss:$12 sps:$4 sm:$0xff]   ;;  %v9775_v38 = vld [vmem:[#allocation9] ss:$12 sps:$4 sm:$0xff]   ;;  %v9778_v39 = vld [vmem:[#allocation9 + $0x8] ss:$12 sps:$4 sm:$0xff]  }
 0x31a   : > { %v11545_v6 = vpack.c.bf16 %v2274_v5, %v2272_v3  ;;  %v2392_v8 = vshll.u32 %v11543_v4, 16  ;;  %v2390_v13 = vshrl.u32 %v11543_v4, 16  ;;  %v9781_v40 = vld [vmem:[#allocation9 + $0x13c] ss:$12 sps:$4 sm:$0xff]   ;;  %v9782_v42 = vld [vmem:[#allocation9 + $0x140] ss:$12 sps:$4 sm:$0xff]  }
 0x31b   : > { %v9785_v43 = vld [vmem:[#allocation9 + $0x124] ss:$12 sps:$4 sm:$0xff]   ;;  %v9783_v44 = vld [vmem:[#allocation9 + $0x120] ss:$12 sps:$4 sm:$0xff]   ;;  %v9786_v45 = vld [vmem:[#allocation9 + $0x128] ss:$12 sps:$4 sm:$0xff]  }
 0x31c   : > { %v2399_v9 = vshll.u32 %v11545_v6, 16  ;;  %v2394_v10 = vrot.slane %v2392_v8, 1  ;;  %v2397_v11 = vshrl.u32 %v11545_v6, 16  ;;  %v9789_v46 = vld [vmem:[#allocation9 + $0x10c] ss:$12 sps:$4 sm:$0xff]   ;;  %v3084_v0 = vrot.slane %v11545_v6, 1 }
 0x31d   : > { %v9787_v47 = vld [vmem:[#allocation9 + $0x108] ss:$12 sps:$4 sm:$0xff]   ;;  %v9790_v48 = vld [vmem:[#allocation9 + $0x110] ss:$12 sps:$4 sm:$0xff]   ;;  %v9794_v52 = vld [vmem:[#allocation9 + $0xf8] ss:$12 sps:$4 sm:$0xff]  }
 0x31e   : > { %v2401_v12 = vrot.slane %v2399_v9, 1  ;;  %v2395_v17 = vor.u32 %v2394_v10, %v2390_v13  ;;  %v9793_v50 = vld [vmem:[#allocation9 + $0xf4] ss:$12 sps:$4 sm:$0xff]   ;;  %v9791_v51 = vld [vmem:[#allocation9 + $0xf0] ss:$12 sps:$4 sm:$0xff]  }
 0x31f   : > { %v9797_v53 = vld [vmem:[#allocation9 + $0xdc] ss:$12 sps:$4 sm:$0xff]   ;;  %v9795_v55 = vld [vmem:[#allocation9 + $0xd8] ss:$12 sps:$4 sm:$0xff]   ;;  %v9798_v56 = vld [vmem:[#allocation9 + $0xe0] ss:$12 sps:$4 sm:$0xff]  }
 0x320   : > { %v2402_v14 = vor.u32 %v2401_v12, %v2397_v11  ;;  %v9801_v57 = vld [vmem:[#allocation9 + $0xc4] ss:$12 sps:$4 sm:$0xff]   ;;  %v9799_v59 = vld [vmem:[#allocation9 + $0xc0] ss:$12 sps:$4 sm:$0xff]   ;;  %v9802_v60 = vld [vmem:[#allocation9 + $0xc8] ss:$12 sps:$4 sm:$0xff]  }
 0x321   : > { %v9805_v62 = vld [vmem:[#allocation9 + $0x34c] ss:$12 sps:$4 sm:$0xff]   ;;  %v9803_v54 = vld [vmem:[#allocation9 + $0x348] ss:$12 sps:$4 sm:$0xff]   ;;  %v9806_v63 = vld [vmem:[#allocation9 + $0x350] ss:$12 sps:$4 sm:$0xff]  }
 0x322   : > { %8613 = vmatprep.mubr.msk.bf16.mxu0 %vm1114_vm1, %v2402_v14  ;;  %8614 = vmatprep.mubr.msk.bf16.mxu1 %vm1114_vm1, %v2402_v14  ;;  %v9809_v3 = vld [vmem:[#allocation9 + $0x334] ss:$12 sps:$4 sm:$0xff]   ;;  %v9807_v5 = vld [vmem:[#allocation9 + $0x330] ss:$12 sps:$4 sm:$0xff]   ;;  %v9810_v8 = vld [vmem:[#allocation9 + $0x338] ss:$12 sps:$4 sm:$0xff]  }
 0x323   : > { %2664 = vmatmul.mubr.bf16.vlgmr.msra.gmra.mxu0 %v2395_v17  ;;  %2707 = vmatmul.mubr.bf16.vlgmr.msra.gmra.mxu1 %v2395_v17  ;;  %v9813_v9 = vld [vmem:[#allocation9 + $0x31c] ss:$12 sps:$4 sm:$0xff]   ;;  %v9811_v10 = vld [vmem:[#allocation9 + $0x318] ss:$12 sps:$4 sm:$0xff]   ;;  %v9815_v12 = vld [vmem:[#allocation9 + $0x300] ss:$12 sps:$4 sm:$0xff]  }
 0x324   : > { %2942 = vmatpush1.bf16.msra.mxu0 %v9747_v15  ;;  %2985 = vmatpush1.bf16.msra.mxu1 %v9750_v16  ;;  %v9817_v11 = vld [vmem:[#allocation9 + $0x304] ss:$12 sps:$4 sm:$0xff]   ;;  %v9818_v13 = vld [vmem:[#allocation9 + $0x308] ss:$12 sps:$4 sm:$0xff]   ;;  %v9821_v14 = vld [vmem:[#allocation9 + $0x2ec] ss:$12 sps:$4 sm:$0xff]  }
 0x325   : > { %8657 = vmatprep.mubr.msk.bf16.mxu0 %vm1114_vm1, %v11545_v6  ;;  %8658 = vmatprep.mubr.msk.bf16.mxu1 %vm1114_vm1, %v11545_v6  ;;  %v9814_v6 = vld [vmem:[#allocation9 + $0x320] ss:$12 sps:$4 sm:$0xff]   ;;  %v9819_v15 = vld [vmem:[#allocation9 + $0x2e8] ss:$12 sps:$4 sm:$0xff]   ;;  %v9822_v16 = vld [vmem:[#allocation9 + $0x2f0] ss:$12 sps:$4 sm:$0xff]  }
 0x326   : > { %2943 = vmatprep.subr.bf16.mxu0 %v9753_v18  ;;  %2986 = vmatprep.subr.bf16.mxu1 %v11069_v2  ;;  %v9825_v17 = vld [vmem:[#allocation9 + $0x2d4] ss:$12 sps:$4 sm:$0xff]   ;;  %v9823_v18 = vld [vmem:[#allocation9 + $0x2d0] ss:$12 sps:$4 sm:$0xff]  }
 0x328   : > { %2944 = vmatpush1.bf16.msra.mxu0 %v9751_v19  ;;  %2987 = vmatpush1.bf16.msra.mxu1 %v9754_v20  ;;  %v9826_v19 = vld [vmem:[#allocation9 + $0x2d8] ss:$12 sps:$4 sm:$0xff]   ;;  %v9829_v20 = vld [vmem:[#allocation9 + $0x2bc] ss:$12 sps:$4 sm:$0xff]  }
 0x329   : > { %2945 = vmatprep.subr.bf16.mxu0 %v9757_v22  ;;  %2988 = vmatprep.subr.bf16.mxu1 %v11069_v2  ;;  %v9827_v22 = vld [vmem:[#allocation9 + $0x2b8] ss:$12 sps:$4 sm:$0xff]  }
 0x32c   : > { %2946 = vmatpush1.bf16.msra.mxu0 %v9755_v23  ;;  %2989 = vmatpush1.bf16.msra.mxu1 %v9758_v24  ;;  %v9830_v23 = vld [vmem:[#allocation9 + $0x2c0] ss:$12 sps:$4 sm:$0xff]   ;;  %v9833_v24 = vld [vmem:[#allocation9 + $0x2a4] ss:$12 sps:$4 sm:$0xff]  }
 0x32d   : > { %2947 = vmatprep.subr.bf16.mxu0 %v9761_v25  ;;  %2990 = vmatprep.subr.bf16.mxu1 %v11069_v2  ;;  %v9831_v25 = vld [vmem:[#allocation9 + $0x2a0] ss:$12 sps:$4 sm:$0xff]  }
 0x330   : > { %2948 = vmatpush1.bf16.msra.mxu0 %v9759_v26  ;;  %2991 = vmatpush1.bf16.msra.mxu1 %v9762_v27  ;;  %v9834_v26 = vld [vmem:[#allocation9 + $0x2a8] ss:$12 sps:$4 sm:$0xff]  }
 0x331   : > { %2949 = vmatprep.subr.bf16.mxu0 %v9765_v28  ;;  %2992 = vmatprep.subr.bf16.mxu1 %v11069_v2  ;;  %v9837_v27 = vld [vmem:[#allocation9 + $0x3dc] ss:$12 sps:$4 sm:$0xff]   ;;  %v9835_v28 = vld [vmem:[#allocation9 + $0x3d8] ss:$12 sps:$4 sm:$0xff]  }
 0x334   : > { %2950 = vmatpush1.bf16.msra.mxu0 %v9763_v30  ;;  %2993 = vmatpush1.bf16.msra.mxu1 %v9766_v32  ;;  %v9838_v30 = vld [vmem:[#allocation9 + $0x3e0] ss:$12 sps:$4 sm:$0xff]   ;;  %v9841_v32 = vld [vmem:[#allocation9 + $0x3c4] ss:$12 sps:$4 sm:$0xff]  }
 0x335   : > { %2951 = vmatprep.subr.bf16.mxu0 %v9769_v58  ;;  %2994 = vmatprep.subr.bf16.mxu1 %v11069_v2  ;;  %v9839_v58 = vld [vmem:[#allocation9 + $0x3c0] ss:$12 sps:$4 sm:$0xff]  }
 0x338   : > { %2952 = vmatpush1.bf16.msra.mxu0 %v9767_v31  ;;  %2995 = vmatpush1.bf16.msra.mxu1 %v9770_v33  ;;  %v9842_v31 = vld [vmem:[#allocation9 + $0x3c8] ss:$12 sps:$4 sm:$0xff]   ;;  %v9845_v33 = vld [vmem:[#allocation9 + $0x3ac] ss:$12 sps:$4 sm:$0xff]  }
 0x339   : > { %2953 = vmatprep.subr.bf16.mxu0 %v9773_v34  ;;  %2996 = vmatprep.subr.bf16.mxu1 %v11069_v2  ;;  %v9843_v34 = vld [vmem:[#allocation9 + $0x3a8] ss:$12 sps:$4 sm:$0xff]  }
 0x33c   : > { %2954 = vmatpush1.bf16.msra.mxu0 %v9771_v35  ;;  %2997 = vmatpush1.bf16.msra.mxu1 %v9774_v36  ;;  %v9846_v35 = vld [vmem:[#allocation9 + $0x3b0] ss:$12 sps:$4 sm:$0xff]   ;;  %v9849_v36 = vld [vmem:[#allocation9 + $0x394] ss:$12 sps:$4 sm:$0xff]  }
 0x33d   : > { %2955 = vmatprep.subr.bf16.mxu0 %v9777_v37  ;;  %2998 = vmatprep.subr.bf16.mxu1 %v11069_v2  ;;  %v9847_v37 = vld [vmem:[#allocation9 + $0x390] ss:$12 sps:$4 sm:$0xff]  }
 0x340   : > { %2956 = vmatpush1.bf16.msra.mxu0 %v9775_v38  ;;  %2999 = vmatpush1.bf16.msra.mxu1 %v9778_v39  ;;  %v9850_v38 = vld [vmem:[#allocation9 + $0x398] ss:$12 sps:$4 sm:$0xff]   ;;  %v9853_v39 = vld [vmem:[#allocation9 + $0x37c] ss:$12 sps:$4 sm:$0xff]  }
 0x341   : > { %2961 = vmatprep.subr.bf16.mxu0 %v9781_v40  ;;  %3004 = vmatprep.subr.bf16.mxu1 %v11069_v2  ;;  %v9851_v40 = vld [vmem:[#allocation9 + $0x378] ss:$12 sps:$4 sm:$0xff]  }
 0x344   : > { %2962 = vmatpush2.bf16.msra.mxu0 %v9779_v41  ;;  %3005 = vmatpush2.bf16.msra.mxu1 %v9782_v42  ;;  %v9854_v41 = vld [vmem:[#allocation9 + $0x380] ss:$12 sps:$4 sm:$0xff]   ;;  %v9857_v42 = vld [vmem:[#allocation9 + $0x364] ss:$12 sps:$4 sm:$0xff]  }
 0x345   : > { %2963 = vmatprep.subr.bf16.mxu0 %v9785_v43  ;;  %3006 = vmatprep.subr.bf16.mxu1 %v11069_v2  ;;  %v9855_v43 = vld [vmem:[#allocation9 + $0x360] ss:$12 sps:$4 sm:$0xff]  }
 0x348   : > { %2964 = vmatpush2.bf16.msra.mxu0 %v9783_v44  ;;  %3007 = vmatpush2.bf16.msra.mxu1 %v9786_v45  ;;  %v9858_v44 = vld [vmem:[#allocation9 + $0x368] ss:$12 sps:$4 sm:$0xff]   ;;  %v3083_v45 = vrot.slane %v11543_v4, 1 }
 0x349   : > { %2965 = vmatprep.subr.bf16.mxu0 %v9789_v46  ;;  %3008 = vmatprep.subr.bf16.mxu1 %v11069_v2 }
 0x34c   : > { %2966 = vmatpush2.bf16.msra.mxu0 %v9787_v47  ;;  %3009 = vmatpush2.bf16.msra.mxu1 %v9790_v48 }
 0x34d   : > { %2967 = vmatprep.subr.bf16.mxu0 %v9793_v50  ;;  %3010 = vmatprep.subr.bf16.mxu1 %v11069_v2 }
 0x350   : > { %2968 = vmatpush2.bf16.msra.mxu0 %v9791_v51  ;;  %3011 = vmatpush2.bf16.msra.mxu1 %v9794_v52  ;;  %v11071_v51 = vmov 0.0  }
 0x351   : > { %2969 = vmatprep.subr.bf16.mxu0 %v9797_v53  ;;  %3012 = vmatprep.subr.bf16.mxu1 %v11069_v2  ;;  %3574 = vst [vmem:[#allocation3] sm:$0x3] %v11071_v51 }
 0x354   : > { %2970 = vmatpush2.bf16.msra.mxu0 %v9795_v55  ;;  %3013 = vmatpush2.bf16.msra.mxu1 %v9798_v56 }
 0x355   : > { %2971 = vmatprep.subr.bf16.mxu0 %v9801_v57  ;;  %3014 = vmatprep.subr.bf16.mxu1 %v11069_v2 }
 0x358   : > { %2972 = vmatpush2.bf16.msra.mxu0 %v9799_v59  ;;  %3015 = vmatpush2.bf16.msra.mxu1 %v9802_v60 }
 0x359   : > { %3313 = vmatprep.subr.bf16.mxu0 %v9805_v62  ;;  %3356 = vmatprep.subr.bf16.mxu1 %v11069_v2 }
 0x35b   : > { %2974 = vmatmul.mubr.bf16.vlgmr.msra.gmra.mxu0 %v11543_v4  ;;  %3017 = vmatmul.mubr.bf16.vlgmr.msra.gmra.mxu1 %v11543_v4  ;;  %v3403_v4 = vld [vmem:[#allocation10] sm:$0x7] }
 0x35c   : > { %3314 = vmatpush1.bf16.msra.mxu0 %v9803_v54  ;;  %8701 = vmatprep.mubr.msk.bf16.mxu0 %vm1114_vm1, %v3084_v0 }
 0x35d   : > { %3357 = vmatpush1.bf16.msra.mxu1 %v9806_v63  ;;  %8702 = vmatprep.mubr.msk.bf16.mxu1 %vm1114_vm1, %v3084_v0 }
 0x35e   : > { %3315 = vmatprep.subr.bf16.mxu0 %v9809_v3  ;;  %3358 = vmatprep.subr.bf16.mxu1 %v11069_v2 }
 0x360   : > { %3316 = vmatpush1.bf16.msra.mxu0 %v9807_v5  ;;  %v3408_v5 = vrot.slane %v3403_v4, %v11408_v1 }
 0x361   : > { %3359 = vmatpush1.bf16.msra.mxu1 %v9810_v8  ;;  %3317 = vmatprep.subr.bf16.mxu0 %v9813_v9 }
 0x362   : > { %3360 = vmatprep.subr.bf16.mxu1 %v11069_v2 }
 0x364   : > { %3318 = vmatpush1.bf16.msra.mxu0 %v9811_v10  ;;  %v3416_v10 = vrot.slane %v3403_v4, %v1903_v21 }
 0x365   : > { %3361 = vmatpush1.bf16.msra.mxu1 %v9814_v6  ;;  %3319 = vmatprep.subr.bf16.mxu0 %v9817_v11 }
 0x366   : > { %3362 = vmatprep.subr.bf16.mxu1 %v11069_v2 }
 0x368   : > { %3320 = vmatpush1.bf16.msra.mxu0 %v9815_v12 }
 0x369   : > { %3363 = vmatpush1.bf16.msra.mxu1 %v9818_v13  ;;  %3321 = vmatprep.subr.bf16.mxu0 %v9821_v14  ;;  %v3412_v13 = vrot.slane %v3403_v4, %v11411_v7 }
 0x36a   : > { %3364 = vmatprep.subr.bf16.mxu1 %v11069_v2 }
 0x36c   : > { %3322 = vmatpush1.bf16.msra.mxu0 %v9819_v15 }
 0x36d   : > { %3365 = vmatpush1.bf16.msra.mxu1 %v9822_v16  ;;  %3323 = vmatprep.subr.bf16.mxu0 %v9825_v17 }
 0x36e   : > { %3366 = vmatprep.subr.bf16.mxu1 %v11069_v2 }
 0x370   : > { %3324 = vmatpush1.bf16.msra.mxu0 %v9823_v18 }
 0x371   : > { %3367 = vmatpush1.bf16.msra.mxu1 %v9826_v19  ;;  %3325 = vmatprep.subr.bf16.mxu0 %v9829_v20 }
 0x372   : > { %3368 = vmatprep.subr.bf16.mxu1 %v11069_v2 }
 0x374   : > { %3326 = vmatpush1.bf16.msra.mxu0 %v9827_v22 }
 0x375   : > { %3369 = vmatpush1.bf16.msra.mxu1 %v9830_v23  ;;  %3327 = vmatprep.subr.bf16.mxu0 %v9833_v24 }
 0x376   : > { %3370 = vmatprep.subr.bf16.mxu1 %v11069_v2 }
 0x378   : > { %3328 = vmatpush1.bf16.msra.mxu0 %v9831_v25 }
 0x379   : > { %3371 = vmatpush1.bf16.msra.mxu1 %v9834_v26  ;;  %3333 = vmatprep.subr.bf16.mxu0 %v9837_v27 }
 0x37a   : > { %3376 = vmatprep.subr.bf16.mxu1 %v11069_v2 }
 0x37c   : > { %3334 = vmatpush2.bf16.msra.mxu0 %v9835_v28 }
 0x37d   : > { %3377 = vmatpush2.bf16.msra.mxu1 %v9838_v30  ;;  %3335 = vmatprep.subr.bf16.mxu0 %v9841_v32 }
 0x37e   : > { %3378 = vmatprep.subr.bf16.mxu1 %v11069_v2 }
 0x380   : > { %3336 = vmatpush2.bf16.msra.mxu0 %v9839_v58 }
 0x381   : > { %3379 = vmatpush2.bf16.msra.mxu1 %v9842_v31  ;;  %3337 = vmatprep.subr.bf16.mxu0 %v9845_v33 }
 0x382   : > { %3380 = vmatprep.subr.bf16.mxu1 %v11069_v2 }
 0x384   : > { %3338 = vmatpush2.bf16.msra.mxu0 %v9843_v34 }
 0x385   : > { %3381 = vmatpush2.bf16.msra.mxu1 %v9846_v35  ;;  %3339 = vmatprep.subr.bf16.mxu0 %v9849_v36 }
 0x386   : > { %3382 = vmatprep.subr.bf16.mxu1 %v11069_v2 }
 0x388   : > { %3340 = vmatpush2.bf16.msra.mxu0 %v9847_v37 }
 0x389   : > { %3383 = vmatpush2.bf16.msra.mxu1 %v9850_v38  ;;  %3341 = vmatprep.subr.bf16.mxu0 %v9853_v39 }
 0x38a   : > { %3384 = vmatprep.subr.bf16.mxu1 %v11069_v2 }
 0x38c   : > { %3342 = vmatpush2.bf16.msra.mxu0 %v9851_v40 }
 0x38d   : > { %3385 = vmatpush2.bf16.msra.mxu1 %v9854_v41  ;;  %3343 = vmatprep.subr.bf16.mxu0 %v9857_v42 }
 0x38e   : > { %3386 = vmatprep.subr.bf16.mxu1 %v11069_v2 }
 0x390   : > { %3344 = vmatpush2.bf16.msra.mxu0 %v9855_v43 }
 0x391   : > { %3387 = vmatpush2.bf16.msra.mxu1 %v9858_v44 }
 0x393   : > { %3346 = vmatmul.mubr.bf16.vlgmr.msra.gmra.mxu0 %v3083_v45 }
 0x394   : > { %3389 = vmatmul.mubr.bf16.vlgmr.msra.gmra.mxu1 %v3083_v45 }
 0x3e3   : > { %v2708_v46 = vpop.f32.mrf.mxu1  ;;  %v2665_v57 = vpop.f32.mrf.mxu0 }
 0x3e5   : > { %v2710_v47 = vpop.f32.mrf.mxu1  ;;  %v2667_v59 = vpop.f32.mrf.mxu0 }
 0x3e7   : > { %v2711_v48 = vpop.f32.mrf.mxu1  ;;  %v2669_v60 = vpop.f32.mrf.mxu0 }
 0x3e9   : > { %v2713_v50 = vpop.f32.mrf.mxu1  ;;  %v2671_v2 = vpop.f32.mrf.mxu0 }
 0x41b   : > { %v3018_v52 = vpop.f32.mrf.mxu1  ;;  %v2975_v62 = vpop.f32.mrf.mxu0 }
 0x41c   : > { %v2976_v3 = vadd.f32 %v2975_v62, %v2665_v57  ;;  %v3019_v8 = vadd.f32 %v3018_v52, %v2708_v46 }
 0x41d   : > { %v3020_v53 = vpop.f32.mrf.mxu1  ;;  %v2977_v54 = vpop.f32.mrf.mxu0 }
 0x41e   : > { %v2978_v6 = vadd.f32 %v2977_v54, %v2667_v59 }
 0x41f   : > { %v3021_v55 = vpop.f32.mrf.mxu1  ;;  %v2979_v63 = vpop.f32.mrf.mxu0 }
 0x420   : > { %v2980_v16 = vadd.f32 %v2979_v63, %v2669_v60  ;;  %v3022_v20 = vadd.f32 %v3021_v55, %v2711_v48 }
 0x421   : > { %v3023_v56 = vpop.f32.mrf.mxu1  ;;  %v2981_v0 = vpop.f32.mrf.mxu0 }
 0x422   : > { %v2982_v1 = vadd.f32 %v2981_v0, %v2671_v2 }
 0x453   : > { %v3347_v9 = vpop.f32.mrf.mxu0 }
 0x454   : > { %v3397_v11 = vadd.f32 %v3347_v9, %v2976_v3  ;;  %v3390_v12 = vpop.f32.mrf.mxu1 }
 0x455   : > { %v3399_v14 = vadd.f32 %v3390_v12, %v3019_v8  ;;  %v3349_v15 = vpop.f32.mrf.mxu0 }
 0x456   : > { %v3420_v17 = vadd.f32 %v3408_v5, %v3397_v11  ;;  %v3398_v18 = vadd.f32 %v3349_v15, %v2978_v6  ;;  %v3392_v19 = vpop.f32.mrf.mxu1 }
 0x457   : > { %v3422_v22 = vadd.f32 %v3416_v10, %v3399_v14  ;;  %v3351_v23 = vpop.f32.mrf.mxu0 }
 0x458   : > { %v3421_v24 = vadd.f32 %v3412_v13, %v3398_v18  ;;  %v3400_v25 = vadd.f32 %v3351_v23, %v2980_v16  ;;  %v3393_v26 = vpop.f32.mrf.mxu1  ;;  %v3426_v28 = vmax.f32 %v3420_v17, 0.0 }
 0x459   : > { %v3428_v61 = vmax.f32 %v3422_v22, 0.0  ;;  %v3402_v21 = vadd.f32 %v3393_v26, %v3022_v20  ;;  %v3353_v27 = vpop.f32.mrf.mxu0 }
 0x45a   : > { %v3427_v30 = vmax.f32 %v3421_v24, 0.0  ;;  %v3401_v32 = vadd.f32 %v3353_v27, %v2982_v1  ;;  %v3395_v7 = vpop.f32.mrf.mxu1  ;;  %v3423_v31 = vadd.f32 %v3408_v5, %v3400_v25 }
 0x45b   : > { %v3481_v58 = vcombine.high %v3428_v61, %v3428_v61  ;;  %v3425_v33 = vadd.f32 %v3416_v10, %v3402_v21  ;;  %v3449_v37 = vrot.slane %v3428_v61, %v11498_v49 }
 0x45c   : > { %v3435_v34 = vcombine.low %v3426_v28, %v3427_v30  ;;  %v3480_v35 = vcombine.high %v3426_v28, %v3427_v30  ;;  %v3424_v36 = vadd.f32 %v3412_v13, %v3401_v32  ;;  %v3429_v42 = vmax.f32 %v3423_v31, 0.0 }
 0x45d   : > { %v3495_v38 = vrot.slane %v3481_v58, %v11498_v49  ;;  %v3431_v43 = vmax.f32 %v3425_v33, 0.0 }
 0x45e   : > { %v3442_v39 = vrot.slane %v3435_v34, %v11498_v49  ;;  %v3488_v40 = vrot.slane %v3480_v35, %v11498_v49  ;;  %v3430_v41 = vmax.f32 %v3424_v36, 0.0 }
 0x45f   : > { %v3543_v55 = vrot.slane %v3431_v43, %v11498_v49 }
 0x460   : > { %v3450_v44 = vcombine.low %v3442_v39, %v3449_v37  ;;  %v3461_v45 = vcombine.high %v3442_v39, %v3449_v37  ;;  %v3496_v46 = vcombine.low %v3488_v40, %v3495_v38  ;;  %v3507_v47 = vcombine.high %v3488_v40, %v3495_v38 }
 0x461   : > { %v3529_v48 = vcombine.low %v3429_v42, %v3430_v41 }
 0x462   : > { %v3457_v50 = vrot.slane %v3450_v44, %v11498_v49  ;;  %v3468_v51 = vrot.slane %v3461_v45, %v11498_v49  ;;  %v3503_v52 = vrot.slane %v3496_v46, %v11498_v49  ;;  %v3514_v53 = vrot.slane %v3507_v47, %v11498_v49 }
 0x463   : > { %v3536_v56 = vrot.slane %v3529_v48, %v11498_v49 }
 0x464   : > { %3460 = vst.msk [vmem:[#allocation2 + $0x1] ss:$2 sm:$0x7] %vm11505_vm2, %v3457_v50  ;;  %3471 = vst.msk [vmem:[#allocation2 + $0x7] ss:$2 sm:$0x7] %vm11505_vm2, %v3468_v51  ;;  %v3472_v57 = vcombine.high %v3457_v50, %v3457_v50  ;;  %v3476_v59 = vcombine.high %v3468_v51, %v3468_v51  ;;  %v3518_v60 = vcombine.high %v3503_v52, %v3503_v52 }
 0x465   : > { %3506 = vst.msk [vmem:[#allocation2 + $0x19] ss:$2 sm:$0x7] %vm11505_vm2, %v3503_v52  ;;  %3517 = vst.msk [vmem:[#allocation2 + $0x1f] ss:$2 sm:$0x7] %vm11505_vm2, %v3514_v53  ;;  %v3522_v2 = vcombine.high %v3514_v53, %v3514_v53  ;;  %v3544_v62 = vcombine.low %v3536_v56, %v3543_v55  ;;  %v3555_v54 = vcombine.high %v3536_v56, %v3543_v55 }
 0x466   : > { %3475 = vst.msk [vmem:[#allocation2 + $0xd] ss:$2 sm:$0x7] %vm11505_vm2, %v3472_v57  ;;  %3479 = vst.msk [vmem:[#allocation2 + $0x13] ss:$2 sm:$0x7] %vm11505_vm2, %v3476_v59 }
 0x467   : > { %3521 = vst.msk [vmem:[#allocation2 + $0x25] ss:$2 sm:$0x7] %vm11505_vm2, %v3518_v60  ;;  %3525 = vst.msk [vmem:[#allocation2 + $0x2b] ss:$2 sm:$0x7] %vm11505_vm2, %v3522_v2  ;;  %v3551_v63 = vrot.slane %v3544_v62, %v11498_v49  ;;  %v3562_v4 = vrot.slane %v3555_v54, %v11498_v49 }
 0x469   : > { %3554 = vst.msk [vmem:[#allocation2 + $0x31] ss:$2 sm:$0x7] %vm11505_vm2, %v3551_v63  ;;  %3565 = vst.msk [vmem:[#allocation2 + $0x37] ss:$2 sm:$0x7] %vm11505_vm2, %v3562_v4  ;;  %v3566_v0 = vcombine.high %v3551_v63, %v3551_v63  ;;  %v3570_v3 = vcombine.high %v3562_v4, %v3562_v4 }
 0x46b   : > { %3569 = vst.msk [vmem:[#allocation2 + $0x3d] ss:$2 sm:$0x7] %vm11505_vm2, %v3566_v0  ;;  %3573 = vst.msk [vmem:[#allocation2 + $0x43] ss:$2 sm:$0x7] %vm11505_vm2, %v3570_v3 }
 0x46c PF: > { %v9859_v49 = vld [vmem:[%s11357_s1 + $0x74] ss:$8 sps:$4 sm:$0xff]   ;;  %v9863_v8 = vld [vmem:[%s11357_s1 + $0x70] ss:$8 sps:$4 sm:$0xff]   ;;  %v9865_v29 = vld [vmem:[%s11357_s1 + $0x64] ss:$8 sps:$4 sm:$0xff]   ;;  %v3597_v39 = vlaneseq }
 0x46d   : > { %v9861_v5 = vld [vmem:[%s11357_s1 + $0x174] ss:$8 sps:$4 sm:$0xff]   ;;  %7286 = vmatprep.subr.bf16.mxu0 %v9859_v49  ;;  %v9864_v9 = vld [vmem:[%s11357_s1 + $0x170] ss:$8 sps:$4 sm:$0xff]   ;;  %v9867_v10 = vld [vmem:[%s11357_s1 + $0x164] ss:$8 sps:$4 sm:$0xff]  }
 0x46e   : > { %7327 = vmatprep.subr.bf16.mxu1 %v9861_v5  ;;  %7287 = vmatpush1.bf16.msra.mxu0 %v9863_v8  ;;  %v9869_v6 = vld [vmem:[%s11357_s1 + $0x60] ss:$8 sps:$4 sm:$0xff]   ;;  %v9871_v12 = vld [vmem:[%s11357_s1 + $0x54] ss:$8 sps:$4 sm:$0xff]   ;;  %v9875_v14 = vld [vmem:[%s11357_s1 + $0x50] ss:$8 sps:$4 sm:$0xff]  }
 0x46f   : > { %7328 = vmatpush1.bf16.msra.mxu1 %v9864_v9  ;;  %7288 = vmatprep.subr.bf16.mxu0 %v9865_v29  ;;  %v9870_v11 = vld [vmem:[%s11357_s1 + $0x160] ss:$8 sps:$4 sm:$0xff]   ;;  %v9873_v13 = vld [vmem:[%s11357_s1 + $0x154] ss:$8 sps:$4 sm:$0xff]   ;;  %v9876_v15 = vld [vmem:[%s11357_s1 + $0x150] ss:$8 sps:$4 sm:$0xff]  }
 0x470   : > { %7329 = vmatprep.subr.bf16.mxu1 %v9867_v10  ;;  %v9877_v16 = vld [vmem:[%s11357_s1 + $0x44] ss:$8 sps:$4 sm:$0xff]   ;;  %v9881_v18 = vld [vmem:[%s11357_s1 + $0x40] ss:$8 sps:$4 sm:$0xff]   ;;  %v9883_v20 = vld [vmem:[%s11357_s1 + $0x34] ss:$8 sps:$4 sm:$0xff]  }
 0x471   : > { %v9879_v17 = vld [vmem:[%s11357_s1 + $0x144] ss:$8 sps:$4 sm:$0xff]   ;;  %v9882_v19 = vld [vmem:[%s11357_s1 + $0x140] ss:$8 sps:$4 sm:$0xff]   ;;  %v9885_v22 = vld [vmem:[%s11357_s1 + $0x134] ss:$8 sps:$4 sm:$0xff]  }
 0x472   : > { %7289 = vmatpush1.bf16.msra.mxu0 %v9869_v6  ;;  %v9887_v23 = vld [vmem:[%s11357_s1 + $0x30] ss:$8 sps:$4 sm:$0xff]   ;;  %v9889_v24 = vld [vmem:[%s11357_s1 + $0x24] ss:$8 sps:$4 sm:$0xff]   ;;  %v9893_v26 = vld [vmem:[%s11357_s1 + $0x20] ss:$8 sps:$4 sm:$0xff]  }
 0x473   : > { %7330 = vmatpush1.bf16.msra.mxu1 %v9870_v11  ;;  %7290 = vmatprep.subr.bf16.mxu0 %v9871_v12  ;;  %v9888_v1 = vld [vmem:[%s11357_s1 + $0x130] ss:$8 sps:$4 sm:$0xff]   ;;  %v9891_v25 = vld [vmem:[%s11357_s1 + $0x124] ss:$8 sps:$4 sm:$0xff]   ;;  %v9894_v61 = vld [vmem:[%s11357_s1 + $0x120] ss:$8 sps:$4 sm:$0xff]  }
 0x474   : > { %7331 = vmatprep.subr.bf16.mxu1 %v9873_v13  ;;  %v9895_v21 = vld [vmem:[%s11357_s1 + $0x14] ss:$8 sps:$4 sm:$0xff]   ;;  %v9899_v28 = vld [vmem:[%s11357_s1 + $0x10] ss:$8 sps:$4 sm:$0xff]   ;;  %v9901_v32 = vld [vmem:[%s11357_s1 + $0x4] ss:$8 sps:$4 sm:$0xff]  }
 0x475   : > { %v9897_v27 = vld [vmem:[%s11357_s1 + $0x114] ss:$8 sps:$4 sm:$0xff]   ;;  %v9900_v30 = vld [vmem:[%s11357_s1 + $0x110] ss:$8 sps:$4 sm:$0xff]   ;;  %v9903_v7 = vld [vmem:[%s11357_s1 + $0x104] ss:$8 sps:$4 sm:$0xff]  }
 0x476   : > { %7291 = vmatpush1.bf16.msra.mxu0 %v9875_v14  ;;  %v9905_v58 = vld [vmem:[%s11357_s1] ss:$8 sps:$4 sm:$0xff]   ;;  %v9907_v33 = vld [vmem:[%s11357_s1 + $0xf4] ss:$8 sps:$4 sm:$0xff]   ;;  %v9911_v35 = vld [vmem:[%s11357_s1 + $0xf0] ss:$8 sps:$4 sm:$0xff]  }
 0x477   : > { %7332 = vmatpush1.bf16.msra.mxu1 %v9876_v15  ;;  %7292 = vmatprep.subr.bf16.mxu0 %v9877_v16  ;;  %v9906_v31 = vld [vmem:[%s11357_s1 + $0x100] ss:$8 sps:$4 sm:$0xff]   ;;  %v9909_v34 = vld [vmem:[%s11357_s1 + $0x1f4] ss:$8 sps:$4 sm:$0xff]   ;;  %v9912_v36 = vld [vmem:[%s11357_s1 + $0x1f0] ss:$8 sps:$4 sm:$0xff]  }
 0x478   : > { %7333 = vmatprep.subr.bf16.mxu1 %v9879_v17  ;;  %v11072_v37 = vmov 1983009808   ;;  %v9913_v40 = vld [vmem:[%s11357_s1 + $0xe4] ss:$8 sps:$4 sm:$0xff]   ;;  %v9917_v42 = vld [vmem:[%s11357_s1 + $0xe0] ss:$8 sps:$4 sm:$0xff]  }
 0x479   : > { %v3595_v38 = vunpack.c.l.s4 %v11072_v37  ;;  %v9915_v41 = vld [vmem:[%s11357_s1 + $0x1e4] ss:$8 sps:$4 sm:$0xff]   ;;  %v11669_v44 = vshrl.u32 %v3597_v39, 7  ;;  %v9918_v45 = vld [vmem:[%s11357_s1 + $0x1e0] ss:$8 sps:$4 sm:$0xff]   ;;  %v3575_v55 = vld [vmem:[#allocation2] sm:$0xff] }
 0x47a   : > { %7293 = vmatpush1.bf16.msra.mxu0 %v9881_v18  ;;  %v9919_v46 = vld [vmem:[%s11357_s1 + $0xd4] ss:$8 sps:$4 sm:$0xff]   ;;  %v9923_v48 = vld [vmem:[%s11357_s1 + $0xd0] ss:$8 sps:$4 sm:$0xff]   ;;  %v9925_v52 = vld [vmem:[%s11357_s1 + $0xc4] ss:$8 sps:$4 sm:$0xff]   ;;  %v3593_v59 = vcombine.high %v3575_v55, %v3575_v55 }
 0x47b   : > { %7334 = vmatpush1.bf16.msra.mxu1 %v9882_v19  ;;  %7294 = vmatprep.subr.bf16.mxu0 %v9883_v20  ;;  %v3596_v43 = vunpack.c.0.s8 %v3595_v38  ;;  %v9921_v47 = vld [vmem:[%s11357_s1 + $0x1d4] ss:$8 sps:$4 sm:$0xff]   ;;  %v9924_v50 = vld [vmem:[%s11357_s1 + $0x1d0] ss:$8 sps:$4 sm:$0xff]   ;;  %v9927_v53 = vld [vmem:[%s11357_s1 + $0x1c4] ss:$8 sps:$4 sm:$0xff]  }
 0x47c   : > { %7335 = vmatprep.subr.bf16.mxu1 %v9885_v22  ;;  %v9929_v56 = vld [vmem:[%s11357_s1 + $0xc0] ss:$8 sps:$4 sm:$0xff]   ;;  %v9931_v2 = vld [vmem:[%s11357_s1 + $0xb4] ss:$8 sps:$4 sm:$0xff]   ;;  %v9935_v4 = vld [vmem:[%s11357_s1 + $0xb0] ss:$8 sps:$4 sm:$0xff]  }
 0x47d   : > { %v11677_v51 = vsub.s32 %v3596_v43, %v11669_v44  ;;  %v9930_v60 = vld [vmem:[%s11357_s1 + $0x1c0] ss:$8 sps:$4 sm:$0xff]   ;;  %v9933_v62 = vld [vmem:[%s11357_s1 + $0x1b4] ss:$8 sps:$4 sm:$0xff]   ;;  %v9936_v49 = vld [vmem:[%s11357_s1 + $0x1b0] ss:$8 sps:$4 sm:$0xff]  }
 0x47e   : > { %7295 = vmatpush1.bf16.msra.mxu0 %v9887_v23  ;;  %v9937_v5 = vld [vmem:[%s11357_s1 + $0xa4] ss:$8 sps:$4 sm:$0xff]   ;;  %v9941_v29 = vld [vmem:[%s11357_s1 + $0xa0] ss:$8 sps:$4 sm:$0xff]   ;;  %v9943_v6 = vld [vmem:[%s11357_s1 + $0x94] ss:$8 sps:$4 sm:$0xff]  }
 0x47f   : > { %7336 = vmatpush1.bf16.msra.mxu1 %v9888_v1  ;;  %7296 = vmatprep.subr.bf16.mxu0 %v9889_v24  ;;  %v3600_v57 = vrot.slane %v3575_v55, %v11677_v51  ;;  %v3607_v63 = vrot.slane %v3593_v59, %v11677_v51  ;;  %v9939_v8 = vld [vmem:[%s11357_s1 + $0x1a4] ss:$8 sps:$4 sm:$0xff]   ;;  %v9942_v10 = vld [vmem:[%s11357_s1 + $0x1a0] ss:$8 sps:$4 sm:$0xff]   ;;  %v9945_v11 = vld [vmem:[%s11357_s1 + $0x194] ss:$8 sps:$4 sm:$0xff]  }
 0x480   : > { %7337 = vmatprep.subr.bf16.mxu1 %v9891_v25  ;;  %v9947_v12 = vld [vmem:[%s11357_s1 + $0x90] ss:$8 sps:$4 sm:$0xff]   ;;  %v9949_v14 = vld [vmem:[%s11357_s1 + $0x84] ss:$8 sps:$4 sm:$0xff]   ;;  %v9953_v16 = vld [vmem:[%s11357_s1 + $0x80] ss:$8 sps:$4 sm:$0xff]  }
 0x481   : > { %v3608_v54 = vcombine.high %v3600_v57, %v3600_v57  ;;  %v3609_v3 = vcombine.high %v3607_v63, %v3607_v63  ;;  %v9948_v13 = vld [vmem:[%s11357_s1 + $0x190] ss:$8 sps:$4 sm:$0xff]   ;;  %v9951_v15 = vld [vmem:[%s11357_s1 + $0x184] ss:$8 sps:$4 sm:$0xff]   ;;  %v9954_v17 = vld [vmem:[%s11357_s1 + $0x180] ss:$8 sps:$4 sm:$0xff]   ;;  %v3782_v20 = vpack.c.bf16 %v3600_v57, %v3600_v57  ;;  %v3784_v22 = vpack.c.bf16 %v3607_v63, %v3607_v63 }
 0x482   : > { %7297 = vmatpush1.bf16.msra.mxu0 %v9893_v26  ;;  %v9958_v18 = vld [vmem:[%s11357_s1 + $0x274] ss:$8 sps:$4 sm:$0xff]   ;;  %v9956_v23 = vld [vmem:[%s11357_s1 + $0x270] ss:$8 sps:$4 sm:$0xff]   ;;  %v9964_v24 = vld [vmem:[%s11357_s1 + $0x264] ss:$8 sps:$4 sm:$0xff]  }
 0x483   : > { %7338 = vmatpush1.bf16.msra.mxu1 %v9894_v61  ;;  %7298 = vmatprep.subr.bf16.mxu0 %v9895_v21  ;;  %v3783_v0 = vpack.c.bf16 %v3608_v54, %v3608_v54  ;;  %v3785_v9 = vpack.c.bf16 %v3609_v3, %v3609_v3  ;;  %v9961_v19 = vld [vmem:[%s11357_s1 + $0x374] ss:$8 sps:$4 sm:$0xff]   ;;  %v9959_v1 = vld [vmem:[%s11357_s1 + $0x370] ss:$8 sps:$4 sm:$0xff]   ;;  %v9967_v25 = vld [vmem:[%s11357_s1 + $0x364] ss:$8 sps:$4 sm:$0xff]  }
 0x484   : > { %7339 = vmatprep.subr.bf16.mxu1 %v9897_v27  ;;  %v9962_v26 = vld [vmem:[%s11357_s1 + $0x260] ss:$8 sps:$4 sm:$0xff]   ;;  %v9970_v21 = vld [vmem:[%s11357_s1 + $0x254] ss:$8 sps:$4 sm:$0xff]   ;;  %v9988_v37 = vld [vmem:[%s11357_s1 + $0x224] ss:$8 sps:$4 sm:$0xff]  }
 0x485   : > { %7318 = vmatprep.mubr.bf16.mxu0 %v3783_v0  ;;  %7359 = vmatprep.mubr.bf16.mxu1 %v3785_v9  ;;  %v9965_v61 = vld [vmem:[%s11357_s1 + $0x360] ss:$8 sps:$4 sm:$0xff]   ;;  %v9973_v27 = vld [vmem:[%s11357_s1 + $0x354] ss:$8 sps:$4 sm:$0xff]   ;;  %v9991_v38 = vld [vmem:[%s11357_s1 + $0x324] ss:$8 sps:$4 sm:$0xff]  }
 0x486   : > { %7299 = vmatpush1.bf16.msra.mxu0 %v9899_v28  ;;  %v9968_v28 = vld [vmem:[%s11357_s1 + $0x250] ss:$8 sps:$4 sm:$0xff]   ;;  %v9986_v39 = vld [vmem:[%s11357_s1 + $0x220] ss:$8 sps:$4 sm:$0xff]   ;;  %v10003_v55 = vld [vmem:[%s11357_s1 + $0x304] ss:$8 sps:$4 sm:$0xff]  }
 0x487   : > { %7340 = vmatpush1.bf16.msra.mxu1 %v9900_v30  ;;  %7300 = vmatprep.subr.bf16.mxu0 %v9901_v32  ;;  %v9971_v30 = vld [vmem:[%s11357_s1 + $0x350] ss:$8 sps:$4 sm:$0xff]   ;;  %v9976_v32 = vld [vmem:[%s11357_s1 + $0x244] ss:$8 sps:$4 sm:$0xff]   ;;  %v9998_v59 = vld [vmem:[%s11357_s1 + $0x200] ss:$8 sps:$4 sm:$0xff]  }
 0x488   : > { %7341 = vmatprep.subr.bf16.mxu1 %v9903_v7  ;;  %v9979_v7 = vld [vmem:[%s11357_s1 + $0x344] ss:$8 sps:$4 sm:$0xff]   ;;  %v3576_v43 = vld [vmem:[#allocation2 + $0x8] sm:$0xff]  ;;  %p9279_p2 = scmp.ne.s32.totalorder %s11157_s23, 1 }
 0x489   : > { %v10009_v54 = vld [vmem:[%s11357_s1 + $0x3f4] ss:$8 sps:$4 sm:$0xff]   ;;  %v10004_v63 = vld [vmem:[%s11357_s1 + $0x2f0] ss:$8 sps:$4 sm:$0xff]   ;;  %v10012_v0 = vld [vmem:[%s11357_s1 + $0x2e4] ss:$8 sps:$4 sm:$0xff]  }
 0x48a   : > { %7301 = vmatpush1.bf16.msra.mxu0 %v9905_v58  ;;  %v9974_v58 = vld [vmem:[%s11357_s1 + $0x240] ss:$8 sps:$4 sm:$0xff]   ;;  %v10015_v3 = vld [vmem:[%s11357_s1 + $0x3e4] ss:$8 sps:$4 sm:$0xff]   ;;  %v10021_v9 = vld [vmem:[%s11357_s1 + $0x3d4] ss:$8 sps:$4 sm:$0xff]  }
 0x48b   : > { %7342 = vmatpush1.bf16.msra.mxu1 %v9906_v31  ;;  %7302 = vmatprep.subr.bf16.mxu0 %v9907_v33  ;;  %v9977_v31 = vld [vmem:[%s11357_s1 + $0x340] ss:$8 sps:$4 sm:$0xff]   ;;  %v9982_v33 = vld [vmem:[%s11357_s1 + $0x234] ss:$8 sps:$4 sm:$0xff]   ;;  %s12543_s3 = sld [smem:[#allocation35_spill]] (!%p9279_p2) }
 0x48c   : > { %7343 = vmatprep.subr.bf16.mxu1 %v9909_v34  ;;  %v9985_v34 = vld [vmem:[%s11357_s1 + $0x334] ss:$8 sps:$4 sm:$0xff]  }
 0x48e   : > { %7303 = vmatpush2.bf16.msra.mxu0 %v9911_v35  ;;  %v9980_v35 = vld [vmem:[%s11357_s1 + $0x230] ss:$8 sps:$4 sm:$0xff]  }
 0x48f   : > { %7344 = vmatpush2.bf16.msra.mxu1 %v9912_v36  ;;  %7304 = vmatprep.subr.bf16.mxu0 %v9913_v40  ;;  %v9983_v36 = vld [vmem:[%s11357_s1 + $0x330] ss:$8 sps:$4 sm:$0xff]   ;;  %v9989_v40 = vld [vmem:[%s11357_s1 + $0x320] ss:$8 sps:$4 sm:$0xff]  }
 0x490   : > { %7345 = vmatprep.subr.bf16.mxu1 %v9915_v41  ;;  %v9994_v41 = vld [vmem:[%s11357_s1 + $0x214] ss:$8 sps:$4 sm:$0xff]  }
 0x492   : > { %7305 = vmatpush2.bf16.msra.mxu0 %v9917_v42  ;;  %v9997_v42 = vld [vmem:[%s11357_s1 + $0x314] ss:$8 sps:$4 sm:$0xff]  }
 0x493   : > { %7346 = vmatpush2.bf16.msra.mxu1 %v9918_v45  ;;  %7306 = vmatprep.subr.bf16.mxu0 %v9919_v46  ;;  %v11728_v45 = vrot.slane %v3576_v43, %v11677_v51  ;;  %v3610_v46 = vcombine.high %v3576_v43, %v3576_v43  ;;  %v10070_v43 = vld [vmem:[%s11357_s1 + $0x554] ss:$8 sps:$4 sm:$0xff]  }
 0x494   : > { %7347 = vmatprep.subr.bf16.mxu1 %v9921_v47  ;;  %v9992_v47 = vld [vmem:[%s11357_s1 + $0x210] ss:$8 sps:$4 sm:$0xff]  }
 0x496   : > { %7307 = vmatpush2.bf16.msra.mxu0 %v9923_v48  ;;  %v9995_v48 = vld [vmem:[%s11357_s1 + $0x310] ss:$8 sps:$4 sm:$0xff]  }
 0x497   : > { %7348 = vmatpush2.bf16.msra.mxu1 %v9924_v50  ;;  %7308 = vmatprep.subr.bf16.mxu0 %v9925_v52  ;;  %v3625_v50 = vcombine.high %v11728_v45, %v11728_v45  ;;  %v11735_v52 = vrot.slane %v3610_v46, %v11677_v51 }
 0x498   : > { %7349 = vmatprep.subr.bf16.mxu1 %v9927_v53  ;;  %v10000_v53 = vld [vmem:[%s11357_s1 + $0x204] ss:$8 sps:$4 sm:$0xff]  }
 0x499   : > { %v3626_v57 = vcombine.high %v11735_v52, %v11735_v52 }
 0x49a   : > { %7309 = vmatpush2.bf16.msra.mxu0 %v9929_v56  ;;  %v3787_v56 = vpack.c.bf16 %v3625_v50, %v3625_v50  ;;  %v10068_v50 = vld [vmem:[%s11357_s1 + $0x550] ss:$8 sps:$4 sm:$0xff]  }
 0x49b   : > { %7350 = vmatpush2.bf16.msra.mxu1 %v9930_v60  ;;  %7310 = vmatprep.subr.bf16.mxu0 %v9931_v2  ;;  %v10001_v60 = vld [vmem:[%s11357_s1 + $0x300] ss:$8 sps:$4 sm:$0xff]   ;;  %v3789_v2 = vpack.c.bf16 %v3626_v57, %v3626_v57  ;;  %v10079_v57 = vld [vmem:[%s11357_s1 + $0x434] ss:$8 sps:$4 sm:$0xff]  }
 0x49c   : > { %7351 = vmatprep.subr.bf16.mxu1 %v9933_v62  ;;  %v10006_v62 = vld [vmem:[%s11357_s1 + $0x2f4] ss:$8 sps:$4 sm:$0xff]  }
 0x49e   : > { %7311 = vmatpush2.bf16.msra.mxu0 %v9935_v4  ;;  %v10007_v4 = vld [vmem:[%s11357_s1 + $0x3f0] ss:$8 sps:$4 sm:$0xff]  }
 0x49f   : > { %7352 = vmatpush2.bf16.msra.mxu1 %v9936_v49  ;;  %7312 = vmatprep.subr.bf16.mxu0 %v9937_v5  ;;  %v10010_v49 = vld [vmem:[%s11357_s1 + $0x2e0] ss:$8 sps:$4 sm:$0xff]  }
 0x4a0   : > { %7353 = vmatprep.subr.bf16.mxu1 %v9939_v8  ;;  %v10013_v5 = vld [vmem:[%s11357_s1 + $0x3e0] ss:$8 sps:$4 sm:$0xff]   ;;  %v10018_v8 = vld [vmem:[%s11357_s1 + $0x2d4] ss:$8 sps:$4 sm:$0xff]  }
 0x4a2   : > { %7313 = vmatpush2.bf16.msra.mxu0 %v9941_v29  ;;  %v10016_v29 = vld [vmem:[%s11357_s1 + $0x2d0] ss:$8 sps:$4 sm:$0xff]  }
 0x4a3   : > { %7354 = vmatpush2.bf16.msra.mxu1 %v9942_v10  ;;  %7314 = vmatprep.subr.bf16.mxu0 %v9943_v6  ;;  %v10019_v10 = vld [vmem:[%s11357_s1 + $0x3d0] ss:$8 sps:$4 sm:$0xff]   ;;  %v10024_v6 = vld [vmem:[%s11357_s1 + $0x2c4] ss:$8 sps:$4 sm:$0xff]  }
 0x4a4   : > { %7355 = vmatprep.subr.bf16.mxu1 %v9945_v11  ;;  %v10027_v11 = vld [vmem:[%s11357_s1 + $0x3c4] ss:$8 sps:$4 sm:$0xff]  }
 0x4a6   : > { %7315 = vmatpush2.bf16.msra.mxu0 %v9947_v12  ;;  %v10022_v12 = vld [vmem:[%s11357_s1 + $0x2c0] ss:$8 sps:$4 sm:$0xff]  }
 0x4a7   : > { %7356 = vmatpush2.bf16.msra.mxu1 %v9948_v13  ;;  %7316 = vmatprep.subr.bf16.mxu0 %v9949_v14  ;;  %v10025_v13 = vld [vmem:[%s11357_s1 + $0x3c0] ss:$8 sps:$4 sm:$0xff]   ;;  %v10030_v14 = vld [vmem:[%s11357_s1 + $0x2b4] ss:$8 sps:$4 sm:$0xff]  }
 0x4a8   : > { %7357 = vmatprep.subr.bf16.mxu1 %v9951_v15  ;;  %v10033_v15 = vld [vmem:[%s11357_s1 + $0x3b4] ss:$8 sps:$4 sm:$0xff]  }
 0x4aa   : > { %7317 = vmatpush2.bf16.msra.mxu0 %v9953_v16  ;;  %v10028_v16 = vld [vmem:[%s11357_s1 + $0x2b0] ss:$8 sps:$4 sm:$0xff]  }
 0x4ab   : > { %7358 = vmatpush2.bf16.msra.mxu1 %v9954_v17  ;;  %7368 = vmatprep.subr.bf16.mxu0 %v9958_v18  ;;  %v10031_v17 = vld [vmem:[%s11357_s1 + $0x3b0] ss:$8 sps:$4 sm:$0xff]   ;;  %v10036_v18 = vld [vmem:[%s11357_s1 + $0x2a4] ss:$8 sps:$4 sm:$0xff]  }
 0x4ac   : > { %7409 = vmatprep.subr.bf16.mxu1 %v9961_v19  ;;  %v10039_v19 = vld [vmem:[%s11357_s1 + $0x3a4] ss:$8 sps:$4 sm:$0xff]  }
 0x4ad   : > { %7319 = vmatmul.mubr.bf16.vlgmr.msra.gmra.mxu0 %v3782_v20  ;;  %v10034_v20 = vld [vmem:[%s11357_s1 + $0x2a0] ss:$8 sps:$4 sm:$0xff]  }
 0x4ae   : > { %7360 = vmatmul.mubr.bf16.vlgmr.msra.gmra.mxu1 %v3784_v22  ;;  %7369 = vmatpush1.bf16.msra.mxu0 %v9956_v23  ;;  %v10037_v22 = vld [vmem:[%s11357_s1 + $0x3a0] ss:$8 sps:$4 sm:$0xff]   ;;  %v10042_v23 = vld [vmem:[%s11357_s1 + $0x294] ss:$8 sps:$4 sm:$0xff]  }
 0x4af   : > { %7410 = vmatpush1.bf16.msra.mxu1 %v9959_v1  ;;  %7370 = vmatprep.subr.bf16.mxu0 %v9964_v24  ;;  %v10045_v1 = vld [vmem:[%s11357_s1 + $0x394] ss:$8 sps:$4 sm:$0xff]   ;;  %v10040_v24 = vld [vmem:[%s11357_s1 + $0x290] ss:$8 sps:$4 sm:$0xff]  }
 0x4b0   : > { %7411 = vmatprep.subr.bf16.mxu1 %v9967_v25  ;;  %7400 = vmatprep.mubr.bf16.mxu0 %v3787_v56  ;;  %v10043_v25 = vld [vmem:[%s11357_s1 + $0x390] ss:$8 sps:$4 sm:$0xff]   ;;  %v10074_v56 = vld [vmem:[%s11357_s1 + $0x540] ss:$8 sps:$4 sm:$0xff]  }
 0x4b1   : > { %7441 = vmatprep.mubr.bf16.mxu1 %v3789_v2  ;;  %v10080_v2 = vld [vmem:[%s11357_s1 + $0x530] ss:$8 sps:$4 sm:$0xff]  }
 0x4b2   : > { %7371 = vmatpush1.bf16.msra.mxu0 %v9962_v26  ;;  %v10048_v26 = vld [vmem:[%s11357_s1 + $0x284] ss:$8 sps:$4 sm:$0xff]  }
 0x4b3   : > { %7412 = vmatpush1.bf16.msra.mxu1 %v9965_v61  ;;  %7372 = vmatprep.subr.bf16.mxu0 %v9970_v21  ;;  %v10051_v61 = vld [vmem:[%s11357_s1 + $0x384] ss:$8 sps:$4 sm:$0xff]   ;;  %v10046_v21 = vld [vmem:[%s11357_s1 + $0x280] ss:$8 sps:$4 sm:$0xff]  }
 0x4b4   : > { %7413 = vmatprep.subr.bf16.mxu1 %v9973_v27  ;;  %v10049_v27 = vld [vmem:[%s11357_s1 + $0x380] ss:$8 sps:$4 sm:$0xff]  }
 0x4b6   : > { %7373 = vmatpush1.bf16.msra.mxu0 %v9968_v28  ;;  %v10055_v28 = vld [vmem:[%s11357_s1 + $0x474] ss:$8 sps:$4 sm:$0xff]  }
 0x4b7   : > { %7414 = vmatpush1.bf16.msra.mxu1 %v9971_v30  ;;  %7374 = vmatprep.subr.bf16.mxu0 %v9976_v32  ;;  %v10058_v30 = vld [vmem:[%s11357_s1 + $0x574] ss:$8 sps:$4 sm:$0xff]   ;;  %v3786_v32 = vpack.c.bf16 %v11728_v45, %v11728_v45 }
 0x4b8   : > { %7415 = vmatprep.subr.bf16.mxu1 %v9979_v7  ;;  %v3788_v7 = vpack.c.bf16 %v11735_v52, %v11735_v52  ;;  %v10073_v52 = vld [vmem:[%s11357_s1 + $0x444] ss:$8 sps:$4 sm:$0xff]  }
 0x4ba   : > { %7375 = vmatpush1.bf16.msra.mxu0 %v9974_v58  ;;  %v10053_v58 = vld [vmem:[%s11357_s1 + $0x470] ss:$8 sps:$4 sm:$0xff]  }
 0x4bb   : > { %7416 = vmatpush1.bf16.msra.mxu1 %v9977_v31  ;;  %7376 = vmatprep.subr.bf16.mxu0 %v9982_v33  ;;  %v10056_v31 = vld [vmem:[%s11357_s1 + $0x570] ss:$8 sps:$4 sm:$0xff]   ;;  %v10061_v33 = vld [vmem:[%s11357_s1 + $0x464] ss:$8 sps:$4 sm:$0xff]  }
 0x4bc   : > { %7417 = vmatprep.subr.bf16.mxu1 %v9985_v34  ;;  %v3577_v34 = vld [vmem:[#allocation2 + $0x10] sm:$0xff] }
 0x4be   : > { %7377 = vmatpush1.bf16.msra.mxu0 %v9980_v35  ;;  %v10064_v35 = vld [vmem:[%s11357_s1 + $0x564] ss:$8 sps:$4 sm:$0xff]  }
 0x4bf   : > { %7418 = vmatpush1.bf16.msra.mxu1 %v9983_v36  ;;  %7378 = vmatprep.subr.bf16.mxu0 %v9988_v37  ;;  %v11786_v36 = vrot.slane %v3577_v34, %v11677_v51  ;;  %v3627_v37 = vcombine.high %v3577_v34, %v3577_v34 }
 0x4c0   : > { %7419 = vmatprep.subr.bf16.mxu1 %v9991_v38  ;;  %v10059_v38 = vld [vmem:[%s11357_s1 + $0x460] ss:$8 sps:$4 sm:$0xff]  }
 0x4c2   : > { %7379 = vmatpush1.bf16.msra.mxu0 %v9986_v39  ;;  %v3642_v39 = vcombine.high %v11786_v36, %v11786_v36 }
 0x4c3   : > { %7420 = vmatpush1.bf16.msra.mxu1 %v9989_v40  ;;  %7380 = vmatprep.subr.bf16.mxu0 %v9994_v41  ;;  %v11792_v40 = vrot.slane %v3627_v37, %v11677_v51  ;;  %v10062_v41 = vld [vmem:[%s11357_s1 + $0x560] ss:$8 sps:$4 sm:$0xff]   ;;  %v10140_v37 = vld [vmem:[%s11357_s1 + $0x590] ss:$8 sps:$4 sm:$0xff]  }
 0x4c4   : > { %7421 = vmatprep.subr.bf16.mxu1 %v9997_v42  ;;  %v10067_v42 = vld [vmem:[%s11357_s1 + $0x454] ss:$8 sps:$4 sm:$0xff]   ;;  %v3791_v45 = vpack.c.bf16 %v3642_v39, %v3642_v39  ;;  %v10148_v39 = vld [vmem:[%s11357_s1 + $0x584] ss:$8 sps:$4 sm:$0xff]  }
 0x4c5   : > { %v3643_v46 = vcombine.high %v11792_v40, %v11792_v40 }
 0x4c6   : > { %7381 = vmatpush1.bf16.msra.mxu0 %v9992_v47  ;;  %v10065_v47 = vld [vmem:[%s11357_s1 + $0x450] ss:$8 sps:$4 sm:$0xff]  }
 0x4c7   : > { %7422 = vmatpush1.bf16.msra.mxu1 %v9995_v48  ;;  %7382 = vmatprep.subr.bf16.mxu0 %v10000_v53  ;;  %v3793_v48 = vpack.c.bf16 %v3643_v46, %v3643_v46  ;;  %v10076_v53 = vld [vmem:[%s11357_s1 + $0x544] ss:$8 sps:$4 sm:$0xff]   ;;  %v10152_v46 = vld [vmem:[%s11357_s1 + $0x674] ss:$8 sps:$4 sm:$0xff]  }
 0x4c8   : > { %7423 = vmatprep.subr.bf16.mxu1 %v10003_v55  ;;  %v10071_v55 = vld [vmem:[%s11357_s1 + $0x440] ss:$8 sps:$4 sm:$0xff]  }
 0x4ca   : > { %7383 = vmatpush1.bf16.msra.mxu0 %v9998_v59  ;;  %v10082_v59 = vld [vmem:[%s11357_s1 + $0x534] ss:$8 sps:$4 sm:$0xff]  }
 0x4cb   : > { %7424 = vmatpush1.bf16.msra.mxu1 %v10001_v60  ;;  %7384 = vmatprep.subr.bf16.mxu0 %v10006_v62  ;;  %v10077_v60 = vld [vmem:[%s11357_s1 + $0x430] ss:$8 sps:$4 sm:$0xff]   ;;  %v10085_v62 = vld [vmem:[%s11357_s1 + $0x424] ss:$8 sps:$4 sm:$0xff]  }
 0x4cc   : > { %7425 = vmatprep.subr.bf16.mxu1 %v10009_v54  ;;  %v10088_v54 = vld [vmem:[%s11357_s1 + $0x524] ss:$8 sps:$4 sm:$0xff]  }
 0x4ce   : > { %7385 = vmatpush2.bf16.msra.mxu0 %v10004_v63  ;;  %v10083_v63 = vld [vmem:[%s11357_s1 + $0x420] ss:$8 sps:$4 sm:$0xff]  }
 0x4cf   : > { %7426 = vmatpush2.bf16.msra.mxu1 %v10007_v4  ;;  %7386 = vmatprep.subr.bf16.mxu0 %v10012_v0  ;;  %v10086_v4 = vld [vmem:[%s11357_s1 + $0x520] ss:$8 sps:$4 sm:$0xff]   ;;  %v10091_v0 = vld [vmem:[%s11357_s1 + $0x414] ss:$8 sps:$4 sm:$0xff]  }
 0x4d0   : > { %7427 = vmatprep.subr.bf16.mxu1 %v10015_v3  ;;  %v10094_v3 = vld [vmem:[%s11357_s1 + $0x514] ss:$8 sps:$4 sm:$0xff]  }
 0x4d2   : > { %7387 = vmatpush2.bf16.msra.mxu0 %v10010_v49  ;;  %v10089_v49 = vld [vmem:[%s11357_s1 + $0x410] ss:$8 sps:$4 sm:$0xff]  }
 0x4d3   : > { %7428 = vmatpush2.bf16.msra.mxu1 %v10013_v5  ;;  %7388 = vmatprep.subr.bf16.mxu0 %v10018_v8  ;;  %v10092_v5 = vld [vmem:[%s11357_s1 + $0x510] ss:$8 sps:$4 sm:$0xff]   ;;  %v10097_v8 = vld [vmem:[%s11357_s1 + $0x404] ss:$8 sps:$4 sm:$0xff]  }
 0x4d4   : > { %7429 = vmatprep.subr.bf16.mxu1 %v10021_v9  ;;  %v10100_v9 = vld [vmem:[%s11357_s1 + $0x504] ss:$8 sps:$4 sm:$0xff]  }
 0x4d6   : > { %7389 = vmatpush2.bf16.msra.mxu0 %v10016_v29  ;;  %v10095_v29 = vld [vmem:[%s11357_s1 + $0x400] ss:$8 sps:$4 sm:$0xff]  }
 0x4d7   : > { %7430 = vmatpush2.bf16.msra.mxu1 %v10019_v10  ;;  %7390 = vmatprep.subr.bf16.mxu0 %v10024_v6  ;;  %v10098_v10 = vld [vmem:[%s11357_s1 + $0x500] ss:$8 sps:$4 sm:$0xff]   ;;  %v10103_v6 = vld [vmem:[%s11357_s1 + $0x4f4] ss:$8 sps:$4 sm:$0xff]  }
 0x4d8   : > { %7431 = vmatprep.subr.bf16.mxu1 %v10027_v11  ;;  %v10106_v11 = vld [vmem:[%s11357_s1 + $0x5f4] ss:$8 sps:$4 sm:$0xff]  }
 0x4da   : > { %7391 = vmatpush2.bf16.msra.mxu0 %v10022_v12  ;;  %v10101_v12 = vld [vmem:[%s11357_s1 + $0x4f0] ss:$8 sps:$4 sm:$0xff]  }
 0x4db   : > { %7432 = vmatpush2.bf16.msra.mxu1 %v10025_v13  ;;  %7392 = vmatprep.subr.bf16.mxu0 %v10030_v14  ;;  %v10104_v13 = vld [vmem:[%s11357_s1 + $0x5f0] ss:$8 sps:$4 sm:$0xff]   ;;  %v10109_v14 = vld [vmem:[%s11357_s1 + $0x4e4] ss:$8 sps:$4 sm:$0xff]  }
 0x4dc   : > { %7433 = vmatprep.subr.bf16.mxu1 %v10033_v15  ;;  %v10112_v15 = vld [vmem:[%s11357_s1 + $0x5e4] ss:$8 sps:$4 sm:$0xff]  }
 0x4de   : > { %7393 = vmatpush2.bf16.msra.mxu0 %v10028_v16  ;;  %v10107_v16 = vld [vmem:[%s11357_s1 + $0x4e0] ss:$8 sps:$4 sm:$0xff]  }
 0x4df   : > { %7434 = vmatpush2.bf16.msra.mxu1 %v10031_v17  ;;  %7394 = vmatprep.subr.bf16.mxu0 %v10036_v18  ;;  %v10110_v17 = vld [vmem:[%s11357_s1 + $0x5e0] ss:$8 sps:$4 sm:$0xff]   ;;  %v10115_v18 = vld [vmem:[%s11357_s1 + $0x4d4] ss:$8 sps:$4 sm:$0xff]  }
 0x4e0   : > { %7435 = vmatprep.subr.bf16.mxu1 %v10039_v19  ;;  %v10118_v19 = vld [vmem:[%s11357_s1 + $0x5d4] ss:$8 sps:$4 sm:$0xff]  }
 0x4e2   : > { %7395 = vmatpush2.bf16.msra.mxu0 %v10034_v20  ;;  %v10113_v20 = vld [vmem:[%s11357_s1 + $0x4d0] ss:$8 sps:$4 sm:$0xff]  }
 0x4e3   : > { %7436 = vmatpush2.bf16.msra.mxu1 %v10037_v22  ;;  %7396 = vmatprep.subr.bf16.mxu0 %v10042_v23  ;;  %v10116_v22 = vld [vmem:[%s11357_s1 + $0x5d0] ss:$8 sps:$4 sm:$0xff]   ;;  %v10121_v23 = vld [vmem:[%s11357_s1 + $0x4c4] ss:$8 sps:$4 sm:$0xff]  }
 0x4e4   : > { %7437 = vmatprep.subr.bf16.mxu1 %v10045_v1  ;;  %v10124_v1 = vld [vmem:[%s11357_s1 + $0x5c4] ss:$8 sps:$4 sm:$0xff]  }
 0x4e6   : > { %7397 = vmatpush2.bf16.msra.mxu0 %v10040_v24  ;;  %v10119_v24 = vld [vmem:[%s11357_s1 + $0x4c0] ss:$8 sps:$4 sm:$0xff]  }
 0x4e7   : > { %7438 = vmatpush2.bf16.msra.mxu1 %v10043_v25  ;;  %7398 = vmatprep.subr.bf16.mxu0 %v10048_v26  ;;  %v10122_v25 = vld [vmem:[%s11357_s1 + $0x5c0] ss:$8 sps:$4 sm:$0xff]   ;;  %v10127_v26 = vld [vmem:[%s11357_s1 + $0x4b4] ss:$8 sps:$4 sm:$0xff]  }
 0x4e8   : > { %7439 = vmatprep.subr.bf16.mxu1 %v10051_v61  ;;  %v10130_v61 = vld [vmem:[%s11357_s1 + $0x5b4] ss:$8 sps:$4 sm:$0xff]  }
 0x4ea   : > { %7399 = vmatpush2.bf16.msra.mxu0 %v10046_v21  ;;  %v10125_v21 = vld [vmem:[%s11357_s1 + $0x4b0] ss:$8 sps:$4 sm:$0xff]  }
 0x4eb   : > { %7440 = vmatpush2.bf16.msra.mxu1 %v10049_v27  ;;  %7450 = vmatprep.subr.bf16.mxu0 %v10055_v28  ;;  %v10128_v27 = vld [vmem:[%s11357_s1 + $0x5b0] ss:$8 sps:$4 sm:$0xff]   ;;  %v10133_v28 = vld [vmem:[%s11357_s1 + $0x4a4] ss:$8 sps:$4 sm:$0xff]  }
 0x4ec   : > { %7491 = vmatprep.subr.bf16.mxu1 %v10058_v30  ;;  %v10136_v30 = vld [vmem:[%s11357_s1 + $0x5a4] ss:$8 sps:$4 sm:$0xff]  }
 0x4ed   : > { %7401 = vmatmul.mubr.bf16.vlgmr.msra.gmra.mxu0 %v3786_v32  ;;  %v10131_v32 = vld [vmem:[%s11357_s1 + $0x4a0] ss:$8 sps:$4 sm:$0xff]  }
 0x4ee   : > { %7442 = vmatmul.mubr.bf16.vlgmr.msra.gmra.mxu1 %v3788_v7  ;;  %7451 = vmatpush1.bf16.msra.mxu0 %v10053_v58  ;;  %v3578_v7 = vld [vmem:[#allocation2 + $0x18] sm:$0xff] }
 0x4ef   : > { %7492 = vmatpush1.bf16.msra.mxu1 %v10056_v31  ;;  %7452 = vmatprep.subr.bf16.mxu0 %v10061_v33  ;;  %v10134_v58 = vld [vmem:[%s11357_s1 + $0x5a0] ss:$8 sps:$4 sm:$0xff]   ;;  %v10139_v31 = vld [vmem:[%s11357_s1 + $0x494] ss:$8 sps:$4 sm:$0xff]   ;;  %v3644_v34 = vcombine.high %v3578_v7, %v3578_v7 }
 0x4f0   : > { %7493 = vmatprep.subr.bf16.mxu1 %v10064_v35  ;;  %7482 = vmatprep.mubr.bf16.mxu0 %v3791_v45  ;;  %v10142_v33 = vld [vmem:[%s11357_s1 + $0x594] ss:$8 sps:$4 sm:$0xff]   ;;  %v10137_v35 = vld [vmem:[%s11357_s1 + $0x490] ss:$8 sps:$4 sm:$0xff]   ;;  %v10146_v45 = vld [vmem:[%s11357_s1 + $0x580] ss:$8 sps:$4 sm:$0xff]  }
 0x4f1   : > { %7523 = vmatprep.mubr.bf16.mxu1 %v3793_v48 }
 0x4f2   : > { %7453 = vmatpush1.bf16.msra.mxu0 %v10059_v38  ;;  %v10145_v38 = vld [vmem:[%s11357_s1 + $0x484] ss:$8 sps:$4 sm:$0xff]  }
 0x4f3   : > { %7494 = vmatpush1.bf16.msra.mxu1 %v10062_v41  ;;  %7454 = vmatprep.subr.bf16.mxu0 %v10067_v42  ;;  %v11852_v41 = vrot.slane %v3578_v7, %v11677_v51  ;;  %v11855_v42 = vrot.slane %v3644_v34, %v11677_v51  ;;  %v10213_v7 = vld [vmem:[%s11357_s1 + $0x7d0] ss:$8 sps:$4 sm:$0xff]   ;;  %v10219_v34 = vld [vmem:[%s11357_s1 + $0x7c0] ss:$8 sps:$4 sm:$0xff]  }
 0x4f4   : > { %7495 = vmatprep.subr.bf16.mxu1 %v10070_v43  ;;  %v10143_v43 = vld [vmem:[%s11357_s1 + $0x480] ss:$8 sps:$4 sm:$0xff]  }
 0x4f5   : > { %v3659_v48 = vcombine.high %v11852_v41, %v11852_v41 }
 0x4f6   : > { %7455 = vmatpush1.bf16.msra.mxu0 %v10065_v47  ;;  %v10155_v47 = vld [vmem:[%s11357_s1 + $0x774] ss:$8 sps:$4 sm:$0xff]  }
 0x4f7   : > { %7496 = vmatpush1.bf16.msra.mxu1 %v10068_v50  ;;  %7456 = vmatprep.subr.bf16.mxu0 %v10073_v52  ;;  %v3660_v50 = vcombine.high %v11855_v42, %v11855_v42  ;;  %v3790_v52 = vpack.c.bf16 %v11786_v36, %v11786_v36  ;;  %v10156_v36 = vld [vmem:[%s11357_s1 + $0x660] ss:$8 sps:$4 sm:$0xff]  }
 0x4f8   : > { %7497 = vmatprep.subr.bf16.mxu1 %v10076_v53  ;;  %v3792_v53 = vpack.c.bf16 %v11792_v40, %v11792_v40  ;;  %v10159_v40 = vld [vmem:[%s11357_s1 + $0x760] ss:$8 sps:$4 sm:$0xff]  }
 0x4fa   : > { %7457 = vmatpush1.bf16.msra.mxu0 %v10071_v55  ;;  %v10150_v55 = vld [vmem:[%s11357_s1 + $0x670] ss:$8 sps:$4 sm:$0xff]  }
 0x4fb   : > { %7498 = vmatpush1.bf16.msra.mxu1 %v10074_v56  ;;  %7458 = vmatprep.subr.bf16.mxu0 %v10079_v57  ;;  %v10153_v56 = vld [vmem:[%s11357_s1 + $0x770] ss:$8 sps:$4 sm:$0xff]   ;;  %v10158_v57 = vld [vmem:[%s11357_s1 + $0x664] ss:$8 sps:$4 sm:$0xff]  }
 0x4fc   : > { %7499 = vmatprep.subr.bf16.mxu1 %v10082_v59  ;;  %v10161_v59 = vld [vmem:[%s11357_s1 + $0x764] ss:$8 sps:$4 sm:$0xff]  }
 0x4fe   : > { %7459 = vmatpush1.bf16.msra.mxu0 %v10077_v60  ;;  %v3795_v60 = vpack.c.bf16 %v3659_v48, %v3659_v48  ;;  %v10231_v48 = vld [vmem:[%s11357_s1 + $0x7a0] ss:$8 sps:$4 sm:$0xff]  }
 0x4ff   : > { %7500 = vmatpush1.bf16.msra.mxu1 %v10080_v2  ;;  %7460 = vmatprep.subr.bf16.mxu0 %v10085_v62  ;;  %v3797_v2 = vpack.c.bf16 %v3660_v50, %v3660_v50  ;;  %v10164_v62 = vld [vmem:[%s11357_s1 + $0x654] ss:$8 sps:$4 sm:$0xff]  }
 0x500   : > { %7501 = vmatprep.subr.bf16.mxu1 %v10088_v54  ;;  %v10167_v54 = vld [vmem:[%s11357_s1 + $0x754] ss:$8 sps:$4 sm:$0xff]  }
 0x501   : > { %v10236_v50 = vld [vmem:[%s11357_s1 + $0x694] ss:$8 sps:$4 sm:$0xff]  }
 0x502   : > { %7461 = vmatpush1.bf16.msra.mxu0 %v10083_v63  ;;  %v10162_v63 = vld [vmem:[%s11357_s1 + $0x650] ss:$8 sps:$4 sm:$0xff]  }
 0x503   : > { %7502 = vmatpush1.bf16.msra.mxu1 %v10086_v4  ;;  %7462 = vmatprep.subr.bf16.mxu0 %v10091_v0  ;;  %v10165_v4 = vld [vmem:[%s11357_s1 + $0x750] ss:$8 sps:$4 sm:$0xff]   ;;  %v10170_v0 = vld [vmem:[%s11357_s1 + $0x644] ss:$8 sps:$4 sm:$0xff]  }
 0x504   : > { %7503 = vmatprep.subr.bf16.mxu1 %v10094_v3  ;;  %v10173_v3 = vld [vmem:[%s11357_s1 + $0x744] ss:$8 sps:$4 sm:$0xff]  }
 0x506   : > { %7463 = vmatpush1.bf16.msra.mxu0 %v10089_v49  ;;  %v10168_v49 = vld [vmem:[%s11357_s1 + $0x640] ss:$8 sps:$4 sm:$0xff]  }
 0x507   : > { %7504 = vmatpush1.bf16.msra.mxu1 %v10092_v5  ;;  %7464 = vmatprep.subr.bf16.mxu0 %v10097_v8  ;;  %v10171_v5 = vld [vmem:[%s11357_s1 + $0x740] ss:$8 sps:$4 sm:$0xff]   ;;  %v10176_v8 = vld [vmem:[%s11357_s1 + $0x634] ss:$8 sps:$4 sm:$0xff]  }
 0x508   : > { %7505 = vmatprep.subr.bf16.mxu1 %v10100_v9  ;;  %v10179_v9 = vld [vmem:[%s11357_s1 + $0x734] ss:$8 sps:$4 sm:$0xff]  }
 0x50a   : > { %7465 = vmatpush1.bf16.msra.mxu0 %v10095_v29  ;;  %v10174_v29 = vld [vmem:[%s11357_s1 + $0x630] ss:$8 sps:$4 sm:$0xff]  }
 0x50b   : > { %7506 = vmatpush1.bf16.msra.mxu1 %v10098_v10  ;;  %7466 = vmatprep.subr.bf16.mxu0 %v10103_v6  ;;  %v10177_v10 = vld [vmem:[%s11357_s1 + $0x730] ss:$8 sps:$4 sm:$0xff]   ;;  %v10182_v6 = vld [vmem:[%s11357_s1 + $0x624] ss:$8 sps:$4 sm:$0xff]  }
 0x50c   : > { %7507 = vmatprep.subr.bf16.mxu1 %v10106_v11  ;;  %v10185_v11 = vld [vmem:[%s11357_s1 + $0x724] ss:$8 sps:$4 sm:$0xff]  }
 0x50e   : > { %7467 = vmatpush2.bf16.msra.mxu0 %v10101_v12  ;;  %v10180_v12 = vld [vmem:[%s11357_s1 + $0x620] ss:$8 sps:$4 sm:$0xff]  }
 0x50f   : > { %7508 = vmatpush2.bf16.msra.mxu1 %v10104_v13  ;;  %7468 = vmatprep.subr.bf16.mxu0 %v10109_v14  ;;  %v10183_v13 = vld [vmem:[%s11357_s1 + $0x720] ss:$8 sps:$4 sm:$0xff]   ;;  %v10188_v14 = vld [vmem:[%s11357_s1 + $0x614] ss:$8 sps:$4 sm:$0xff]  }
 0x510   : > { %7509 = vmatprep.subr.bf16.mxu1 %v10112_v15  ;;  %v10191_v15 = vld [vmem:[%s11357_s1 + $0x714] ss:$8 sps:$4 sm:$0xff]  }
 0x512   : > { %7469 = vmatpush2.bf16.msra.mxu0 %v10107_v16  ;;  %v10186_v16 = vld [vmem:[%s11357_s1 + $0x610] ss:$8 sps:$4 sm:$0xff]  }
 0x513   : > { %7510 = vmatpush2.bf16.msra.mxu1 %v10110_v17  ;;  %7470 = vmatprep.subr.bf16.mxu0 %v10115_v18  ;;  %v10189_v17 = vld [vmem:[%s11357_s1 + $0x710] ss:$8 sps:$4 sm:$0xff]   ;;  %v10194_v18 = vld [vmem:[%s11357_s1 + $0x604] ss:$8 sps:$4 sm:$0xff]  }
 0x514   : > { %7511 = vmatprep.subr.bf16.mxu1 %v10118_v19  ;;  %v10197_v19 = vld [vmem:[%s11357_s1 + $0x704] ss:$8 sps:$4 sm:$0xff]  }
 0x516   : > { %7471 = vmatpush2.bf16.msra.mxu0 %v10113_v20  ;;  %v10192_v20 = vld [vmem:[%s11357_s1 + $0x600] ss:$8 sps:$4 sm:$0xff]  }
 0x517   : > { %7512 = vmatpush2.bf16.msra.mxu1 %v10116_v22  ;;  %7472 = vmatprep.subr.bf16.mxu0 %v10121_v23  ;;  %v10195_v22 = vld [vmem:[%s11357_s1 + $0x700] ss:$8 sps:$4 sm:$0xff]   ;;  %v10200_v23 = vld [vmem:[%s11357_s1 + $0x6f4] ss:$8 sps:$4 sm:$0xff]  }
 0x518   : > { %7513 = vmatprep.subr.bf16.mxu1 %v10124_v1  ;;  %v10203_v1 = vld [vmem:[%s11357_s1 + $0x7f4] ss:$8 sps:$4 sm:$0xff]  }
 0x51a   : > { %7473 = vmatpush2.bf16.msra.mxu0 %v10119_v24  ;;  %v10198_v24 = vld [vmem:[%s11357_s1 + $0x6f0] ss:$8 sps:$4 sm:$0xff]  }
 0x51b   : > { %7514 = vmatpush2.bf16.msra.mxu1 %v10122_v25  ;;  %7474 = vmatprep.subr.bf16.mxu0 %v10127_v26  ;;  %v10201_v25 = vld [vmem:[%s11357_s1 + $0x7f0] ss:$8 sps:$4 sm:$0xff]   ;;  %v10206_v26 = vld [vmem:[%s11357_s1 + $0x6e4] ss:$8 sps:$4 sm:$0xff]  }
 0x51c   : > { %7515 = vmatprep.subr.bf16.mxu1 %v10130_v61  ;;  %v10209_v61 = vld [vmem:[%s11357_s1 + $0x7e4] ss:$8 sps:$4 sm:$0xff]  }
 0x51e   : > { %7475 = vmatpush2.bf16.msra.mxu0 %v10125_v21  ;;  %v10204_v21 = vld [vmem:[%s11357_s1 + $0x6e0] ss:$8 sps:$4 sm:$0xff]  }
 0x51f   : > { %7516 = vmatpush2.bf16.msra.mxu1 %v10128_v27  ;;  %7476 = vmatprep.subr.bf16.mxu0 %v10133_v28  ;;  %v10207_v27 = vld [vmem:[%s11357_s1 + $0x7e0] ss:$8 sps:$4 sm:$0xff]   ;;  %v10212_v28 = vld [vmem:[%s11357_s1 + $0x6d4] ss:$8 sps:$4 sm:$0xff]  }
 0x520   : > { %7517 = vmatprep.subr.bf16.mxu1 %v10136_v30  ;;  %v10215_v30 = vld [vmem:[%s11357_s1 + $0x7d4] ss:$8 sps:$4 sm:$0xff]  }
 0x522   : > { %7477 = vmatpush2.bf16.msra.mxu0 %v10131_v32  ;;  %v10210_v32 = vld [vmem:[%s11357_s1 + $0x6d0] ss:$8 sps:$4 sm:$0xff]  }
 0x523   : > { %7518 = vmatpush2.bf16.msra.mxu1 %v10134_v58  ;;  %7478 = vmatprep.subr.bf16.mxu0 %v10139_v31  ;;  %v10218_v58 = vld [vmem:[%s11357_s1 + $0x6c4] ss:$8 sps:$4 sm:$0xff]  }
 0x524   : > { %7519 = vmatprep.subr.bf16.mxu1 %v10142_v33  ;;  %v10221_v31 = vld [vmem:[%s11357_s1 + $0x7c4] ss:$8 sps:$4 sm:$0xff]   ;;  %v10216_v33 = vld [vmem:[%s11357_s1 + $0x6c0] ss:$8 sps:$4 sm:$0xff]  }
 0x526   : > { %7479 = vmatpush2.bf16.msra.mxu0 %v10137_v35  ;;  %v10224_v35 = vld [vmem:[%s11357_s1 + $0x6b4] ss:$8 sps:$4 sm:$0xff]  }
 0x527   : > { %7520 = vmatpush2.bf16.msra.mxu1 %v10140_v37  ;;  %7480 = vmatprep.subr.bf16.mxu0 %v10145_v38  ;;  %v10227_v37 = vld [vmem:[%s11357_s1 + $0x7b4] ss:$8 sps:$4 sm:$0xff]   ;;  %v10222_v38 = vld [vmem:[%s11357_s1 + $0x6b0] ss:$8 sps:$4 sm:$0xff]  }
 0x528   : > { %7521 = vmatprep.subr.bf16.mxu1 %v10148_v39  ;;  %v10225_v39 = vld [vmem:[%s11357_s1 + $0x7b0] ss:$8 sps:$4 sm:$0xff]  }
 0x52a   : > { %7481 = vmatpush2.bf16.msra.mxu0 %v10143_v43  ;;  %v10230_v43 = vld [vmem:[%s11357_s1 + $0x6a4] ss:$8 sps:$4 sm:$0xff]  }
 0x52b   : > { %7522 = vmatpush2.bf16.msra.mxu1 %v10146_v45  ;;  %7532 = vmatprep.subr.bf16.mxu0 %v10152_v46  ;;  %v10233_v45 = vld [vmem:[%s11357_s1 + $0x7a4] ss:$8 sps:$4 sm:$0xff]   ;;  %v3579_v46 = vld [vmem:[#allocation2 + $0x20] sm:$0xff] }
 0x52c   : > { %7573 = vmatprep.subr.bf16.mxu1 %v10155_v47  ;;  %v10228_v47 = vld [vmem:[%s11357_s1 + $0x6a0] ss:$8 sps:$4 sm:$0xff]  }
 0x52d   : > { %7483 = vmatmul.mubr.bf16.vlgmr.msra.gmra.mxu0 %v3790_v52  ;;  %v10239_v52 = vld [vmem:[%s11357_s1 + $0x794] ss:$8 sps:$4 sm:$0xff]  }
 0x52e   : > { %7524 = vmatmul.mubr.bf16.vlgmr.msra.gmra.mxu1 %v3792_v53  ;;  %7533 = vmatpush1.bf16.msra.mxu0 %v10150_v55  ;;  %v3661_v53 = vcombine.high %v3579_v46, %v3579_v46  ;;  %v10234_v55 = vld [vmem:[%s11357_s1 + $0x690] ss:$8 sps:$4 sm:$0xff]  }
 0x52f   : > { %7574 = vmatpush1.bf16.msra.mxu1 %v10153_v56  ;;  %7534 = vmatprep.subr.bf16.mxu0 %v10158_v57  ;;  %v10237_v56 = vld [vmem:[%s11357_s1 + $0x790] ss:$8 sps:$4 sm:$0xff]   ;;  %v10242_v57 = vld [vmem:[%s11357_s1 + $0x684] ss:$8 sps:$4 sm:$0xff]  }
 0x530   : > { %7575 = vmatprep.subr.bf16.mxu1 %v10161_v59  ;;  %7564 = vmatprep.mubr.bf16.mxu0 %v3795_v60  ;;  %v10245_v59 = vld [vmem:[%s11357_s1 + $0x784] ss:$8 sps:$4 sm:$0xff]   ;;  %v11930_v60 = vrot.slane %v3579_v46, %v11677_v51  ;;  %v10283_v46 = vld [vmem:[%s11357_s1 + $0x810] ss:$8 sps:$4 sm:$0xff]  }
 0x531   : > { %7605 = vmatprep.mubr.bf16.mxu1 %v3797_v2  ;;  %v11933_v2 = vrot.slane %v3661_v53, %v11677_v51  ;;  %v10292_v53 = vld [vmem:[%s11357_s1 + $0x900] ss:$8 sps:$4 sm:$0xff]  }
 0x532   : > { %7535 = vmatpush1.bf16.msra.mxu0 %v10156_v36  ;;  %v10240_v36 = vld [vmem:[%s11357_s1 + $0x680] ss:$8 sps:$4 sm:$0xff]  }
 0x533   : > { %7576 = vmatpush1.bf16.msra.mxu1 %v10159_v40  ;;  %7536 = vmatprep.subr.bf16.mxu0 %v10164_v62  ;;  %v10243_v40 = vld [vmem:[%s11357_s1 + $0x780] ss:$8 sps:$4 sm:$0xff]  }
 0x534   : > { %7577 = vmatprep.subr.bf16.mxu1 %v10167_v54  ;;  %v4394_v62 = vld [vmem:[%s11363_s26] sm:$0x3]  ;;  %v4398_v54 = vsub.s32 0, %v11669_v44 }
 0x536   : > { %7537 = vmatpush1.bf16.msra.mxu0 %v10162_v63  ;;  %v10249_v63 = vld [vmem:[%s11357_s1 + $0x874] ss:$8 sps:$4 sm:$0xff]  }
 0x537   : > { %7578 = vmatpush1.bf16.msra.mxu1 %v10165_v4  ;;  %7538 = vmatprep.subr.bf16.mxu0 %v10170_v0  ;;  %v10252_v4 = vld [vmem:[%s11357_s1 + $0x974] ss:$8 sps:$4 sm:$0xff]   ;;  %v4402_v0 = vsub.s32 1, %v11669_v44  ;;  %v10255_v44 = vld [vmem:[%s11357_s1 + $0x864] ss:$8 sps:$4 sm:$0xff]  }
 0x538   : > { %7579 = vmatprep.subr.bf16.mxu1 %v10173_v3  ;;  %v3676_v3 = vcombine.high %v11930_v60, %v11930_v60 }
 0x53a   : > { %7539 = vmatpush1.bf16.msra.mxu0 %v10168_v49  ;;  %v3677_v49 = vcombine.high %v11933_v2, %v11933_v2 }
 0x53b   : > { %7580 = vmatpush1.bf16.msra.mxu1 %v10171_v5  ;;  %7540 = vmatprep.subr.bf16.mxu0 %v10176_v8  ;;  %v3794_v5 = vpack.c.bf16 %v11852_v41, %v11852_v41  ;;  %v3796_v8 = vpack.c.bf16 %v11855_v42, %v11855_v42  ;;  %v10253_v42 = vld [vmem:[%s11357_s1 + $0x860] ss:$8 sps:$4 sm:$0xff]  }
 0x53c   : > { %7581 = vmatprep.subr.bf16.mxu1 %v10179_v9  ;;  %v4399_v9 = vrot.slane %v4394_v62, %v4398_v54  ;;  %v10304_v54 = vld [vmem:[%s11357_s1 + $0x9e0] ss:$8 sps:$4 sm:$0xff]  }
 0x53e   : > { %7541 = vmatpush1.bf16.msra.mxu0 %v10174_v29  ;;  %v10247_v29 = vld [vmem:[%s11357_s1 + $0x870] ss:$8 sps:$4 sm:$0xff]  }
 0x53f   : > { %7582 = vmatpush1.bf16.msra.mxu1 %v10177_v10  ;;  %7542 = vmatprep.subr.bf16.mxu0 %v10182_v6  ;;  %v10250_v10 = vld [vmem:[%s11357_s1 + $0x970] ss:$8 sps:$4 sm:$0xff]   ;;  %v10258_v6 = vld [vmem:[%s11357_s1 + $0x964] ss:$8 sps:$4 sm:$0xff]  }
 0x540   : > { %7583 = vmatprep.subr.bf16.mxu1 %v10185_v11  ;;  %v4403_v11 = vrot.slane %v4394_v62, %v4402_v0  ;;  %v10301_v62 = vld [vmem:[%s11357_s1 + $0x8e0] ss:$8 sps:$4 sm:$0xff]   ;;  %v10307_v0 = vld [vmem:[%s11357_s1 + $0x8d0] ss:$8 sps:$4 sm:$0xff]  }
 0x542   : > { %7543 = vmatpush1.bf16.msra.mxu0 %v10180_v12  ;;  %v3799_v12 = vpack.c.bf16 %v3676_v3, %v3676_v3  ;;  %v10310_v3 = vld [vmem:[%s11357_s1 + $0x9d0] ss:$8 sps:$4 sm:$0xff]  }
 0x543   : > { %7584 = vmatpush1.bf16.msra.mxu1 %v10183_v13  ;;  %7544 = vmatprep.subr.bf16.mxu0 %v10188_v14  ;;  %v3801_v13 = vpack.c.bf16 %v3677_v49, %v3677_v49  ;;  %v10315_v49 = vld [vmem:[%s11357_s1 + $0x8c4] ss:$8 sps:$4 sm:$0xff]  }
 0x544   : > { %7585 = vmatprep.subr.bf16.mxu1 %v10191_v15 }
 0x546   : > { %7545 = vmatpush1.bf16.msra.mxu0 %v10186_v16  ;;  %v10256_v16 = vld [vmem:[%s11357_s1 + $0x960] ss:$8 sps:$4 sm:$0xff]  }
 0x547   : > { %7586 = vmatpush1.bf16.msra.mxu1 %v10189_v17  ;;  %7546 = vmatprep.subr.bf16.mxu0 %v10194_v18  ;;  %v10261_v17 = vld [vmem:[%s11357_s1 + $0x854] ss:$8 sps:$4 sm:$0xff]  }
 0x548   : > { %7587 = vmatprep.subr.bf16.mxu1 %v10197_v19 }
 0x54a   : > { %7547 = vmatpush1.bf16.msra.mxu0 %v10192_v20  ;;  %v10264_v20 = vld [vmem:[%s11357_s1 + $0x954] ss:$8 sps:$4 sm:$0xff]  }
 0x54b   : > { %7588 = vmatpush1.bf16.msra.mxu1 %v10195_v22  ;;  %7548 = vmatprep.subr.bf16.mxu0 %v10200_v23 }
 0x54c   : > { %7589 = vmatprep.subr.bf16.mxu1 %v10203_v1 }
 0x54e   : > { %7549 = vmatpush2.bf16.msra.mxu0 %v10198_v24 }
 0x54f   : > { %7590 = vmatpush2.bf16.msra.mxu1 %v10201_v25  ;;  %7550 = vmatprep.subr.bf16.mxu0 %v10206_v26  ;;  %v10259_v25 = vld [vmem:[%s11357_s1 + $0x850] ss:$8 sps:$4 sm:$0xff]  }
 0x550   : > { %7591 = vmatprep.subr.bf16.mxu1 %v10209_v61  ;;  %v10262_v26 = vld [vmem:[%s11357_s1 + $0x950] ss:$8 sps:$4 sm:$0xff]  }
 0x552   : > { %7551 = vmatpush2.bf16.msra.mxu0 %v10204_v21 }
 0x553   : > { %7592 = vmatpush2.bf16.msra.mxu1 %v10207_v27  ;;  %7552 = vmatprep.subr.bf16.mxu0 %v10212_v28  ;;  %v10267_v28 = vld [vmem:[%s11357_s1 + $0x844] ss:$8 sps:$4 sm:$0xff]  }
 0x554   : > { %7593 = vmatprep.subr.bf16.mxu1 %v10215_v30  ;;  %v10270_v30 = vld [vmem:[%s11357_s1 + $0x944] ss:$8 sps:$4 sm:$0xff]  }
 0x556   : > { %7553 = vmatpush2.bf16.msra.mxu0 %v10210_v32  ;;  %v10265_v32 = vld [vmem:[%s11357_s1 + $0x840] ss:$8 sps:$4 sm:$0xff]  }
 0x557   : > { %7594 = vmatpush2.bf16.msra.mxu1 %v10213_v7  ;;  %7554 = vmatprep.subr.bf16.mxu0 %v10218_v58  ;;  %v10268_v7 = vld [vmem:[%s11357_s1 + $0x940] ss:$8 sps:$4 sm:$0xff]   ;;  %v10273_v58 = vld [vmem:[%s11357_s1 + $0x834] ss:$8 sps:$4 sm:$0xff]  }
 0x558   : > { %7595 = vmatprep.subr.bf16.mxu1 %v10221_v31  ;;  %v10276_v31 = vld [vmem:[%s11357_s1 + $0x934] ss:$8 sps:$4 sm:$0xff]  }
 0x55a   : > { %7555 = vmatpush2.bf16.msra.mxu0 %v10216_v33  ;;  %v10271_v33 = vld [vmem:[%s11357_s1 + $0x830] ss:$8 sps:$4 sm:$0xff]  }
 0x55b   : > { %7596 = vmatpush2.bf16.msra.mxu1 %v10219_v34  ;;  %7556 = vmatprep.subr.bf16.mxu0 %v10224_v35  ;;  %v10274_v34 = vld [vmem:[%s11357_s1 + $0x930] ss:$8 sps:$4 sm:$0xff]   ;;  %v10279_v35 = vld [vmem:[%s11357_s1 + $0x824] ss:$8 sps:$4 sm:$0xff]  }
 0x55c   : > { %7597 = vmatprep.subr.bf16.mxu1 %v10227_v37  ;;  %v10282_v37 = vld [vmem:[%s11357_s1 + $0x924] ss:$8 sps:$4 sm:$0xff]  }
 0x55e   : > { %7557 = vmatpush2.bf16.msra.mxu0 %v10222_v38  ;;  %v10277_v38 = vld [vmem:[%s11357_s1 + $0x820] ss:$8 sps:$4 sm:$0xff]  }
 0x55f   : > { %7598 = vmatpush2.bf16.msra.mxu1 %v10225_v39  ;;  %7558 = vmatprep.subr.bf16.mxu0 %v10230_v43  ;;  %v10280_v39 = vld [vmem:[%s11357_s1 + $0x920] ss:$8 sps:$4 sm:$0xff]   ;;  %v10285_v43 = vld [vmem:[%s11357_s1 + $0x814] ss:$8 sps:$4 sm:$0xff]  }
 0x560   : > { %7599 = vmatprep.subr.bf16.mxu1 %v10233_v45  ;;  %v10288_v45 = vld [vmem:[%s11357_s1 + $0x914] ss:$8 sps:$4 sm:$0xff]  }
 0x562   : > { %7559 = vmatpush2.bf16.msra.mxu0 %v10228_v47  ;;  %v10286_v47 = vld [vmem:[%s11357_s1 + $0x910] ss:$8 sps:$4 sm:$0xff]  }
 0x563   : > { %7600 = vmatpush2.bf16.msra.mxu1 %v10231_v48  ;;  %7560 = vmatprep.subr.bf16.mxu0 %v10236_v50  ;;  %v10291_v48 = vld [vmem:[%s11357_s1 + $0x804] ss:$8 sps:$4 sm:$0xff]  }
 0x564   : > { %7601 = vmatprep.subr.bf16.mxu1 %v10239_v52  ;;  %v10294_v50 = vld [vmem:[%s11357_s1 + $0x904] ss:$8 sps:$4 sm:$0xff]   ;;  %v10289_v52 = vld [vmem:[%s11357_s1 + $0x800] ss:$8 sps:$4 sm:$0xff]  }
 0x566   : > { %7561 = vmatpush2.bf16.msra.mxu0 %v10234_v55  ;;  %v10297_v55 = vld [vmem:[%s11357_s1 + $0x8f4] ss:$8 sps:$4 sm:$0xff]  }
 0x567   : > { %7602 = vmatpush2.bf16.msra.mxu1 %v10237_v56  ;;  %7562 = vmatprep.subr.bf16.mxu0 %v10242_v57  ;;  %v10300_v56 = vld [vmem:[%s11357_s1 + $0x9f4] ss:$8 sps:$4 sm:$0xff]   ;;  %v10295_v57 = vld [vmem:[%s11357_s1 + $0x8f0] ss:$8 sps:$4 sm:$0xff]  }
 0x568   : > { %7603 = vmatprep.subr.bf16.mxu1 %v10245_v59  ;;  %v10298_v59 = vld [vmem:[%s11357_s1 + $0x9f0] ss:$8 sps:$4 sm:$0xff]  }
 0x56a   : > { %7563 = vmatpush2.bf16.msra.mxu0 %v10240_v36  ;;  %v10303_v36 = vld [vmem:[%s11357_s1 + $0x8e4] ss:$8 sps:$4 sm:$0xff]  }
 0x56b   : > { %7604 = vmatpush2.bf16.msra.mxu1 %v10243_v40  ;;  %7614 = vmatprep.subr.bf16.mxu0 %v10249_v63  ;;  %v10306_v40 = vld [vmem:[%s11357_s1 + $0x9e4] ss:$8 sps:$4 sm:$0xff]   ;;  %v10309_v63 = vld [vmem:[%s11357_s1 + $0x8d4] ss:$8 sps:$4 sm:$0xff]  }
 0x56c   : > { %7655 = vmatprep.subr.bf16.mxu1 %v10252_v4  ;;  %v10312_v4 = vld [vmem:[%s11357_s1 + $0x9d4] ss:$8 sps:$4 sm:$0xff]  }
 0x56d   : > { %v7320_v41 = vpop.f32.mrf.mxu0  ;;  %7565 = vmatmul.mubr.bf16.vlgmr.msra.gmra.mxu0 %v3794_v5  ;;  %v10318_v5 = vld [vmem:[%s11357_s1 + $0x9c4] ss:$8 sps:$4 sm:$0xff]  }
 0x56e   : > { %v7361_v14 = vpop.f32.mrf.mxu1  ;;  %7606 = vmatmul.mubr.bf16.vlgmr.msra.gmra.mxu1 %v3796_v8  ;;  %v7321_v15 = vadd.f32 %v7320_v41, %v4399_v9  ;;  %7615 = vmatpush1.bf16.msra.mxu0 %v10247_v29  ;;  %v10313_v8 = vld [vmem:[%s11357_s1 + $0x8c0] ss:$8 sps:$4 sm:$0xff]   ;;  %v10321_v29 = vld [vmem:[%s11357_s1 + $0x8b4] ss:$8 sps:$4 sm:$0xff]  }
 0x56f   : > { %7656 = vmatpush1.bf16.msra.mxu1 %v10250_v10  ;;  %v7322_v18 = vpop.f32.mrf.mxu0  ;;  %7616 = vmatprep.subr.bf16.mxu0 %v10255_v44  ;;  %v10316_v9 = vld [vmem:[%s11357_s1 + $0x9c0] ss:$8 sps:$4 sm:$0xff]   ;;  %v10324_v10 = vld [vmem:[%s11357_s1 + $0x9b4] ss:$8 sps:$4 sm:$0xff]   ;;  %v10319_v44 = vld [vmem:[%s11357_s1 + $0x8b0] ss:$8 sps:$4 sm:$0xff]  }
 0x570   : > { %v7363_v19 = vpop.f32.mrf.mxu1  ;;  %7657 = vmatprep.subr.bf16.mxu1 %v10258_v6  ;;  %v11958_v22 = vadd.f32 %v7361_v14, %v7321_v15  ;;  %v7323_v23 = vadd.f32 %v7322_v18, %v4403_v11  ;;  %7646 = vmatprep.mubr.bf16.mxu0 %v3799_v12  ;;  %v10322_v6 = vld [vmem:[%s11357_s1 + $0x9b0] ss:$8 sps:$4 sm:$0xff]   ;;  %v10327_v11 = vld [vmem:[%s11357_s1 + $0x8a4] ss:$8 sps:$4 sm:$0xff]   ;;  %v10325_v41 = vld [vmem:[%s11357_s1 + $0x8a0] ss:$8 sps:$4 sm:$0xff]  }
 0x571   : > { %7687 = vmatprep.mubr.bf16.mxu1 %v3801_v13  ;;  %v7324_v1 = vpop.f32.mrf.mxu0  ;;  %v10330_v12 = vld [vmem:[%s11357_s1 + $0x9a4] ss:$8 sps:$4 sm:$0xff]   ;;  %v3580_v13 = vld [vmem:[#allocation2 + $0x28] sm:$0xff]  ;;  %v10328_v14 = vld [vmem:[%s11357_s1 + $0x9a0] ss:$8 sps:$4 sm:$0xff]  }
 0x572   : > { %v7365_v24 = vpop.f32.mrf.mxu1  ;;  %v11962_v61 = vadd.f32 %v7363_v19, %v7323_v23  ;;  %7617 = vmatpush1.bf16.msra.mxu0 %v10253_v42  ;;  %v10333_v42 = vld [vmem:[%s11357_s1 + $0x894] ss:$8 sps:$4 sm:$0xff]   ;;  %v10334_v18 = vld [vmem:[%s11357_s1 + $0x990] ss:$8 sps:$4 sm:$0xff]   ;;  %v10339_v19 = vld [vmem:[%s11357_s1 + $0x884] ss:$8 sps:$4 sm:$0xff]   ;;  %v12015_v23 = vrot.slane %v3580_v13, %v11677_v51 }
 0x573   : > { %7658 = vmatpush1.bf16.msra.mxu1 %v10256_v16  ;;  %v7325_v21 = vpop.f32.mrf.mxu0  ;;  %7618 = vmatprep.subr.bf16.mxu0 %v10261_v17  ;;  %v10336_v15 = vld [vmem:[%s11357_s1 + $0x994] ss:$8 sps:$4 sm:$0xff]   ;;  %v3678_v16 = vcombine.high %v3580_v13, %v3580_v13  ;;  %v10331_v17 = vld [vmem:[%s11357_s1 + $0x890] ss:$8 sps:$4 sm:$0xff]   ;;  %v10337_v24 = vld [vmem:[%s11357_s1 + $0x880] ss:$8 sps:$4 sm:$0xff]  }
 0x574   : > { %v7366_v27 = vpop.f32.mrf.mxu1  ;;  %7659 = vmatprep.subr.bf16.mxu1 %v10264_v20  ;;  %v10342_v20 = vld [vmem:[%s11357_s1 + $0x984] ss:$8 sps:$4 sm:$0xff]   ;;  %v10349_v21 = vld [vmem:[%s11357_s1 + $0xb74] ss:$8 sps:$4 sm:$0xff]   ;;  %v10389_v13 = vld [vmem:[%s11357_s1 + $0xb00] ss:$8 sps:$4 sm:$0xff]  }
 0x575   : > { %v12018_v1 = vrot.slane %v3678_v16, %v11677_v51  ;;  %v10344_v27 = vld [vmem:[%s11357_s1 + $0xa70] ss:$8 sps:$4 sm:$0xff]   ;;  %v10400_v16 = vld [vmem:[%s11357_s1 + $0xae4] ss:$8 sps:$4 sm:$0xff]  }
 0x576   : > { %7619 = vmatpush1.bf16.msra.mxu0 %v10259_v25  ;;  %v10340_v25 = vld [vmem:[%s11357_s1 + $0x980] ss:$8 sps:$4 sm:$0xff]  }
 0x577   : > { %7660 = vmatpush1.bf16.msra.mxu1 %v10262_v26  ;;  %7620 = vmatprep.subr.bf16.mxu0 %v10267_v28  ;;  %v10346_v26 = vld [vmem:[%s11357_s1 + $0xa74] ss:$8 sps:$4 sm:$0xff]   ;;  %v10347_v28 = vld [vmem:[%s11357_s1 + $0xb70] ss:$8 sps:$4 sm:$0xff]  }
 0x578   : > { %7661 = vmatprep.subr.bf16.mxu1 %v10270_v30  ;;  %v3693_v30 = vcombine.high %v12015_v23, %v12015_v23 }
 0x57a   : > { %7621 = vmatpush1.bf16.msra.mxu0 %v10265_v32  ;;  %v3694_v32 = vcombine.high %v12018_v1, %v12018_v1 }
 0x57b   : > { %7662 = vmatpush1.bf16.msra.mxu1 %v10268_v7  ;;  %7622 = vmatprep.subr.bf16.mxu0 %v10273_v58  ;;  %v3798_v7 = vpack.c.bf16 %v11930_v60, %v11930_v60  ;;  %v3800_v58 = vpack.c.bf16 %v11933_v2, %v11933_v2 }
 0x57c   : > { %7663 = vmatprep.subr.bf16.mxu1 %v10276_v31  ;;  %v10352_v31 = vld [vmem:[%s11357_s1 + $0xa64] ss:$8 sps:$4 sm:$0xff]  }
 0x57e   : > { %7623 = vmatpush1.bf16.msra.mxu0 %v10271_v33  ;;  %v10355_v33 = vld [vmem:[%s11357_s1 + $0xb64] ss:$8 sps:$4 sm:$0xff]  }
 0x57f   : > { %7664 = vmatpush1.bf16.msra.mxu1 %v10274_v34  ;;  %7624 = vmatprep.subr.bf16.mxu0 %v10279_v35  ;;  %v10350_v34 = vld [vmem:[%s11357_s1 + $0xa60] ss:$8 sps:$4 sm:$0xff]  }
 0x580   : > { %7665 = vmatprep.subr.bf16.mxu1 %v10282_v37  ;;  %v10353_v35 = vld [vmem:[%s11357_s1 + $0xb60] ss:$8 sps:$4 sm:$0xff]   ;;  %v3803_v37 = vpack.c.bf16 %v3693_v30, %v3693_v30 }
 0x581   : > { %v10413_v30 = vld [vmem:[%s11357_s1 + $0xbc0] ss:$8 sps:$4 sm:$0xff]  }
 0x582   : > { %7625 = vmatpush1.bf16.msra.mxu0 %v10277_v38  ;;  %v3805_v38 = vpack.c.bf16 %v3694_v32, %v3694_v32  ;;  %v10418_v32 = vld [vmem:[%s11357_s1 + $0xab4] ss:$8 sps:$4 sm:$0xff]  }
 0x583   : > { %7666 = vmatpush1.bf16.msra.mxu1 %v10280_v39  ;;  %7626 = vmatprep.subr.bf16.mxu0 %v10285_v43 }
 0x584   : > { %7667 = vmatprep.subr.bf16.mxu1 %v10288_v45 }
 0x586   : > { %7627 = vmatpush1.bf16.msra.mxu0 %v10283_v46  ;;  %v10358_v46 = vld [vmem:[%s11357_s1 + $0xa54] ss:$8 sps:$4 sm:$0xff]  }
 0x587   : > { %7668 = vmatpush1.bf16.msra.mxu1 %v10286_v47  ;;  %7628 = vmatprep.subr.bf16.mxu0 %v10291_v48  ;;  %v10361_v47 = vld [vmem:[%s11357_s1 + $0xb54] ss:$8 sps:$4 sm:$0xff]  }
 0x588   : > { %7669 = vmatprep.subr.bf16.mxu1 %v10294_v50 }
 0x58a   : > { %7629 = vmatpush1.bf16.msra.mxu0 %v10289_v52  ;;  %v10356_v52 = vld [vmem:[%s11357_s1 + $0xa50] ss:$8 sps:$4 sm:$0xff]  }
 0x58b   : > { %7670 = vmatpush1.bf16.msra.mxu1 %v10292_v53  ;;  %7630 = vmatprep.subr.bf16.mxu0 %v10297_v55  ;;  %v10359_v53 = vld [vmem:[%s11357_s1 + $0xb50] ss:$8 sps:$4 sm:$0xff]  }
 0x58c   : > { %7671 = vmatprep.subr.bf16.mxu1 %v10300_v56 }
 0x58e   : > { %7631 = vmatpush2.bf16.msra.mxu0 %v10295_v57 }
 0x58f   : > { %7672 = vmatpush2.bf16.msra.mxu1 %v10298_v59  ;;  %7632 = vmatprep.subr.bf16.mxu0 %v10303_v36  ;;  %v10367_v36 = vld [vmem:[%s11357_s1 + $0xb44] ss:$8 sps:$4 sm:$0xff]  }
 0x590   : > { %7673 = vmatprep.subr.bf16.mxu1 %v10306_v40  ;;  %v10362_v40 = vld [vmem:[%s11357_s1 + $0xa40] ss:$8 sps:$4 sm:$0xff]  }
 0x592   : > { %7633 = vmatpush2.bf16.msra.mxu0 %v10301_v62  ;;  %v10365_v62 = vld [vmem:[%s11357_s1 + $0xb40] ss:$8 sps:$4 sm:$0xff]  }
 0x593   : > { %7674 = vmatpush2.bf16.msra.mxu1 %v10304_v54  ;;  %7634 = vmatprep.subr.bf16.mxu0 %v10309_v63  ;;  %v10370_v54 = vld [vmem:[%s11357_s1 + $0xa34] ss:$8 sps:$4 sm:$0xff]  }
 0x594   : > { %7675 = vmatprep.subr.bf16.mxu1 %v10312_v4  ;;  %v10373_v63 = vld [vmem:[%s11357_s1 + $0xb34] ss:$8 sps:$4 sm:$0xff]   ;;  %v10368_v4 = vld [vmem:[%s11357_s1 + $0xa30] ss:$8 sps:$4 sm:$0xff]  }
 0x596   : > { %7635 = vmatpush2.bf16.msra.mxu0 %v10307_v0  ;;  %v10371_v0 = vld [vmem:[%s11357_s1 + $0xb30] ss:$8 sps:$4 sm:$0xff]  }
 0x597   : > { %7676 = vmatpush2.bf16.msra.mxu1 %v10310_v3  ;;  %7636 = vmatprep.subr.bf16.mxu0 %v10315_v49  ;;  %v10376_v3 = vld [vmem:[%s11357_s1 + $0xa24] ss:$8 sps:$4 sm:$0xff]  }
 0x598   : > { %7677 = vmatprep.subr.bf16.mxu1 %v10318_v5  ;;  %v10379_v49 = vld [vmem:[%s11357_s1 + $0xb24] ss:$8 sps:$4 sm:$0xff]   ;;  %v10374_v5 = vld [vmem:[%s11357_s1 + $0xa20] ss:$8 sps:$4 sm:$0xff]  }
 0x59a   : > { %7637 = vmatpush2.bf16.msra.mxu0 %v10313_v8  ;;  %v10377_v8 = vld [vmem:[%s11357_s1 + $0xb20] ss:$8 sps:$4 sm:$0xff]  }
 0x59b   : > { %7678 = vmatpush2.bf16.msra.mxu1 %v10316_v9  ;;  %7638 = vmatprep.subr.bf16.mxu0 %v10321_v29  ;;  %v10382_v9 = vld [vmem:[%s11357_s1 + $0xa14] ss:$8 sps:$4 sm:$0xff]  }
 0x59c   : > { %7679 = vmatprep.subr.bf16.mxu1 %v10324_v10  ;;  %v10385_v29 = vld [vmem:[%s11357_s1 + $0xb14] ss:$8 sps:$4 sm:$0xff]   ;;  %v10380_v10 = vld [vmem:[%s11357_s1 + $0xa10] ss:$8 sps:$4 sm:$0xff]  }
 0x59e   : > { %7639 = vmatpush2.bf16.msra.mxu0 %v10319_v44  ;;  %v10383_v44 = vld [vmem:[%s11357_s1 + $0xb10] ss:$8 sps:$4 sm:$0xff]  }
 0x59f   : > { %7680 = vmatpush2.bf16.msra.mxu1 %v10322_v6  ;;  %7640 = vmatprep.subr.bf16.mxu0 %v10327_v11  ;;  %v10388_v6 = vld [vmem:[%s11357_s1 + $0xa04] ss:$8 sps:$4 sm:$0xff]  }
 0x5a0   : > { %7681 = vmatprep.subr.bf16.mxu1 %v10330_v12  ;;  %v10391_v11 = vld [vmem:[%s11357_s1 + $0xb04] ss:$8 sps:$4 sm:$0xff]   ;;  %v10386_v12 = vld [vmem:[%s11357_s1 + $0xa00] ss:$8 sps:$4 sm:$0xff]  }
 0x5a2   : > { %7641 = vmatpush2.bf16.msra.mxu0 %v10325_v41  ;;  %v10394_v41 = vld [vmem:[%s11357_s1 + $0xaf4] ss:$8 sps:$4 sm:$0xff]  }
 0x5a3   : > { %7682 = vmatpush2.bf16.msra.mxu1 %v10328_v14  ;;  %7642 = vmatprep.subr.bf16.mxu0 %v10333_v42  ;;  %v10397_v14 = vld [vmem:[%s11357_s1 + $0xbf4] ss:$8 sps:$4 sm:$0xff]   ;;  %v10392_v42 = vld [vmem:[%s11357_s1 + $0xaf0] ss:$8 sps:$4 sm:$0xff]  }
 0x5a4   : > { %7683 = vmatprep.subr.bf16.mxu1 %v10336_v15  ;;  %v10395_v15 = vld [vmem:[%s11357_s1 + $0xbf0] ss:$8 sps:$4 sm:$0xff]  }
 0x5a6   : > { %7643 = vmatpush2.bf16.msra.mxu0 %v10331_v17  ;;  %v10403_v17 = vld [vmem:[%s11357_s1 + $0xbe4] ss:$8 sps:$4 sm:$0xff]  }
 0x5a7   : > { %7684 = vmatpush2.bf16.msra.mxu1 %v10334_v18  ;;  %7644 = vmatprep.subr.bf16.mxu0 %v10339_v19  ;;  %v10398_v18 = vld [vmem:[%s11357_s1 + $0xae0] ss:$8 sps:$4 sm:$0xff]  }
 0x5a8   : > { %7685 = vmatprep.subr.bf16.mxu1 %v10342_v20  ;;  %v10401_v19 = vld [vmem:[%s11357_s1 + $0xbe0] ss:$8 sps:$4 sm:$0xff]   ;;  %v10406_v20 = vld [vmem:[%s11357_s1 + $0xad4] ss:$8 sps:$4 sm:$0xff]  }
 0x5aa   : > { %7645 = vmatpush2.bf16.msra.mxu0 %v10337_v24  ;;  %v10409_v24 = vld [vmem:[%s11357_s1 + $0xbd4] ss:$8 sps:$4 sm:$0xff]  }
 0x5ab   : > { %7686 = vmatpush2.bf16.msra.mxu1 %v10340_v25  ;;  %7696 = vmatprep.subr.bf16.mxu0 %v10346_v26  ;;  %v10404_v25 = vld [vmem:[%s11357_s1 + $0xad0] ss:$8 sps:$4 sm:$0xff]  }
 0x5ac   : > { %7737 = vmatprep.subr.bf16.mxu1 %v10349_v21  ;;  %v10407_v26 = vld [vmem:[%s11357_s1 + $0xbd0] ss:$8 sps:$4 sm:$0xff]   ;;  %v10412_v21 = vld [vmem:[%s11357_s1 + $0xac4] ss:$8 sps:$4 sm:$0xff]  }
 0x5ad   : > { %v7402_v39 = vpop.f32.mrf.mxu0  ;;  %7647 = vmatmul.mubr.bf16.vlgmr.msra.gmra.mxu0 %v3798_v7  ;;  %v10421_v7 = vld [vmem:[%s11357_s1 + $0xbb4] ss:$8 sps:$4 sm:$0xff]  }
 0x5ae   : > { %v7443_v43 = vpop.f32.mrf.mxu1  ;;  %7688 = vmatmul.mubr.bf16.vlgmr.msra.gmra.mxu1 %v3800_v58  ;;  %v7403_v60 = vadd.f32 %v7402_v39, %v11958_v22  ;;  %7697 = vmatpush1.bf16.msra.mxu0 %v10344_v27  ;;  %v10415_v27 = vld [vmem:[%s11357_s1 + $0xbc4] ss:$8 sps:$4 sm:$0xff]   ;;  %v10416_v58 = vld [vmem:[%s11357_s1 + $0xab0] ss:$8 sps:$4 sm:$0xff]   ;;  %v10430_v39 = vld [vmem:[%s11357_s1 + $0xa94] ss:$8 sps:$4 sm:$0xff]  }
 0x5af   : > { %7738 = vmatpush1.bf16.msra.mxu1 %v10347_v28  ;;  %v7404_v2 = vpop.f32.mrf.mxu0  ;;  %7698 = vmatprep.subr.bf16.mxu0 %v10352_v31  ;;  %v10410_v28 = vld [vmem:[%s11357_s1 + $0xac0] ss:$8 sps:$4 sm:$0xff]   ;;  %v10419_v31 = vld [vmem:[%s11357_s1 + $0xbb0] ss:$8 sps:$4 sm:$0xff]  }
 0x5b0   : > { %v7445_v45 = vpop.f32.mrf.mxu1  ;;  %7739 = vmatprep.subr.bf16.mxu1 %v10355_v33  ;;  %v12041_v48 = vadd.f32 %v7443_v43, %v7403_v60  ;;  %v7405_v50 = vadd.f32 %v7404_v2, %v11962_v61  ;;  %7728 = vmatprep.mubr.bf16.mxu0 %v3803_v37  ;;  %v10364_v61 = vld [vmem:[%s11357_s1 + $0xa44] ss:$8 sps:$4 sm:$0xff]   ;;  %v10422_v37 = vld [vmem:[%s11357_s1 + $0xaa0] ss:$8 sps:$4 sm:$0xff]   ;;  %v10433_v43 = vld [vmem:[%s11357_s1 + $0xb94] ss:$8 sps:$4 sm:$0xff]  }
 0x5b1   : > { %7769 = vmatprep.mubr.bf16.mxu1 %v3805_v38  ;;  %v7406_v22 = vpop.f32.mrf.mxu0  ;;  %v10424_v33 = vld [vmem:[%s11357_s1 + $0xaa4] ss:$8 sps:$4 sm:$0xff]   ;;  %v10425_v38 = vld [vmem:[%s11357_s1 + $0xba0] ss:$8 sps:$4 sm:$0xff]   ;;  %v10428_v2 = vld [vmem:[%s11357_s1 + $0xa90] ss:$8 sps:$4 sm:$0xff]  }
 0x5b2   : > { %v7447_v55 = vpop.f32.mrf.mxu1  ;;  %v12046_v56 = vadd.f32 %v7445_v45, %v7405_v50  ;;  %7699 = vmatpush1.bf16.msra.mxu0 %v10350_v34  ;;  %v10427_v34 = vld [vmem:[%s11357_s1 + $0xba4] ss:$8 sps:$4 sm:$0xff]   ;;  %v10431_v45 = vld [vmem:[%s11357_s1 + $0xb90] ss:$8 sps:$4 sm:$0xff]   ;;  %v10437_v22 = vld [vmem:[%s11357_s1 + $0xb80] ss:$8 sps:$4 sm:$0xff]  }
 0x5b3   : > { %7740 = vmatpush1.bf16.msra.mxu1 %v10353_v35  ;;  %v7407_v57 = vpop.f32.mrf.mxu0  ;;  %7700 = vmatprep.subr.bf16.mxu0 %v10358_v46  ;;  %v3581_v35 = vld [vmem:[#allocation2 + $0x30] sm:$0xff]  ;;  %v10443_v55 = vld [vmem:[%s11357_s1 + $0xc74] ss:$8 sps:$4 sm:$0xff]  }
 0x5b4   : > { %v7448_v59 = vpop.f32.mrf.mxu1  ;;  %7741 = vmatprep.subr.bf16.mxu1 %v10361_v47  ;;  %v3695_v60 = vcombine.high %v3581_v35, %v3581_v35  ;;  %v10436_v46 = vld [vmem:[%s11357_s1 + $0xa84] ss:$8 sps:$4 sm:$0xff]   ;;  %v12099_v50 = vrot.slane %v3581_v35, %v11677_v51  ;;  %v10446_v57 = vld [vmem:[%s11357_s1 + $0xd74] ss:$8 sps:$4 sm:$0xff]   ;;  %v10486_v35 = vld [vmem:[%s11357_s1 + $0xd00] ss:$8 sps:$4 sm:$0xff]  }
 0x5b5   : > { %v10439_v47 = vld [vmem:[%s11357_s1 + $0xb84] ss:$8 sps:$4 sm:$0xff]  }
 0x5b6   : > { %7701 = vmatpush1.bf16.msra.mxu0 %v10356_v52  ;;  %v12102_v52 = vrot.slane %v3695_v60, %v11677_v51  ;;  %v3710_v59 = vcombine.high %v12099_v50, %v12099_v50  ;;  %v10497_v60 = vld [vmem:[%s11357_s1 + $0xce4] ss:$8 sps:$4 sm:$0xff]  }
 0x5b7   : > { %7742 = vmatpush1.bf16.msra.mxu1 %v10359_v53  ;;  %7702 = vmatprep.subr.bf16.mxu0 %v10364_v61  ;;  %v10434_v53 = vld [vmem:[%s11357_s1 + $0xa80] ss:$8 sps:$4 sm:$0xff]  }
 0x5b8   : > { %7743 = vmatprep.subr.bf16.mxu1 %v10367_v36  ;;  %v3711_v61 = vcombine.high %v12102_v52, %v12102_v52  ;;  %v3802_v36 = vpack.c.bf16 %v12015_v23, %v12015_v23 }
 0x5ba   : > { %7703 = vmatpush1.bf16.msra.mxu0 %v10362_v40  ;;  %v3804_v40 = vpack.c.bf16 %v12018_v1, %v12018_v1  ;;  %v10447_v1 = vld [vmem:[%s11357_s1 + $0xc60] ss:$8 sps:$4 sm:$0xff]  }
 0x5bb   : > { %7744 = vmatpush1.bf16.msra.mxu1 %v10365_v62  ;;  %7704 = vmatprep.subr.bf16.mxu0 %v10370_v54  ;;  %v10441_v62 = vld [vmem:[%s11357_s1 + $0xc70] ss:$8 sps:$4 sm:$0xff]  }
 0x5bc   : > { %7745 = vmatprep.subr.bf16.mxu1 %v10373_v63  ;;  %v10444_v54 = vld [vmem:[%s11357_s1 + $0xd70] ss:$8 sps:$4 sm:$0xff]   ;;  %v10449_v63 = vld [vmem:[%s11357_s1 + $0xc64] ss:$8 sps:$4 sm:$0xff]  }
 0x5be   : > { %7705 = vmatpush1.bf16.msra.mxu0 %v10368_v4  ;;  %v10452_v4 = vld [vmem:[%s11357_s1 + $0xd64] ss:$8 sps:$4 sm:$0xff]  }
 0x5bf   : > { %7746 = vmatpush1.bf16.msra.mxu1 %v10371_v0  ;;  %7706 = vmatprep.subr.bf16.mxu0 %v10376_v3  ;;  %v3807_v0 = vpack.c.bf16 %v3710_v59, %v3710_v59  ;;  %v3809_v3 = vpack.c.bf16 %v3711_v61, %v3711_v61  ;;  %v10512_v59 = vld [vmem:[%s11357_s1 + $0xdc4] ss:$8 sps:$4 sm:$0xff]   ;;  %v10507_v61 = vld [vmem:[%s11357_s1 + $0xcc0] ss:$8 sps:$4 sm:$0xff]  }
 0x5c0   : > { %7747 = vmatprep.subr.bf16.mxu1 %v10379_v49 }
 0x5c2   : > { %7707 = vmatpush1.bf16.msra.mxu0 %v10374_v5 }
 0x5c3   : > { %7748 = vmatpush1.bf16.msra.mxu1 %v10377_v8  ;;  %7708 = vmatprep.subr.bf16.mxu0 %v10382_v9  ;;  %v10450_v8 = vld [vmem:[%s11357_s1 + $0xd60] ss:$8 sps:$4 sm:$0xff]  }
 0x5c4   : > { %7749 = vmatprep.subr.bf16.mxu1 %v10385_v29 }
 0x5c6   : > { %7709 = vmatpush1.bf16.msra.mxu0 %v10380_v10  ;;  %v10455_v10 = vld [vmem:[%s11357_s1 + $0xc54] ss:$8 sps:$4 sm:$0xff]  }
 0x5c7   : > { %7750 = vmatpush1.bf16.msra.mxu1 %v10383_v44  ;;  %7710 = vmatprep.subr.bf16.mxu0 %v10388_v6  ;;  %v10458_v44 = vld [vmem:[%s11357_s1 + $0xd54] ss:$8 sps:$4 sm:$0xff]  }
 0x5c8   : > { %7751 = vmatprep.subr.bf16.mxu1 %v10391_v11 }
 0x5ca   : > { %7711 = vmatpush1.bf16.msra.mxu0 %v10386_v12 }
 0x5cb   : > { %7752 = vmatpush1.bf16.msra.mxu1 %v10389_v13  ;;  %7712 = vmatprep.subr.bf16.mxu0 %v10394_v41  ;;  %v10453_v41 = vld [vmem:[%s11357_s1 + $0xc50] ss:$8 sps:$4 sm:$0xff]  }
 0x5cc   : > { %7753 = vmatprep.subr.bf16.mxu1 %v10397_v14  ;;  %v10456_v14 = vld [vmem:[%s11357_s1 + $0xd50] ss:$8 sps:$4 sm:$0xff]  }
 0x5ce   : > { %7713 = vmatpush2.bf16.msra.mxu0 %v10392_v42 }
 0x5cf   : > { %7754 = vmatpush2.bf16.msra.mxu1 %v10395_v15  ;;  %7714 = vmatprep.subr.bf16.mxu0 %v10400_v16  ;;  %v10464_v16 = vld [vmem:[%s11357_s1 + $0xd44] ss:$8 sps:$4 sm:$0xff]  }
 0x5d0   : > { %7755 = vmatprep.subr.bf16.mxu1 %v10403_v17  ;;  %v10459_v17 = vld [vmem:[%s11357_s1 + $0xc40] ss:$8 sps:$4 sm:$0xff]  }
 0x5d2   : > { %7715 = vmatpush2.bf16.msra.mxu0 %v10398_v18  ;;  %v10462_v18 = vld [vmem:[%s11357_s1 + $0xd40] ss:$8 sps:$4 sm:$0xff]  }
 0x5d3   : > { %7756 = vmatpush2.bf16.msra.mxu1 %v10401_v19  ;;  %7716 = vmatprep.subr.bf16.mxu0 %v10406_v20  ;;  %v10467_v19 = vld [vmem:[%s11357_s1 + $0xc34] ss:$8 sps:$4 sm:$0xff]  }
 0x5d4   : > { %7757 = vmatprep.subr.bf16.mxu1 %v10409_v24  ;;  %v10470_v20 = vld [vmem:[%s11357_s1 + $0xd34] ss:$8 sps:$4 sm:$0xff]   ;;  %v10465_v24 = vld [vmem:[%s11357_s1 + $0xc30] ss:$8 sps:$4 sm:$0xff]  }
 0x5d6   : > { %7717 = vmatpush2.bf16.msra.mxu0 %v10404_v25  ;;  %v10468_v25 = vld [vmem:[%s11357_s1 + $0xd30] ss:$8 sps:$4 sm:$0xff]  }
 0x5d7   : > { %7758 = vmatpush2.bf16.msra.mxu1 %v10407_v26  ;;  %7718 = vmatprep.subr.bf16.mxu0 %v10412_v21  ;;  %v10473_v26 = vld [vmem:[%s11357_s1 + $0xc24] ss:$8 sps:$4 sm:$0xff]  }
 0x5d8   : > { %7759 = vmatprep.subr.bf16.mxu1 %v10415_v27  ;;  %v10476_v21 = vld [vmem:[%s11357_s1 + $0xd24] ss:$8 sps:$4 sm:$0xff]   ;;  %v10471_v27 = vld [vmem:[%s11357_s1 + $0xc20] ss:$8 sps:$4 sm:$0xff]  }
 0x5da   : > { %7719 = vmatpush2.bf16.msra.mxu0 %v10410_v28  ;;  %v10474_v28 = vld [vmem:[%s11357_s1 + $0xd20] ss:$8 sps:$4 sm:$0xff]  }
 0x5db   : > { %7760 = vmatpush2.bf16.msra.mxu1 %v10413_v30  ;;  %7720 = vmatprep.subr.bf16.mxu0 %v10418_v32  ;;  %v10479_v30 = vld [vmem:[%s11357_s1 + $0xc14] ss:$8 sps:$4 sm:$0xff]  }
 0x5dc   : > { %7761 = vmatprep.subr.bf16.mxu1 %v10421_v7  ;;  %v10482_v32 = vld [vmem:[%s11357_s1 + $0xd14] ss:$8 sps:$4 sm:$0xff]   ;;  %v10477_v7 = vld [vmem:[%s11357_s1 + $0xc10] ss:$8 sps:$4 sm:$0xff]  }
 0x5de   : > { %7721 = vmatpush2.bf16.msra.mxu0 %v10416_v58  ;;  %v10480_v58 = vld [vmem:[%s11357_s1 + $0xd10] ss:$8 sps:$4 sm:$0xff]  }
 0x5df   : > { %7762 = vmatpush2.bf16.msra.mxu1 %v10419_v31  ;;  %7722 = vmatprep.subr.bf16.mxu0 %v10424_v33  ;;  %v10485_v31 = vld [vmem:[%s11357_s1 + $0xc04] ss:$8 sps:$4 sm:$0xff]  }
 0x5e0   : > { %7763 = vmatprep.subr.bf16.mxu1 %v10427_v34  ;;  %v10488_v33 = vld [vmem:[%s11357_s1 + $0xd04] ss:$8 sps:$4 sm:$0xff]   ;;  %v10483_v34 = vld [vmem:[%s11357_s1 + $0xc00] ss:$8 sps:$4 sm:$0xff]  }
 0x5e2   : > { %7723 = vmatpush2.bf16.msra.mxu0 %v10422_v37  ;;  %v10491_v37 = vld [vmem:[%s11357_s1 + $0xcf4] ss:$8 sps:$4 sm:$0xff]  }
 0x5e3   : > { %7764 = vmatpush2.bf16.msra.mxu1 %v10425_v38  ;;  %7724 = vmatprep.subr.bf16.mxu0 %v10430_v39  ;;  %v10494_v38 = vld [vmem:[%s11357_s1 + $0xdf4] ss:$8 sps:$4 sm:$0xff]   ;;  %v10489_v39 = vld [vmem:[%s11357_s1 + $0xcf0] ss:$8 sps:$4 sm:$0xff]  }
 0x5e4   : > { %7765 = vmatprep.subr.bf16.mxu1 %v10433_v43  ;;  %v10492_v43 = vld [vmem:[%s11357_s1 + $0xdf0] ss:$8 sps:$4 sm:$0xff]  }
 0x5e6   : > { %7725 = vmatpush2.bf16.msra.mxu0 %v10428_v2  ;;  %v10500_v2 = vld [vmem:[%s11357_s1 + $0xde4] ss:$8 sps:$4 sm:$0xff]  }
 0x5e7   : > { %7766 = vmatpush2.bf16.msra.mxu1 %v10431_v45  ;;  %7726 = vmatprep.subr.bf16.mxu0 %v10436_v46  ;;  %v10495_v45 = vld [vmem:[%s11357_s1 + $0xce0] ss:$8 sps:$4 sm:$0xff]  }
 0x5e8   : > { %7767 = vmatprep.subr.bf16.mxu1 %v10439_v47  ;;  %v10498_v46 = vld [vmem:[%s11357_s1 + $0xde0] ss:$8 sps:$4 sm:$0xff]   ;;  %v10503_v47 = vld [vmem:[%s11357_s1 + $0xcd4] ss:$8 sps:$4 sm:$0xff]  }
 0x5ea   : > { %7727 = vmatpush2.bf16.msra.mxu0 %v10434_v53  ;;  %v10506_v53 = vld [vmem:[%s11357_s1 + $0xdd4] ss:$8 sps:$4 sm:$0xff]  }
 0x5eb   : > { %7768 = vmatpush2.bf16.msra.mxu1 %v10437_v22  ;;  %7778 = vmatprep.subr.bf16.mxu0 %v10443_v55  ;;  %v10501_v22 = vld [vmem:[%s11357_s1 + $0xcd0] ss:$8 sps:$4 sm:$0xff]  }
 0x5ec   : > { %7819 = vmatprep.subr.bf16.mxu1 %v10446_v57  ;;  %v10504_v55 = vld [vmem:[%s11357_s1 + $0xdd0] ss:$8 sps:$4 sm:$0xff]   ;;  %v10509_v57 = vld [vmem:[%s11357_s1 + $0xcc4] ss:$8 sps:$4 sm:$0xff]  }
 0x5ed   : > { %v7484_v49 = vpop.f32.mrf.mxu0  ;;  %7729 = vmatmul.mubr.bf16.vlgmr.msra.gmra.mxu0 %v3802_v36  ;;  %v10510_v36 = vld [vmem:[%s11357_s1 + $0xdc0] ss:$8 sps:$4 sm:$0xff]  }
 0x5ee   : > { %v7525_v5 = vpop.f32.mrf.mxu1  ;;  %7770 = vmatmul.mubr.bf16.vlgmr.msra.gmra.mxu1 %v3804_v40  ;;  %v7485_v23 = vadd.f32 %v7484_v49, %v12041_v48  ;;  %7779 = vmatpush1.bf16.msra.mxu0 %v10441_v62  ;;  %v10515_v40 = vld [vmem:[%s11357_s1 + $0xcb4] ss:$8 sps:$4 sm:$0xff]   ;;  %v10519_v49 = vld [vmem:[%s11357_s1 + $0xca0] ss:$8 sps:$4 sm:$0xff]  }
 0x5ef   : > { %7820 = vmatpush1.bf16.msra.mxu1 %v10444_v54  ;;  %v7486_v9 = vpop.f32.mrf.mxu0  ;;  %7780 = vmatprep.subr.bf16.mxu0 %v10449_v63  ;;  %v10518_v62 = vld [vmem:[%s11357_s1 + $0xdb4] ss:$8 sps:$4 sm:$0xff]   ;;  %v10513_v54 = vld [vmem:[%s11357_s1 + $0xcb0] ss:$8 sps:$4 sm:$0xff]  }
 0x5f0   : > { %v7527_v29 = vpop.f32.mrf.mxu1  ;;  %7821 = vmatprep.subr.bf16.mxu1 %v10452_v4  ;;  %v12125_v6 = vadd.f32 %v7525_v5, %v7485_v23  ;;  %v7487_v11 = vadd.f32 %v7486_v9, %v12046_v56  ;;  %7810 = vmatprep.mubr.bf16.mxu0 %v3807_v0  ;;  %v10461_v56 = vld [vmem:[%s11357_s1 + $0xc44] ss:$8 sps:$4 sm:$0xff]   ;;  %v10516_v63 = vld [vmem:[%s11357_s1 + $0xdb0] ss:$8 sps:$4 sm:$0xff]   ;;  %v10522_v5 = vld [vmem:[%s11357_s1 + $0xda0] ss:$8 sps:$4 sm:$0xff]  }
 0x5f1   : > { %7851 = vmatprep.mubr.bf16.mxu1 %v3809_v3  ;;  %v7488_v48 = vpop.f32.mrf.mxu0  ;;  %v10521_v4 = vld [vmem:[%s11357_s1 + $0xca4] ss:$8 sps:$4 sm:$0xff]   ;;  %v10527_v23 = vld [vmem:[%s11357_s1 + $0xc94] ss:$8 sps:$4 sm:$0xff]   ;;  %v10525_v9 = vld [vmem:[%s11357_s1 + $0xc90] ss:$8 sps:$4 sm:$0xff]  }
 0x5f2   : > { %v7529_v12 = vpop.f32.mrf.mxu1  ;;  %v12128_v13 = vadd.f32 %v7527_v29, %v7487_v11  ;;  %7781 = vmatpush1.bf16.msra.mxu0 %v10447_v1  ;;  %v10524_v0 = vld [vmem:[%s11357_s1 + $0xda4] ss:$8 sps:$4 sm:$0xff]   ;;  %v10530_v1 = vld [vmem:[%s11357_s1 + $0xd94] ss:$8 sps:$4 sm:$0xff]   ;;  %v10528_v29 = vld [vmem:[%s11357_s1 + $0xd90] ss:$8 sps:$4 sm:$0xff]  }
 0x5f3   : > { %7822 = vmatpush1.bf16.msra.mxu1 %v10450_v8  ;;  %v7489_v42 = vpop.f32.mrf.mxu0  ;;  %7782 = vmatprep.subr.bf16.mxu0 %v10455_v10  ;;  %v3582_v3 = vld [vmem:[#allocation2 + $0x38] sm:$0xff] }
 0x5f4   : > { %v7530_v15 = vpop.f32.mrf.mxu1  ;;  %7823 = vmatprep.subr.bf16.mxu1 %v10458_v44  ;;  %v3712_v8 = vcombine.high %v3582_v3, %v3582_v3  ;;  %v10533_v10 = vld [vmem:[%s11357_s1 + $0xc84] ss:$8 sps:$4 sm:$0xff]   ;;  %v12183_v11 = vrot.slane %v3582_v3, %v11677_v51  ;;  %v10531_v12 = vld [vmem:[%s11357_s1 + $0xc80] ss:$8 sps:$4 sm:$0xff]   ;;  %v10543_v42 = vld [vmem:[%s11357_s1 + $0xf74] ss:$8 sps:$4 sm:$0xff]  }
 0x5f5   : > { %v10536_v44 = vld [vmem:[%s11357_s1 + $0xd84] ss:$8 sps:$4 sm:$0xff]   ;;  %v10583_v3 = vld [vmem:[%s11357_s1 + $0xf00] ss:$8 sps:$4 sm:$0xff]  }
 0x5f6   : > { %7783 = vmatpush1.bf16.msra.mxu0 %v10453_v41  ;;  %v12186_v48 = vrot.slane %v3712_v8, %v11677_v51  ;;  %v10534_v41 = vld [vmem:[%s11357_s1 + $0xd80] ss:$8 sps:$4 sm:$0xff]   ;;  %v3727_v15 = vcombine.high %v12183_v11, %v12183_v11  ;;  %v10594_v8 = vld [vmem:[%s11357_s1 + $0xee4] ss:$8 sps:$4 sm:$0xff]  }
 0x5f7   : > { %7824 = vmatpush1.bf16.msra.mxu1 %v10456_v14  ;;  %7784 = vmatprep.subr.bf16.mxu0 %v10461_v56  ;;  %v10540_v14 = vld [vmem:[%s11357_s1 + $0xe74] ss:$8 sps:$4 sm:$0xff]  }
 0x5f8   : > { %7825 = vmatprep.subr.bf16.mxu1 %v10464_v16  ;;  %v3728_v56 = vcombine.high %v12186_v48, %v12186_v48  ;;  %v3806_v16 = vpack.c.bf16 %v12099_v50, %v12099_v50 }
 0x5fa   : > { %7785 = vmatpush1.bf16.msra.mxu0 %v10459_v17  ;;  %v3808_v17 = vpack.c.bf16 %v12102_v52, %v12102_v52  ;;  %v10544_v52 = vld [vmem:[%s11357_s1 + $0xe60] ss:$8 sps:$4 sm:$0xff]  }
 0x5fb   : > { %7826 = vmatpush1.bf16.msra.mxu1 %v10462_v18  ;;  %7786 = vmatprep.subr.bf16.mxu0 %v10467_v19  ;;  %v10538_v18 = vld [vmem:[%s11357_s1 + $0xe70] ss:$8 sps:$4 sm:$0xff]  }
 0x5fc   : > { %7827 = vmatprep.subr.bf16.mxu1 %v10470_v20  ;;  %v10541_v19 = vld [vmem:[%s11357_s1 + $0xf70] ss:$8 sps:$4 sm:$0xff]   ;;  %v10546_v20 = vld [vmem:[%s11357_s1 + $0xe64] ss:$8 sps:$4 sm:$0xff]  }
 0x5fe   : > { %7787 = vmatpush1.bf16.msra.mxu0 %v10465_v24  ;;  %v10549_v24 = vld [vmem:[%s11357_s1 + $0xf64] ss:$8 sps:$4 sm:$0xff]  }
 0x5ff   : > { %7828 = vmatpush1.bf16.msra.mxu1 %v10468_v25  ;;  %7788 = vmatprep.subr.bf16.mxu0 %v10473_v26  ;;  %v3811_v25 = vpack.c.bf16 %v3727_v15, %v3727_v15  ;;  %v3813_v26 = vpack.c.bf16 %v3728_v56, %v3728_v56  ;;  %v10609_v15 = vld [vmem:[%s11357_s1 + $0xfc4] ss:$8 sps:$4 sm:$0xff]   ;;  %v10604_v56 = vld [vmem:[%s11357_s1 + $0xec0] ss:$8 sps:$4 sm:$0xff]  }
 0x600   : > { %7829 = vmatprep.subr.bf16.mxu1 %v10476_v21 }
 0x602   : > { %7789 = vmatpush1.bf16.msra.mxu0 %v10471_v27 }
 0x603   : > { %7830 = vmatpush1.bf16.msra.mxu1 %v10474_v28  ;;  %7790 = vmatprep.subr.bf16.mxu0 %v10479_v30  ;;  %v10547_v28 = vld [vmem:[%s11357_s1 + $0xf60] ss:$8 sps:$4 sm:$0xff]  }
 0x604   : > { %7831 = vmatprep.subr.bf16.mxu1 %v10482_v32 }
 0x606   : > { %7791 = vmatpush1.bf16.msra.mxu0 %v10477_v7  ;;  %v10552_v7 = vld [vmem:[%s11357_s1 + $0xe54] ss:$8 sps:$4 sm:$0xff]  }
 0x607   : > { %7832 = vmatpush1.bf16.msra.mxu1 %v10480_v58  ;;  %7792 = vmatprep.subr.bf16.mxu0 %v10485_v31  ;;  %v10555_v58 = vld [vmem:[%s11357_s1 + $0xf54] ss:$8 sps:$4 sm:$0xff]  }
 0x608   : > { %7833 = vmatprep.subr.bf16.mxu1 %v10488_v33 }
 0x60a   : > { %7793 = vmatpush1.bf16.msra.mxu0 %v10483_v34 }
 0x60b   : > { %7834 = vmatpush1.bf16.msra.mxu1 %v10486_v35  ;;  %7794 = vmatprep.subr.bf16.mxu0 %v10491_v37  ;;  %v10550_v37 = vld [vmem:[%s11357_s1 + $0xe50] ss:$8 sps:$4 sm:$0xff]  }
 0x60c   : > { %7835 = vmatprep.subr.bf16.mxu1 %v10494_v38  ;;  %v10553_v38 = vld [vmem:[%s11357_s1 + $0xf50] ss:$8 sps:$4 sm:$0xff]  }
 0x60e   : > { %7795 = vmatpush2.bf16.msra.mxu0 %v10489_v39 }
 0x60f   : > { %7836 = vmatpush2.bf16.msra.mxu1 %v10492_v43  ;;  %7796 = vmatprep.subr.bf16.mxu0 %v10497_v60  ;;  %v10561_v60 = vld [vmem:[%s11357_s1 + $0xf44] ss:$8 sps:$4 sm:$0xff]  }
 0x610   : > { %7837 = vmatprep.subr.bf16.mxu1 %v10500_v2  ;;  %v10556_v2 = vld [vmem:[%s11357_s1 + $0xe40] ss:$8 sps:$4 sm:$0xff]  }
 0x612   : > { %7797 = vmatpush2.bf16.msra.mxu0 %v10495_v45  ;;  %v10559_v45 = vld [vmem:[%s11357_s1 + $0xf40] ss:$8 sps:$4 sm:$0xff]  }
 0x613   : > { %7838 = vmatpush2.bf16.msra.mxu1 %v10498_v46  ;;  %7798 = vmatprep.subr.bf16.mxu0 %v10503_v47  ;;  %v10564_v46 = vld [vmem:[%s11357_s1 + $0xe34] ss:$8 sps:$4 sm:$0xff]  }
 0x614   : > { %7839 = vmatprep.subr.bf16.mxu1 %v10506_v53  ;;  %v10567_v47 = vld [vmem:[%s11357_s1 + $0xf34] ss:$8 sps:$4 sm:$0xff]   ;;  %v10562_v53 = vld [vmem:[%s11357_s1 + $0xe30] ss:$8 sps:$4 sm:$0xff]  }
 0x616   : > { %7799 = vmatpush2.bf16.msra.mxu0 %v10501_v22  ;;  %v10565_v22 = vld [vmem:[%s11357_s1 + $0xf30] ss:$8 sps:$4 sm:$0xff]  }
 0x617   : > { %7840 = vmatpush2.bf16.msra.mxu1 %v10504_v55  ;;  %7800 = vmatprep.subr.bf16.mxu0 %v10509_v57  ;;  %v10570_v55 = vld [vmem:[%s11357_s1 + $0xe24] ss:$8 sps:$4 sm:$0xff]  }
 0x618   : > { %7841 = vmatprep.subr.bf16.mxu1 %v10512_v59  ;;  %v10573_v57 = vld [vmem:[%s11357_s1 + $0xf24] ss:$8 sps:$4 sm:$0xff]   ;;  %v10568_v59 = vld [vmem:[%s11357_s1 + $0xe20] ss:$8 sps:$4 sm:$0xff]  }
 0x61a   : > { %7801 = vmatpush2.bf16.msra.mxu0 %v10507_v61  ;;  %v10571_v61 = vld [vmem:[%s11357_s1 + $0xf20] ss:$8 sps:$4 sm:$0xff]  }
 0x61b   : > { %7842 = vmatpush2.bf16.msra.mxu1 %v10510_v36  ;;  %7802 = vmatprep.subr.bf16.mxu0 %v10515_v40  ;;  %v10576_v36 = vld [vmem:[%s11357_s1 + $0xe14] ss:$8 sps:$4 sm:$0xff]  }
 0x61c   : > { %7843 = vmatprep.subr.bf16.mxu1 %v10518_v62  ;;  %v10579_v40 = vld [vmem:[%s11357_s1 + $0xf14] ss:$8 sps:$4 sm:$0xff]   ;;  %v10574_v62 = vld [vmem:[%s11357_s1 + $0xe10] ss:$8 sps:$4 sm:$0xff]  }
 0x61e   : > { %7803 = vmatpush2.bf16.msra.mxu0 %v10513_v54  ;;  %v10577_v54 = vld [vmem:[%s11357_s1 + $0xf10] ss:$8 sps:$4 sm:$0xff]  }
 0x61f   : > { %7844 = vmatpush2.bf16.msra.mxu1 %v10516_v63  ;;  %7804 = vmatprep.subr.bf16.mxu0 %v10521_v4  ;;  %v10582_v63 = vld [vmem:[%s11357_s1 + $0xe04] ss:$8 sps:$4 sm:$0xff]  }
 0x620   : > { %7845 = vmatprep.subr.bf16.mxu1 %v10524_v0  ;;  %v10585_v4 = vld [vmem:[%s11357_s1 + $0xf04] ss:$8 sps:$4 sm:$0xff]   ;;  %v10580_v0 = vld [vmem:[%s11357_s1 + $0xe00] ss:$8 sps:$4 sm:$0xff]  }
 0x622   : > { %7805 = vmatpush2.bf16.msra.mxu0 %v10519_v49  ;;  %v10588_v49 = vld [vmem:[%s11357_s1 + $0xef4] ss:$8 sps:$4 sm:$0xff]  }
 0x623   : > { %7846 = vmatpush2.bf16.msra.mxu1 %v10522_v5  ;;  %7806 = vmatprep.subr.bf16.mxu0 %v10527_v23  ;;  %v10591_v5 = vld [vmem:[%s11357_s1 + $0xff4] ss:$8 sps:$4 sm:$0xff]   ;;  %v10586_v23 = vld [vmem:[%s11357_s1 + $0xef0] ss:$8 sps:$4 sm:$0xff]  }
 0x624   : > { %7847 = vmatprep.subr.bf16.mxu1 %v10530_v1  ;;  %v10589_v1 = vld [vmem:[%s11357_s1 + $0xff0] ss:$8 sps:$4 sm:$0xff]  }
 0x626   : > { %7807 = vmatpush2.bf16.msra.mxu0 %v10525_v9  ;;  %v10597_v9 = vld [vmem:[%s11357_s1 + $0xfe4] ss:$8 sps:$4 sm:$0xff]  }
 0x627   : > { %7848 = vmatpush2.bf16.msra.mxu1 %v10528_v29  ;;  %7808 = vmatprep.subr.bf16.mxu0 %v10533_v10  ;;  %v10592_v29 = vld [vmem:[%s11357_s1 + $0xee0] ss:$8 sps:$4 sm:$0xff]  }
 0x628   : > { %7849 = vmatprep.subr.bf16.mxu1 %v10536_v44  ;;  %v10595_v10 = vld [vmem:[%s11357_s1 + $0xfe0] ss:$8 sps:$4 sm:$0xff]   ;;  %v10600_v44 = vld [vmem:[%s11357_s1 + $0xed4] ss:$8 sps:$4 sm:$0xff]  }
 0x62a   : > { %7809 = vmatpush2.bf16.msra.mxu0 %v10531_v12  ;;  %v10603_v12 = vld [vmem:[%s11357_s1 + $0xfd4] ss:$8 sps:$4 sm:$0xff]  }
 0x62b   : > { %7850 = vmatpush2.bf16.msra.mxu1 %v10534_v41  ;;  %7860 = vmatprep.subr.bf16.mxu0 %v10540_v14  ;;  %v10598_v41 = vld [vmem:[%s11357_s1 + $0xed0] ss:$8 sps:$4 sm:$0xff]  }
 0x62c   : > { %7901 = vmatprep.subr.bf16.mxu1 %v10543_v42  ;;  %v10601_v14 = vld [vmem:[%s11357_s1 + $0xfd0] ss:$8 sps:$4 sm:$0xff]   ;;  %v10606_v42 = vld [vmem:[%s11357_s1 + $0xec4] ss:$8 sps:$4 sm:$0xff]  }
 0x62d   : > { %v7566_v21 = vpop.f32.mrf.mxu0  ;;  %7811 = vmatmul.mubr.bf16.vlgmr.msra.gmra.mxu0 %v3806_v16  ;;  %v10607_v16 = vld [vmem:[%s11357_s1 + $0xfc0] ss:$8 sps:$4 sm:$0xff]  }
 0x62e   : > { %v7607_v27 = vpop.f32.mrf.mxu1  ;;  %7852 = vmatmul.mubr.bf16.vlgmr.msra.gmra.mxu1 %v3808_v17  ;;  %v7567_v50 = vadd.f32 %v7566_v21, %v12125_v6  ;;  %7861 = vmatpush1.bf16.msra.mxu0 %v10538_v18  ;;  %v10612_v17 = vld [vmem:[%s11357_s1 + $0xeb4] ss:$8 sps:$4 sm:$0xff]   ;;  %v10616_v21 = vld [vmem:[%s11357_s1 + $0xea0] ss:$8 sps:$4 sm:$0xff]  }
 0x62f   : > { %7902 = vmatpush1.bf16.msra.mxu1 %v10541_v19  ;;  %v7568_v30 = vpop.f32.mrf.mxu0  ;;  %7862 = vmatprep.subr.bf16.mxu0 %v10546_v20  ;;  %v10615_v18 = vld [vmem:[%s11357_s1 + $0xfb4] ss:$8 sps:$4 sm:$0xff]   ;;  %v10610_v19 = vld [vmem:[%s11357_s1 + $0xeb0] ss:$8 sps:$4 sm:$0xff]  }
 0x630   : > { %v7609_v32 = vpop.f32.mrf.mxu1  ;;  %7903 = vmatprep.subr.bf16.mxu1 %v10549_v24  ;;  %v12209_v31 = vadd.f32 %v7607_v27, %v7567_v50  ;;  %v7569_v33 = vadd.f32 %v7568_v30, %v12128_v13  ;;  %7892 = vmatprep.mubr.bf16.mxu0 %v3811_v25  ;;  %v10558_v13 = vld [vmem:[%s11357_s1 + $0xe44] ss:$8 sps:$4 sm:$0xff]   ;;  %v10613_v20 = vld [vmem:[%s11357_s1 + $0xfb0] ss:$8 sps:$4 sm:$0xff]   ;;  %v10619_v27 = vld [vmem:[%s11357_s1 + $0xfa0] ss:$8 sps:$4 sm:$0xff]  }
 0x631   : > { %7933 = vmatprep.mubr.bf16.mxu1 %v3813_v26  ;;  %v7570_v6 = vpop.f32.mrf.mxu0  ;;  %v10618_v24 = vld [vmem:[%s11357_s1 + $0xea4] ss:$8 sps:$4 sm:$0xff]   ;;  %v3583_v26 = vld [vmem:[#allocation2 + $0x40] sm:$0xff] }
 0x632   : > { %v7611_v34 = vpop.f32.mrf.mxu1  ;;  %v12212_v35 = vadd.f32 %v7609_v32, %v7569_v33  ;;  %7863 = vmatpush1.bf16.msra.mxu0 %v10544_v52  ;;  %v10621_v25 = vld [vmem:[%s11357_s1 + $0xfa4] ss:$8 sps:$4 sm:$0xff]   ;;  %v10624_v50 = vld [vmem:[%s11357_s1 + $0xe94] ss:$8 sps:$4 sm:$0xff]   ;;  %v10622_v30 = vld [vmem:[%s11357_s1 + $0xe90] ss:$8 sps:$4 sm:$0xff]   ;;  %v12267_v33 = vrot.slane %v3583_v26, %v11677_v51 }
 0x633   : > { %7904 = vmatpush1.bf16.msra.mxu1 %v10547_v28  ;;  %v7571_v39 = vpop.f32.mrf.mxu0  ;;  %7864 = vmatprep.subr.bf16.mxu0 %v10552_v7  ;;  %v10627_v52 = vld [vmem:[%s11357_s1 + $0xf94] ss:$8 sps:$4 sm:$0xff]   ;;  %v3729_v28 = vcombine.high %v3583_v26, %v3583_v26  ;;  %v10625_v32 = vld [vmem:[%s11357_s1 + $0xf90] ss:$8 sps:$4 sm:$0xff]   ;;  %v10630_v7 = vld [vmem:[%s11357_s1 + $0xe84] ss:$8 sps:$4 sm:$0xff]  }
 0x634   : > { %v7612_v43 = vpop.f32.mrf.mxu1  ;;  %7905 = vmatprep.subr.bf16.mxu1 %v10555_v58  ;;  %v10633_v58 = vld [vmem:[%s11357_s1 + $0xf84] ss:$8 sps:$4 sm:$0xff]   ;;  %v10628_v34 = vld [vmem:[%s11357_s1 + $0xe80] ss:$8 sps:$4 sm:$0xff]   ;;  %v10640_v39 = vld [vmem:[%s11357_s1 + $0x1174] ss:$8 sps:$4 sm:$0xff]  }
 0x635   : > { %v12270_v6 = vrot.slane %v3729_v28, %v11677_v51  ;;  %v3744_v43 = vcombine.high %v12267_v33, %v12267_v33  ;;  %v3810_v51 = vpack.c.bf16 %v12183_v11, %v12183_v11  ;;  %v10685_v26 = vld [vmem:[%s11357_s1 + $0x10f4] ss:$8 sps:$4 sm:$0xff]   ;;  %v10694_v28 = vld [vmem:[%s11357_s1 + $0x11e4] ss:$8 sps:$4 sm:$0xff]  }
 0x636   : > { %7865 = vmatpush1.bf16.msra.mxu0 %v10550_v37  ;;  %v10631_v37 = vld [vmem:[%s11357_s1 + $0xf80] ss:$8 sps:$4 sm:$0xff]  }
 0x637   : > { %7906 = vmatpush1.bf16.msra.mxu1 %v10553_v38  ;;  %7866 = vmatprep.subr.bf16.mxu0 %v10558_v13  ;;  %v10637_v38 = vld [vmem:[%s11357_s1 + $0x1074] ss:$8 sps:$4 sm:$0xff]   ;;  %v3745_v13 = vcombine.high %v12270_v6, %v12270_v6 }
 0x638   : > { %7907 = vmatprep.subr.bf16.mxu1 %v10561_v60  ;;  %v3812_v60 = vpack.c.bf16 %v12186_v48, %v12186_v48  ;;  %v10641_v48 = vld [vmem:[%s11357_s1 + $0x1060] ss:$8 sps:$4 sm:$0xff]  }
 0x63a   : > { %7867 = vmatpush1.bf16.msra.mxu0 %v10556_v2  ;;  %v10635_v2 = vld [vmem:[%s11357_s1 + $0x1070] ss:$8 sps:$4 sm:$0xff]  }
 0x63b   : > { %7908 = vmatpush1.bf16.msra.mxu1 %v10559_v45  ;;  %7868 = vmatprep.subr.bf16.mxu0 %v10564_v46  ;;  %v10638_v45 = vld [vmem:[%s11357_s1 + $0x1170] ss:$8 sps:$4 sm:$0xff]   ;;  %v10643_v46 = vld [vmem:[%s11357_s1 + $0x1064] ss:$8 sps:$4 sm:$0xff]  }
 0x63c   : > { %7909 = vmatprep.subr.bf16.mxu1 %v10567_v47  ;;  %v10646_v47 = vld [vmem:[%s11357_s1 + $0x1164] ss:$8 sps:$4 sm:$0xff]  }
 0x63e   : > { %7869 = vmatpush1.bf16.msra.mxu0 %v10562_v53  ;;  %v3815_v53 = vpack.c.bf16 %v3744_v43, %v3744_v43  ;;  %v10701_v43 = vld [vmem:[%s11357_s1 + $0x10c0] ss:$8 sps:$4 sm:$0xff]  }
 0x63f   : > { %7910 = vmatpush1.bf16.msra.mxu1 %v10565_v22  ;;  %7870 = vmatprep.subr.bf16.mxu0 %v10570_v55  ;;  %v3817_v22 = vpack.c.bf16 %v3745_v13, %v3745_v13  ;;  %v10704_v13 = vld [vmem:[%s11357_s1 + $0x11c0] ss:$8 sps:$4 sm:$0xff]  }
 0x640   : > { %7911 = vmatprep.subr.bf16.mxu1 %v10573_v57 }
 0x642   : > { %7871 = vmatpush1.bf16.msra.mxu0 %v10568_v59  ;;  %v10644_v59 = vld [vmem:[%s11357_s1 + $0x1160] ss:$8 sps:$4 sm:$0xff]  }
 0x643   : > { %7912 = vmatpush1.bf16.msra.mxu1 %v10571_v61  ;;  %7872 = vmatprep.subr.bf16.mxu0 %v10576_v36 }
 0x644   : > { %7913 = vmatprep.subr.bf16.mxu1 %v10579_v40  ;;  %v10649_v40 = vld [vmem:[%s11357_s1 + $0x1054] ss:$8 sps:$4 sm:$0xff]  }
 0x646   : > { %7873 = vmatpush1.bf16.msra.mxu0 %v10574_v62  ;;  %v10652_v62 = vld [vmem:[%s11357_s1 + $0x1154] ss:$8 sps:$4 sm:$0xff]  }
 0x647   : > { %7914 = vmatpush1.bf16.msra.mxu1 %v10577_v54  ;;  %7874 = vmatprep.subr.bf16.mxu0 %v10582_v63 }
 0x648   : > { %7915 = vmatprep.subr.bf16.mxu1 %v10585_v4 }
 0x64a   : > { %7875 = vmatpush1.bf16.msra.mxu0 %v10580_v0 }
 0x64b   : > { %7916 = vmatpush1.bf16.msra.mxu1 %v10583_v3  ;;  %7876 = vmatprep.subr.bf16.mxu0 %v10588_v49  ;;  %v10647_v3 = vld [vmem:[%s11357_s1 + $0x1050] ss:$8 sps:$4 sm:$0xff]  }
 0x64c   : > { %7917 = vmatprep.subr.bf16.mxu1 %v10591_v5  ;;  %v10650_v49 = vld [vmem:[%s11357_s1 + $0x1150] ss:$8 sps:$4 sm:$0xff]  }
 0x64e   : > { %7877 = vmatpush2.bf16.msra.mxu0 %v10586_v23 }
 0x64f   : > { %7918 = vmatpush2.bf16.msra.mxu1 %v10589_v1  ;;  %7878 = vmatprep.subr.bf16.mxu0 %v10594_v8  ;;  %v10658_v1 = vld [vmem:[%s11357_s1 + $0x1144] ss:$8 sps:$4 sm:$0xff]   ;;  %v10653_v8 = vld [vmem:[%s11357_s1 + $0x1040] ss:$8 sps:$4 sm:$0xff]  }
 0x650   : > { %7919 = vmatprep.subr.bf16.mxu1 %v10597_v9  ;;  %v10656_v9 = vld [vmem:[%s11357_s1 + $0x1140] ss:$8 sps:$4 sm:$0xff]  }
 0x652   : > { %7879 = vmatpush2.bf16.msra.mxu0 %v10592_v29  ;;  %v10661_v29 = vld [vmem:[%s11357_s1 + $0x1034] ss:$8 sps:$4 sm:$0xff]  }
 0x653   : > { %7920 = vmatpush2.bf16.msra.mxu1 %v10595_v10  ;;  %7880 = vmatprep.subr.bf16.mxu0 %v10600_v44  ;;  %v10664_v10 = vld [vmem:[%s11357_s1 + $0x1134] ss:$8 sps:$4 sm:$0xff]   ;;  %v10659_v44 = vld [vmem:[%s11357_s1 + $0x1030] ss:$8 sps:$4 sm:$0xff]  }
 0x654   : > { %7921 = vmatprep.subr.bf16.mxu1 %v10603_v12  ;;  %v10662_v12 = vld [vmem:[%s11357_s1 + $0x1130] ss:$8 sps:$4 sm:$0xff]  }
 0x656   : > { %7881 = vmatpush2.bf16.msra.mxu0 %v10598_v41  ;;  %v10667_v41 = vld [vmem:[%s11357_s1 + $0x1024] ss:$8 sps:$4 sm:$0xff]  }
 0x657   : > { %7922 = vmatpush2.bf16.msra.mxu1 %v10601_v14  ;;  %7882 = vmatprep.subr.bf16.mxu0 %v10606_v42  ;;  %v10670_v14 = vld [vmem:[%s11357_s1 + $0x1124] ss:$8 sps:$4 sm:$0xff]   ;;  %v10665_v42 = vld [vmem:[%s11357_s1 + $0x1020] ss:$8 sps:$4 sm:$0xff]  }
 0x658   : > { %7923 = vmatprep.subr.bf16.mxu1 %v10609_v15  ;;  %v10668_v15 = vld [vmem:[%s11357_s1 + $0x1120] ss:$8 sps:$4 sm:$0xff]  }
 0x65a   : > { %7883 = vmatpush2.bf16.msra.mxu0 %v10604_v56  ;;  %v10673_v56 = vld [vmem:[%s11357_s1 + $0x1014] ss:$8 sps:$4 sm:$0xff]  }
 0x65b   : > { %7924 = vmatpush2.bf16.msra.mxu1 %v10607_v16  ;;  %7884 = vmatprep.subr.bf16.mxu0 %v10612_v17  ;;  %v10676_v16 = vld [vmem:[%s11357_s1 + $0x1114] ss:$8 sps:$4 sm:$0xff]   ;;  %v10671_v17 = vld [vmem:[%s11357_s1 + $0x1010] ss:$8 sps:$4 sm:$0xff]  }
 0x65c   : > { %7925 = vmatprep.subr.bf16.mxu1 %v10615_v18  ;;  %v10674_v18 = vld [vmem:[%s11357_s1 + $0x1110] ss:$8 sps:$4 sm:$0xff]  }
 0x65e   : > { %7885 = vmatpush2.bf16.msra.mxu0 %v10610_v19  ;;  %v10679_v19 = vld [vmem:[%s11357_s1 + $0x1004] ss:$8 sps:$4 sm:$0xff]  }
 0x65f   : > { %7926 = vmatpush2.bf16.msra.mxu1 %v10613_v20  ;;  %7886 = vmatprep.subr.bf16.mxu0 %v10618_v24  ;;  %v10682_v20 = vld [vmem:[%s11357_s1 + $0x1104] ss:$8 sps:$4 sm:$0xff]   ;;  %v10677_v24 = vld [vmem:[%s11357_s1 + $0x1000] ss:$8 sps:$4 sm:$0xff]  }
 0x660   : > { %7927 = vmatprep.subr.bf16.mxu1 %v10621_v25  ;;  %v10680_v25 = vld [vmem:[%s11357_s1 + $0x1100] ss:$8 sps:$4 sm:$0xff]  }
 0x662   : > { %7887 = vmatpush2.bf16.msra.mxu0 %v10616_v21  ;;  %v10688_v21 = vld [vmem:[%s11357_s1 + $0x11f4] ss:$8 sps:$4 sm:$0xff]  }
 0x663   : > { %7928 = vmatpush2.bf16.msra.mxu1 %v10619_v27  ;;  %7888 = vmatprep.subr.bf16.mxu0 %v10624_v50  ;;  %v10683_v27 = vld [vmem:[%s11357_s1 + $0x10f0] ss:$8 sps:$4 sm:$0xff]  }
 0x664   : > { %7929 = vmatprep.subr.bf16.mxu1 %v10627_v52  ;;  %v10686_v50 = vld [vmem:[%s11357_s1 + $0x11f0] ss:$8 sps:$4 sm:$0xff]   ;;  %v10691_v52 = vld [vmem:[%s11357_s1 + $0x10e4] ss:$8 sps:$4 sm:$0xff]  }
 0x666   : > { %7889 = vmatpush2.bf16.msra.mxu0 %v10622_v30  ;;  %v10689_v30 = vld [vmem:[%s11357_s1 + $0x10e0] ss:$8 sps:$4 sm:$0xff]  }
 0x667   : > { %7930 = vmatpush2.bf16.msra.mxu1 %v10625_v32  ;;  %7890 = vmatprep.subr.bf16.mxu0 %v10630_v7  ;;  %v10692_v32 = vld [vmem:[%s11357_s1 + $0x11e0] ss:$8 sps:$4 sm:$0xff]   ;;  %v10697_v7 = vld [vmem:[%s11357_s1 + $0x10d4] ss:$8 sps:$4 sm:$0xff]  }
 0x668   : > { %7931 = vmatprep.subr.bf16.mxu1 %v10633_v58  ;;  %v10700_v58 = vld [vmem:[%s11357_s1 + $0x11d4] ss:$8 sps:$4 sm:$0xff]  }
 0x66a   : > { %7891 = vmatpush2.bf16.msra.mxu0 %v10628_v34  ;;  %v10695_v34 = vld [vmem:[%s11357_s1 + $0x10d0] ss:$8 sps:$4 sm:$0xff]  }
 0x66b   : > { %7932 = vmatpush2.bf16.msra.mxu1 %v10631_v37  ;;  %7942 = vmatprep.subr.bf16.mxu0 %v10637_v38  ;;  %v10698_v37 = vld [vmem:[%s11357_s1 + $0x11d0] ss:$8 sps:$4 sm:$0xff]   ;;  %v10703_v38 = vld [vmem:[%s11357_s1 + $0x10c4] ss:$8 sps:$4 sm:$0xff]  }
 0x66c   : > { %7983 = vmatprep.subr.bf16.mxu1 %v10640_v39  ;;  %v10706_v39 = vld [vmem:[%s11357_s1 + $0x11c4] ss:$8 sps:$4 sm:$0xff]  }
 0x66d   : > { %v7648_v55 = vpop.f32.mrf.mxu0  ;;  %7893 = vmatmul.mubr.bf16.vlgmr.msra.gmra.mxu0 %v3810_v51  ;;  %v10709_v51 = vld [vmem:[%s11357_s1 + $0x10b4] ss:$8 sps:$4 sm:$0xff]  }
 0x66e   : > { %v7689_v57 = vpop.f32.mrf.mxu1  ;;  %7934 = vmatmul.mubr.bf16.vlgmr.msra.gmra.mxu1 %v3812_v60  ;;  %v7649_v11 = vadd.f32 %v7648_v55, %v12209_v31  ;;  %7943 = vmatpush1.bf16.msra.mxu0 %v10635_v2  ;;  %v10712_v60 = vld [vmem:[%s11357_s1 + $0x11b4] ss:$8 sps:$4 sm:$0xff]   ;;  %v10707_v2 = vld [vmem:[%s11357_s1 + $0x10b0] ss:$8 sps:$4 sm:$0xff]  }
 0x66f   : > { %7984 = vmatpush1.bf16.msra.mxu1 %v10638_v45  ;;  %v7650_v61 = vpop.f32.mrf.mxu0  ;;  %7944 = vmatprep.subr.bf16.mxu0 %v10643_v46  ;;  %v10710_v45 = vld [vmem:[%s11357_s1 + $0x11b0] ss:$8 sps:$4 sm:$0xff]   ;;  %v10715_v46 = vld [vmem:[%s11357_s1 + $0x10a4] ss:$8 sps:$4 sm:$0xff]   ;;  %v10721_v55 = vld [vmem:[%s11357_s1 + $0x1094] ss:$8 sps:$4 sm:$0xff]  }
 0x670   : > { %v7691_v36 = vpop.f32.mrf.mxu1  ;;  %7985 = vmatprep.subr.bf16.mxu1 %v10646_v47  ;;  %v12293_v54 = vadd.f32 %v7689_v57, %v7649_v11  ;;  %v7651_v63 = vadd.f32 %v7650_v61, %v12212_v35  ;;  %7974 = vmatprep.mubr.bf16.mxu0 %v3815_v53  ;;  %v10655_v35 = vld [vmem:[%s11357_s1 + $0x1044] ss:$8 sps:$4 sm:$0xff]   ;;  %v10713_v53 = vld [vmem:[%s11357_s1 + $0x10a0] ss:$8 sps:$4 sm:$0xff]   ;;  %v10724_v57 = vld [vmem:[%s11357_s1 + $0x1194] ss:$8 sps:$4 sm:$0xff]  }
 0x671   : > { %8015 = vmatprep.mubr.bf16.mxu1 %v3817_v22  ;;  %v7652_v31 = vpop.f32.mrf.mxu0  ;;  %v10718_v47 = vld [vmem:[%s11357_s1 + $0x11a4] ss:$8 sps:$4 sm:$0xff]   ;;  %v10716_v22 = vld [vmem:[%s11357_s1 + $0x11a0] ss:$8 sps:$4 sm:$0xff]   ;;  %v10719_v11 = vld [vmem:[%s11357_s1 + $0x1090] ss:$8 sps:$4 sm:$0xff]  }
 0x672   : > { %v7693_v4 = vpop.f32.mrf.mxu1  ;;  %v12296_v0 = vadd.f32 %v7691_v36, %v7651_v63  ;;  %7945 = vmatpush1.bf16.msra.mxu0 %v10641_v48  ;;  %v10722_v48 = vld [vmem:[%s11357_s1 + $0x1190] ss:$8 sps:$4 sm:$0xff]   ;;  %v10730_v61 = vld [vmem:[%s11357_s1 + $0x1184] ss:$8 sps:$4 sm:$0xff]   ;;  %v10725_v36 = vld [vmem:[%s11357_s1 + $0x1080] ss:$8 sps:$4 sm:$0xff]   ;;  %v3816_v63 = vpack.c.bf16 %v12270_v6, %v12270_v6 }
 0x673   : > { %7986 = vmatpush1.bf16.msra.mxu1 %v10644_v59  ;;  %v7653_v5 = vpop.f32.mrf.mxu0  ;;  %7946 = vmatprep.subr.bf16.mxu0 %v10649_v40  ;;  %v10727_v59 = vld [vmem:[%s11357_s1 + $0x1084] ss:$8 sps:$4 sm:$0xff]   ;;  %v10728_v40 = vld [vmem:[%s11357_s1 + $0x1180] ss:$8 sps:$4 sm:$0xff]  }
 0x674   : > { %v7694_v23 = vpop.f32.mrf.mxu1  ;;  %7987 = vmatprep.subr.bf16.mxu1 %v10652_v62  ;;  %v3814_v62 = vpack.c.bf16 %v12267_v33, %v12267_v33 }
 0x676   : > { %7947 = vmatpush1.bf16.msra.mxu0 %v10647_v3 }
 0x677   : > { %7988 = vmatpush1.bf16.msra.mxu1 %v10650_v49  ;;  %7948 = vmatprep.subr.bf16.mxu0 %v10655_v35 }
 0x678   : > { %7989 = vmatprep.subr.bf16.mxu1 %v10658_v1 }
 0x67a   : > { %7949 = vmatpush1.bf16.msra.mxu0 %v10653_v8 }
 0x67b   : > { %7990 = vmatpush1.bf16.msra.mxu1 %v10656_v9  ;;  %7950 = vmatprep.subr.bf16.mxu0 %v10661_v29  ;;  %v8058_v29 = vld [vmem:[%s11365_s17 + $0xf8] sm:$0xff] }
 0x67c   : > { %7991 = vmatprep.subr.bf16.mxu1 %v10664_v10  ;;  %v8042_v10 = vld [vmem:[%s11365_s17 + $0x78] sm:$0xff] }
 0x67e   : > { %7951 = vmatpush1.bf16.msra.mxu0 %v10659_v44  ;;  %v8057_v44 = vld [vmem:[%s11365_s17 + $0xf0] sm:$0xff] }
 0x67f   : > { %7992 = vmatpush1.bf16.msra.mxu1 %v10662_v12  ;;  %7952 = vmatprep.subr.bf16.mxu0 %v10667_v41  ;;  %v8056_v12 = vld [vmem:[%s11365_s17 + $0xe8] sm:$0xff]  ;;  %v8055_v41 = vld [vmem:[%s11365_s17 + $0xe0] sm:$0xff] }
 0x680   : > { %7993 = vmatprep.subr.bf16.mxu1 %v10670_v14  ;;  %v8039_v14 = vld [vmem:[%s11365_s17 + $0x60] sm:$0xff] }
 0x682   : > { %7953 = vmatpush1.bf16.msra.mxu0 %v10665_v42  ;;  %v8054_v42 = vld [vmem:[%s11365_s17 + $0xd8] sm:$0xff] }
 0x683   : > { %7994 = vmatpush1.bf16.msra.mxu1 %v10668_v15  ;;  %7954 = vmatprep.subr.bf16.mxu0 %v10673_v56  ;;  %v8038_v15 = vld [vmem:[%s11365_s17 + $0x58] sm:$0xff]  ;;  %v8053_v56 = vld [vmem:[%s11365_s17 + $0xd0] sm:$0xff] }
 0x684   : > { %7995 = vmatprep.subr.bf16.mxu1 %v10676_v16  ;;  %v8037_v16 = vld [vmem:[%s11365_s17 + $0x50] sm:$0xff] }
 0x686   : > { %7955 = vmatpush1.bf16.msra.mxu0 %v10671_v17  ;;  %v8052_v17 = vld [vmem:[%s11365_s17 + $0xc8] sm:$0xff] }
 0x687   : > { %7996 = vmatpush1.bf16.msra.mxu1 %v10674_v18  ;;  %7956 = vmatprep.subr.bf16.mxu0 %v10679_v19  ;;  %v8036_v18 = vld [vmem:[%s11365_s17 + $0x48] sm:$0xff]  ;;  %v8051_v19 = vld [vmem:[%s11365_s17 + $0xc0] sm:$0xff] }
 0x688   : > { %7997 = vmatprep.subr.bf16.mxu1 %v10682_v20  ;;  %v8035_v20 = vld [vmem:[%s11365_s17 + $0x40] sm:$0xff] }
 0x68a   : > { %7957 = vmatpush1.bf16.msra.mxu0 %v10677_v24  ;;  %v8050_v24 = vld [vmem:[%s11365_s17 + $0xb8] sm:$0xff] }
 0x68b   : > { %7998 = vmatpush1.bf16.msra.mxu1 %v10680_v25  ;;  %7958 = vmatprep.subr.bf16.mxu0 %v10685_v26  ;;  %v8034_v25 = vld [vmem:[%s11365_s17 + $0x38] sm:$0xff]  ;;  %v8049_v26 = vld [vmem:[%s11365_s17 + $0xb0] sm:$0xff] }
 0x68c   : > { %7999 = vmatprep.subr.bf16.mxu1 %v10688_v21  ;;  %v8033_v21 = vld [vmem:[%s11365_s17 + $0x30] sm:$0xff] }
 0x68e   : > { %7959 = vmatpush2.bf16.msra.mxu0 %v10683_v27  ;;  %v8048_v27 = vld [vmem:[%s11365_s17 + $0xa8] sm:$0xff] }
 0x68f   : > { %8000 = vmatpush2.bf16.msra.mxu1 %v10686_v50  ;;  %7960 = vmatprep.subr.bf16.mxu0 %v10691_v52  ;;  %v8032_v50 = vld [vmem:[%s11365_s17 + $0x28] sm:$0xff]  ;;  %v8047_v52 = vld [vmem:[%s11365_s17 + $0xa0] sm:$0xff] }
 0x690   : > { %8001 = vmatprep.subr.bf16.mxu1 %v10694_v28 }
 0x692   : > { %7961 = vmatpush2.bf16.msra.mxu0 %v10689_v30 }
 0x693   : > { %8002 = vmatpush2.bf16.msra.mxu1 %v10692_v32  ;;  %7962 = vmatprep.subr.bf16.mxu0 %v10697_v7  ;;  %v8031_v32 = vld [vmem:[%s11365_s17 + $0x20] sm:$0xff] }
 0x694   : > { %8003 = vmatprep.subr.bf16.mxu1 %v10700_v58  ;;  %v8046_v58 = vld [vmem:[%s11365_s17 + $0x98] sm:$0xff] }
 0x696   : > { %7963 = vmatpush2.bf16.msra.mxu0 %v10695_v34 }
 0x697   : > { %8004 = vmatpush2.bf16.msra.mxu1 %v10698_v37  ;;  %7964 = vmatprep.subr.bf16.mxu0 %v10703_v38  ;;  %v8030_v38 = vld [vmem:[%s11365_s17 + $0x18] sm:$0xff] }
 0x698   : > { %8005 = vmatprep.subr.bf16.mxu1 %v10706_v39 }
 0x69a   : > { %7965 = vmatpush2.bf16.msra.mxu0 %v10701_v43 }
 0x69b   : > { %8006 = vmatpush2.bf16.msra.mxu1 %v10704_v13  ;;  %7966 = vmatprep.subr.bf16.mxu0 %v10709_v51  ;;  %v8045_v13 = vld [vmem:[%s11365_s17 + $0x90] sm:$0xff] }
 0x69c   : > { %8007 = vmatprep.subr.bf16.mxu1 %v10712_v60 }
 0x69e   : > { %7967 = vmatpush2.bf16.msra.mxu0 %v10707_v2  ;;  %v8029_v2 = vld [vmem:[%s11365_s17 + $0x10] sm:$0xff] }
 0x69f   : > { %8008 = vmatpush2.bf16.msra.mxu1 %v10710_v45  ;;  %7968 = vmatprep.subr.bf16.mxu0 %v10715_v46  ;;  %v8044_v46 = vld [vmem:[%s11365_s17 + $0x88] sm:$0xff] }
 0x6a0   : > { %8009 = vmatprep.subr.bf16.mxu1 %v10718_v47 }
 0x6a2   : > { %7969 = vmatpush2.bf16.msra.mxu0 %v10713_v53 }
 0x6a3   : > { %8010 = vmatpush2.bf16.msra.mxu1 %v10716_v22  ;;  %7970 = vmatprep.subr.bf16.mxu0 %v10721_v55  ;;  %v8028_v22 = vld [vmem:[%s11365_s17 + $0x8] sm:$0xff]  ;;  %v8043_v55 = vld [vmem:[%s11365_s17 + $0x80] sm:$0xff] }
 0x6a4   : > { %8011 = vmatprep.subr.bf16.mxu1 %v10724_v57  ;;  %v8027_v57 = vld [vmem:[%s11365_s17] sm:$0xff] }
 0x6a6   : > { %7971 = vmatpush2.bf16.msra.mxu0 %v10719_v11 }
 0x6a7   : > { %8012 = vmatpush2.bf16.msra.mxu1 %v10722_v48  ;;  %7972 = vmatprep.subr.bf16.mxu0 %v10727_v59 }
 0x6a8   : > { %8013 = vmatprep.subr.bf16.mxu1 %v10730_v61 }
 0x6aa   : > { %7973 = vmatpush2.bf16.msra.mxu0 %v10725_v36 }
 0x6ab   : > { %8014 = vmatpush2.bf16.msra.mxu1 %v10728_v40  ;;  %9288 = vmatprep.subr.mxu0 %v8058_v29 }
 0x6ad   : > { %v7730_v31 = vpop.f32.mrf.mxu0  ;;  %7975 = vmatmul.mubr.bf16.vlgmr.msra.gmra.mxu0 %v3814_v62 }
 0x6ae   : > { %v7771_v4 = vpop.f32.mrf.mxu1  ;;  %8016 = vmatmul.mubr.bf16.vlgmr.msra.gmra.mxu1 %v3816_v63  ;;  %v7731_v3 = vadd.f32 %v7730_v31, %v12293_v54  ;;  %v8041_v54 = vld [vmem:[%s11365_s17 + $0x70] sm:$0xff]  ;;  %9289 = vmatpush3.msra.mxu0 %v8042_v10 }
 0x6af   : > { %v7732_v49 = vpop.f32.mrf.mxu0  ;;  %9290 = vmatprep.subr.mxu0 %v8057_v44 }
 0x6b0   : > { %v7773_v5 = vpop.f32.mrf.mxu1  ;;  %v7772_v33 = vadd.f32 %v7771_v4, %v7731_v3  ;;  %v7733_v23 = vadd.f32 %v7732_v49, %v12296_v0  ;;  %v8040_v0 = vld [vmem:[%s11365_s17 + $0x68] sm:$0xff]  ;;  %9291 = vmatpush3.msra.mxu0 %v8041_v54 }
 0x6b1   : > { %v7734_v6 = vpop.f32.mrf.mxu0  ;;  %9292 = vmatprep.subr.mxu0 %v8056_v12 }
 0x6b2   : > { %v7775_v35 = vpop.f32.mrf.mxu1  ;;  %v7774_v1 = vadd.f32 %v7773_v5, %v7733_v23  ;;  %9293 = vmatpush3.msra.mxu0 %v8040_v0 }
 0x6b3   : > { %v7735_v8 = vpop.f32.mrf.mxu0  ;;  %9294 = vmatprep.subr.mxu0 %v8055_v41 }
 0x6b4   : > { %v7776_v9 = vpop.f32.mrf.mxu1  ;;  %9295 = vmatpush3.msra.mxu0 %v8039_v14  ;;  %v8026_v14 = vld [vmem:[#allocation3] sm:$0x3] }
 0x6b5   : > { %9296 = vmatprep.subr.mxu0 %v8054_v42 }
 0x6b6   : > { %9297 = vmatpush3.msra.mxu0 %v8038_v15 }
 0x6b7   : > { %9298 = vmatprep.subr.mxu0 %v8053_v56 }
 0x6b8   : > { %9299 = vmatpush3.msra.mxu0 %v8037_v16 }
 0x6b9   : > { %9300 = vmatprep.subr.mxu0 %v8052_v17 }
 0x6ba   : > { %9301 = vmatpush3.msra.mxu0 %v8036_v18 }
 0x6bb   : > { %9302 = vmatprep.subr.mxu0 %v8051_v19 }
 0x6bc   : > { %9303 = vmatpush3.msra.mxu0 %v8035_v20 }
 0x6bd   : > { %9304 = vmatprep.subr.mxu0 %v8050_v24 }
 0x6be   : > { %9305 = vmatpush3.msra.mxu0 %v8034_v25 }
 0x6bf   : > { %9306 = vmatprep.subr.mxu0 %v8049_v26 }
 0x6c0   : > { %9307 = vmatpush3.msra.mxu0 %v8033_v21 }
 0x6c1   : > { %9308 = vmatprep.subr.mxu0 %v8048_v27 }
 0x6c2   : > { %9309 = vmatpush3.msra.mxu0 %v8032_v50 }
 0x6c3   : > { %9310 = vmatprep.subr.mxu0 %v8047_v52 }
 0x6c4   : > { %9311 = vmatpush3.msra.mxu0 %v8031_v32 }
 0x6c5   : > { %9312 = vmatprep.subr.mxu0 %v8046_v58 }
 0x6c6   : > { %9313 = vmatpush3.msra.mxu0 %v8030_v38 }
 0x6c7   : > { %9314 = vmatprep.subr.mxu0 %v8045_v13 }
 0x6c8   : > { %9315 = vmatpush3.msra.mxu0 %v8029_v2 }
 0x6c9   : > { %9316 = vmatprep.subr.mxu0 %v8044_v46 }
 0x6ca   : > { %9317 = vmatpush3.msra.mxu0 %v8028_v22 }
 0x6cb   : > { %9318 = vmatprep.subr.mxu0 %v8043_v55 }
 0x6cc   : > { %9319 = vmatpush3.msra.mxu0 %v8027_v57 }
 0x6ed   : > { %v7812_v28 = vpop.f32.mrf.mxu0 }
 0x6ee   : > { %v7853_v30 = vpop.f32.mrf.mxu1  ;;  %v7813_v7 = vadd.f32 %v7812_v28, %v7772_v33 }
 0x6ef   : > { %v7814_v34 = vpop.f32.mrf.mxu0 }
 0x6f0   : > { %v7855_v37 = vpop.f32.mrf.mxu1  ;;  %v7854_v39 = vadd.f32 %v7853_v30, %v7813_v7  ;;  %v7815_v43 = vadd.f32 %v7814_v34, %v7774_v1 }
 0x6f1   : > { %v7816_v51 = vpop.f32.mrf.mxu0 }
 0x6f2   : > { %v7857_v60 = vpop.f32.mrf.mxu1  ;;  %v7856_v45 = vadd.f32 %v7855_v37, %v7815_v43 }
 0x6f3   : > { %v7817_v47 = vpop.f32.mrf.mxu0 }
 0x6f4   : > { %v7858_v53 = vpop.f32.mrf.mxu1 }
 0x72d   : > { %v7894_v11 = vpop.f32.mrf.mxu0 }
 0x72e   : > { %v7935_v48 = vpop.f32.mrf.mxu1  ;;  %v7895_v59 = vadd.f32 %v7894_v11, %v7854_v39 }
 0x72f   : > { %v7896_v61 = vpop.f32.mrf.mxu0 }
 0x730   : > { %v7937_v36 = vpop.f32.mrf.mxu1  ;;  %v7936_v40 = vadd.f32 %v7935_v48, %v7895_v59  ;;  %v7897_v3 = vadd.f32 %v7896_v61, %v7856_v45 }
 0x731   : > { %v7898_v62 = vpop.f32.mrf.mxu0 }
 0x732   : > { %v7939_v63 = vpop.f32.mrf.mxu1  ;;  %v7938_v33 = vadd.f32 %v7937_v36, %v7897_v3 }
 0x733   : > { %v7899_v31 = vpop.f32.mrf.mxu0 }
 0x734   : > { %v7940_v4 = vpop.f32.mrf.mxu1 }
 0x76d   : > { %v7976_v49 = vpop.f32.mrf.mxu0 }
 0x76e   : > { %v8017_v5 = vpop.f32.mrf.mxu1  ;;  %v7977_v23 = vadd.f32 %v7976_v49, %v7936_v40 }
 0x76f   : > { %v7978_v6 = vpop.f32.mrf.mxu0 }
 0x770   : > { %v8019_v35 = vpop.f32.mrf.mxu1  ;;  %v7979_v1 = vadd.f32 %v7978_v6, %v7938_v33  ;;  %v8018_v8 = vadd.f32 %v8017_v5, %v7977_v23 }
 0x771   : > { %v7980_v9 = vpop.f32.mrf.mxu0 }
 0x772   : > { %v8021_v29 = vpop.f32.mrf.mxu1  ;;  %v8020_v10 = vadd.f32 %v8019_v35, %v7979_v1  ;;  %v8024_v0 = vmax.f32 %v8018_v8, 0.0 }
 0x773   : > { %v7981_v44 = vpop.f32.mrf.mxu0 }
 0x774   : > { %v8022_v54 = vpop.f32.mrf.mxu1  ;;  %v8025_v12 = vmax.f32 %v8020_v10, 0.0 }
 0x776   : > { %8123 = vmatprep.mubr.f32.mxu0 %v8025_v12 }
 0x777   : > { %8124 = vmatmul.mubr.f32.vlgmr.msra.gmra.mxu0 %v8024_v0 }
 0x837   : > { %v9320_v41 = vpop.f32.mrf.mxu0 }
 0x839   : > { %v9321_v42 = vpop.f32.mrf.mxu0 }
 0x83a   : > { %v9322_v15 = vadd.f32 %v9321_v42, %v9320_v41  ;;  %8134 = sbr.rel (%p9279_p2) target bundleno = 2340 (0x924), region = 108 }
 0x83c   : > { %v8129_v56 = vadd.f32 %v9322_v15, %v8026_v14 }
 0x83e   : > { %8130 = vst [vmem:[#allocation3] sm:$0x3] %v8129_v56 }
 0x83f   : > { %v8160_v16 = vld [vmem:[%s12543_s3 + $0x78] sm:$0xff]  ;;  %v11073_v17 = vmov 0.0   ;;  %v8159_v18 = vld [vmem:[%s12543_s3 + $0x70] sm:$0xff]  ;;  %vm11074_vm3 = vmmov 0   ;;  %v8158_v19 = vld [vmem:[%s12543_s3 + $0x68] sm:$0xff]  ;;  %vm8238_vm4 = vcmask 25600  }
 0x840   : > { %9340 = vmatprep.subr.mxu0 %v11073_v17  ;;  %9372 = vmatprep.mubr.msk.f32.mxu0 %vm11074_vm3, %v11073_v17  ;;  %v8157_v20 = vld [vmem:[%s12543_s3 + $0x60] sm:$0xff]  ;;  %v8156_v24 = vld [vmem:[%s12543_s3 + $0x58] sm:$0xff]  ;;  %v8155_v25 = vld [vmem:[%s12543_s3 + $0x50] sm:$0xff] }
 0x841   : > { %9341 = vmatpush3.msra.mxu0 %v8160_v16  ;;  %v8154_v26 = vld [vmem:[%s12543_s3 + $0x48] sm:$0xff]  ;;  %v8153_v21 = vld [vmem:[%s12543_s3 + $0x40] sm:$0xff]  ;;  %v8152_v27 = vld [vmem:[%s12543_s3 + $0x38] sm:$0xff] }
 0x842   : > { %9342 = vmatprep.subr.mxu0 %v11073_v17  ;;  %v8151_v50 = vld [vmem:[%s12543_s3 + $0x30] sm:$0xff]  ;;  %v8150_v52 = vld [vmem:[%s12543_s3 + $0x28] sm:$0xff]  ;;  %v8149_v28 = vld [vmem:[%s12543_s3 + $0x20] sm:$0xff] }
 0x843   : > { %9343 = vmatpush3.msra.mxu0 %v8159_v18  ;;  %v9280_v32 = vld [vmem:[#allocation15] ss:$0 sm:$0xff]  ;;  %v8148_v7 = vld [vmem:[%s12543_s3 + $0x18] sm:$0xff]  ;;  %v8146_v37 = vld [vmem:[%s12543_s3 + $0x8] sm:$0xff] }
 0x844   : > { %9344 = vmatprep.subr.mxu0 %v11073_v17  ;;  %v8147_v58 = vld [vmem:[%s12543_s3 + $0x10] sm:$0xff]  ;;  %v8145_v38 = vld [vmem:[%s12543_s3] sm:$0xff] }
 0x845   : > { %9345 = vmatpush3.msra.mxu0 %v8158_v19  ;;  %v8135_v30 = vld [vmem:[#allocation3] sm:$0x3]  ;;  %v9281_v43 = vld [vmem:[#allocation16] ss:$0 sm:$0xff] }
 0x846   : > { %9346 = vmatprep.subr.mxu0 %v11073_v17  ;;  %v8143_v34 = vadd.f32 %v9280_v32, %v8135_v30 }
 0x847   : > { %9347 = vmatpush3.msra.mxu0 %v8157_v20 }
 0x848   : > { %9348 = vmatprep.subr.mxu0 %v11073_v17  ;;  %v8144_v39 = vmax.f32 %v8143_v34, 0.0 }
 0x849   : > { %9349 = vmatpush3.msra.mxu0 %v8156_v24 }
 0x84a   : > { %9350 = vmatprep.subr.mxu0 %v11073_v17 }
 0x84b   : > { %9351 = vmatpush3.msra.mxu0 %v8155_v25 }
 0x84c   : > { %9352 = vmatprep.subr.mxu0 %v11073_v17 }
 0x84d   : > { %9353 = vmatpush3.msra.mxu0 %v8154_v26 }
 0x84e   : > { %9354 = vmatprep.subr.mxu0 %v11073_v17 }
 0x84f   : > { %9355 = vmatpush3.msra.mxu0 %v8153_v21 }
 0x850   : > { %9356 = vmatprep.subr.mxu0 %v11073_v17 }
 0x851   : > { %9357 = vmatpush3.msra.mxu0 %v8152_v27 }
 0x852   : > { %9358 = vmatprep.subr.mxu0 %v11073_v17 }
 0x853   : > { %9359 = vmatpush3.msra.mxu0 %v8151_v50 }
 0x854   : > { %9360 = vmatprep.subr.mxu0 %v11073_v17 }
 0x855   : > { %9361 = vmatpush3.msra.mxu0 %v8150_v52 }
 0x856   : > { %9362 = vmatprep.subr.mxu0 %v11073_v17 }
 0x857   : > { %9363 = vmatpush3.msra.mxu0 %v8149_v28 }
 0x858   : > { %9364 = vmatprep.subr.mxu0 %v11073_v17 }
 0x859   : > { %9365 = vmatpush3.msra.mxu0 %v8148_v7 }
 0x85a   : > { %9366 = vmatprep.subr.mxu0 %v11073_v17 }
 0x85b   : > { %9367 = vmatpush3.msra.mxu0 %v8147_v58 }
 0x85c   : > { %9368 = vmatprep.subr.mxu0 %v11073_v17 }
 0x85d   : > { %9369 = vmatpush3.msra.mxu0 %v8146_v37 }
 0x85e   : > { %9370 = vmatprep.subr.mxu0 %v11073_v17 }
 0x85f   : > { %9371 = vmatpush3.msra.mxu0 %v8145_v38 }
 0x860   : > { %9373 = vmatmul.mubr.f32.vlgmr.msra.gmra.mxu0 %v8144_v39 }
 0x920   : > { %v8234_v13 = vpop.f32.mrf.mxu0 }
 0x921   : > { %v8235_v51 = vadd.f32 %v9281_v43, %v8234_v13 }
 0x922   : > { %v9374_v60 = vpop.f32.mrf.mxu0 }
 0x923   : > { %8239 = vst.msk [vmem:[#allocation17] sm:$0x3] %vm8238_vm4, %v8235_v51 }
 0x924 PF: > { %p9454_p13 = scmp.eq.s32.totalorder %s11157_s23, 1  ;;  %s11075_s16 = smov [#allocation17]  }
 0x925   : > { %s8247_s1 = sshll.u32 %s11075_s16, 4  ;;  %s8248_s1 = int_to_ptr.vmem [resolvable:$true] %s8247_s1 }
 0x926   : > { %s10972_s5 = scalar_lea.vmem %s8248_s1, 32  ;;  %p10979_p6 = scmp.lt.s32.totalorder %s8248_s1, %s8248_s1 }
 0x927   : > { %p10973_p8 = scmp.ne.s32.totalorder %s8248_s1, %s10972_s5  ;;  %p10980_p7 = scmp.lt.s32.totalorder %s10972_s5, %s10972_s5 }
 0x929   : > { %p10974_p3 = pnand %p10973_p8, %p9454_p13  ;;  %p10981_p11 = por %p10980_p7, %p10979_p6 }
 0x92b   : > { %p10975_p4 = pneg %p10974_p3 }
 0x92d   : > { %p10982_p10 = pnand %p10981_p11, %p10975_p4 }
 0x92f   : > { %10985 = shalt.err (!%p10982_p10)
}
 0x930   : > { %s12544_s17 = sld [smem:[#allocation36_spill]] }
 0x936   : > { %9409 = dma.vmem_to_hbm [thread:$0]  (%p9454_p13), %s8248_s1, 32, %s12544_s17, [#allocation6]  }
 0x937   : > { %11037 = dma.done.wait (%p9454_p13), [#allocation6], 32  }
 0x938   : > { %11039 = vsyncadd (%p9454_p13), [#allocation6], 4294967264 }
 0x939 PF: > { %s12545_s20 = sld [smem:[#allocation27_spill]] }
 0x93a   : > { %s12546_s17 = sld [smem:[#allocation25_spill]] }
 0x93b   : > { %s12547_s18 = sld [smem:[#allocation26_spill]] }
 0x93c   : > { %s12548_s19 = sld [smem:[#allocation28_spill]] }
 0x93f   : > { %p22_p5 = scmp.ge.s32.totalorder %s12545_s20, 4  }
 0x941   :  { %24 = sbr.rel (!%p22_p5) target bundleno = 13 (0xd), region = 182 }
 0x946   :  { %8260 = vsyncpa [#allocation5], 1 }
 0x947   :  { %8262 = vsyncpa [#allocation5 + $0x1], 1 }
 0x948   :  { %8263 = vsyncpa [#allocation8], 1 }
 0x949   :  { %8264 = vsyncpa [#allocation11], 1 }
 0x94a   :  { %8265 = vsyncpa [#allocation6], 1 }
 0x94b   :  { %8267 = vsyncpa [#allocation6 + $0x1], 1 }

</bundles_post_ra>
